<compile_context>
chip_gen: v5e
topology: v5e:2x2
jax: 0.10.0
libtpu: 0.0.40
codegen_flags: <defaults>
</compile_context>

<pallas_src>
import jax
import jax.numpy as jnp
from jax.experimental import pallas as pl
from jax.experimental.pallas import tpu as pltpu

# NTU joint-merge groups from the reference module (merge_list order).
MERGE_LIST = [[2, 3], [20, 1, 0], [8, 9, 10], [11, 23, 24], [4, 5, 6],
              [7, 21, 22], [16, 17], [18, 19], [12, 13], [14, 15]]


def _time_perm(T):
    """Digit-reversed time order: pos=(p1,p2,t4) -> t = 4*t4 + 2*p2 + p1.

    With this ordering, the even/odd-t split needed by reduction1 and the
    even/odd-t2 split needed by reduction2 both become contiguous
    top/bottom-half row slices.
    """
    T4 = T // 4
    return [4 * t4 + 2 * p2 + p1
            for p1 in range(2) for p2 in range(2) for t4 in range(T4)]


# ------------------------------ fused kernel -------------------------------- #

def _make_fused_kernel(T, M):
    R = T * M        # rows per joint, ordered (t_pos, m), t_pos digit-reversed
    H = R // 2       # rows after first temporal reduction (per group)
    Q = R // 4       # rows after second temporal reduction (per joint pair)
    pos3 = [i for i, g in enumerate(MERGE_LIST) if len(g) == 3]
    n_pairs = len(MERGE_LIST) // 2
    n_pool = n_pairs * Q  # cells averaged by avg_pool2d(T/4, V') + mean over M

    def kernel(x_ref, pe_ref, wl_ref, wm_ref, w1_ref, w2_ref, wf_ref, bf_ref,
               o_ref, x0_scr):
        # ---- stgcn channel lift (K=3 VPU broadcast-FMAs) + PositionalEncoding
        # TODO(synk): TCN_GCN_unit stack (graph conv + temporal conv + BN +
        # relu) is undefined in the reference; approximated by its
        # in_channels->base 1x1 lift.
        xb = x_ref[0]                           # (V*R, Cin) f32
        acc = pe_ref[...]                       # (V*R, base)
        for k in range(xb.shape[-1]):           # Cin is tiny/static: stay off MXU
            acc = acc + xb[:, k:k + 1] * wl_ref[k:k + 1, :]
        x0_scr[...] = acc                       # joint-major: joint v -> rows [v*R,(v+1)*R)

        def joint(v):                           # (R, base) slice of joint v
            return x0_scr[pl.ds(v * R, R), :]

        # TODO(synk): PAR_Block / SPAR_Block / AttentionEmbdding are undefined
        # in the reference; spar_block0/1/2 are treated as identity here.

        # ---- withSR joint merge (5 three-joint groups -> ONE batched matmul)
        g3_rows = jnp.concatenate(
            [jnp.concatenate([joint(j) for j in MERGE_LIST[g]], axis=1)
             for g in pos3], axis=0)                         # (5R, 3*base)
        m3 = jnp.dot(g3_rows, wm_ref[...],
                     preferred_element_type=jnp.float32)     # (5R, 2*base)

        x1 = []                                              # per group (R, 2*base)
        n3 = 0
        for grp in MERGE_LIST:
            if len(grp) == 2:
                x1.append(jnp.concatenate([joint(grp[0]), joint(grp[1])], axis=1))
            else:
                x1.append(m3[n3 * R:(n3 + 1) * R, :])
                n3 += 1

        # ---- withTR even/odd temporal concat + reduction1 (all groups stacked
        # along rows; the split is a contiguous-halves slice thanks to the
        # digit-reversed time ordering).
        r1_in = jnp.concatenate(
            [jnp.concatenate([xg[:H, :], xg[H:, :]], axis=1) for xg in x1],
            axis=0)                                          # (10H, 4*base)
        r1 = jnp.dot(r1_in, w1_ref[...],
                     preferred_element_type=jnp.float32)     # (10H, 2*base)

        # ---- withSR joint-pair concat + withTR temporal concat + reduction2
        r2_blocks = []
        for p in range(n_pairs):
            a = r1[(2 * p) * H:(2 * p + 1) * H, :]           # group 2p
            b = r1[(2 * p + 1) * H:(2 * p + 2) * H, :]       # group 2p+1
            sr = jnp.concatenate([a, b], axis=1)             # (H, 4*base)
            r2_blocks.append(jnp.concatenate([sr[:Q, :], sr[Q:, :]], axis=1))
        r2_in = jnp.concatenate(r2_blocks, axis=0)           # (5Q, 8*base)
        r2 = jnp.dot(r2_in, w2_ref[...],
                     preferred_element_type=jnp.float32)     # (5Q, 4*base)

        # ---- avg_pool2d over (T/4, V') + mean over persons M + fcn (+bias)
        pooled = jnp.sum(r2, axis=0, keepdims=True) * (1.0 / n_pool)  # (1, 4*base)
        logits = jnp.dot(pooled, wf_ref[...],
                         preferred_element_type=jnp.float32) + bf_ref[...]
        o_ref[0] = logits

    return kernel


# ------------------------------ model forward ------------------------------- #

def model_forward(x, params):
    N, C, T, V, M = x.shape
    base = params["w_stgcn"].shape[1]
    num_class = params["w_fcn"].shape[1]
    assert V == 25, "merge list requires NTU 25-joint skeleton"
    assert T % 4 == 0, "two temporal reductions require T divisible by 4"

    tp = jnp.array(_time_perm(T), dtype=jnp.int32)

    # Input layout (one cheap XLA pass over the raw 19 KB input): joint-major
    # rows (v, t_pos, m) with the time axis digit-reversed.
    x_rows = jnp.transpose(x[:, :, tp, :, :], (0, 3, 2, 4, 1))  # (N, V, T, M, C)
    x_rows = x_rows.reshape(N, V * T * M, C).astype(jnp.float32)

    # PositionalEncoding -> same row layout (broadcast over persons).
    pe = params["pe"]                                            # (base, T, V)
    pe_rows = jnp.transpose(pe, (2, 1, 0))[:, tp, :]             # (V, T, base)
    pe_rows = jnp.repeat(pe_rows, M, axis=1).reshape(V * T * M, base)
    pe_rows = pe_rows.astype(jnp.float32)

    kernel = _make_fused_kernel(T, M)
    out = pl.pallas_call(
        kernel,
        out_shape=jax.ShapeDtypeStruct((N, 1, num_class), jnp.float32),
        grid=(N,),
        in_specs=[
            pl.BlockSpec((1, V * T * M, C), lambda i: (i, 0, 0)),
            pl.BlockSpec((V * T * M, base), lambda i: (0, 0)),
            pl.BlockSpec((C, base), lambda i: (0, 0)),
            pl.BlockSpec((3 * base, 2 * base), lambda i: (0, 0)),
            pl.BlockSpec((4 * base, 2 * base), lambda i: (0, 0)),
            pl.BlockSpec((8 * base, 4 * base), lambda i: (0, 0)),
            pl.BlockSpec((4 * base, num_class), lambda i: (0, 0)),
            pl.BlockSpec((1, num_class), lambda i: (0, 0)),
        ],
        out_specs=pl.BlockSpec((1, 1, num_class), lambda i: (i, 0, 0)),
        scratch_shapes=[pltpu.VMEM((V * T * M, base), jnp.float32)],
        compiler_params=pltpu.CompilerParams(
            dimension_semantics=("parallel",)),
    )(x_rows, pe_rows,
      params["w_stgcn"].astype(jnp.float32),
      params["w_merge"].astype(jnp.float32),
      params["w_red1"].astype(jnp.float32),
      params["w_red2"].astype(jnp.float32),
      params["w_fcn"].astype(jnp.float32),
      jnp.asarray(params["b_fcn"], jnp.float32).reshape(1, num_class))
    return out.reshape(N, num_class)


# ------------------------------ parameter init ------------------------------ #

def make_params(key, in_channels, base_dim, num_class, T, V):
    ks = jax.random.split(key, 6)

    def xavier(k, cin, cout):
        lim = (6.0 / (cin + cout)) ** 0.5
        return jax.random.uniform(k, (cin, cout), jnp.float32, -lim, lim)

    # TODO(synk): getSkeletonPE is undefined in the reference; synthetic PE.
    cc = jnp.arange(base_dim, dtype=jnp.float32)[:, None, None]
    tt = jnp.arange(T, dtype=jnp.float32)[None, :, None]
    vv = jnp.arange(V, dtype=jnp.float32)[None, None, :]
    pe = 0.1 * jnp.sin(0.5 * cc + 0.1 * tt + 0.3 * vv)          # (base, T, V)

    return {
        "w_stgcn": xavier(ks[0], in_channels, base_dim),
        "pe": pe,
        "w_merge": xavier(ks[1], 3 * base_dim, 2 * base_dim),
        "w_red1": xavier(ks[2], 4 * base_dim, 2 * base_dim),
        "w_red2": xavier(ks[3], 8 * base_dim, 4 * base_dim),
        "w_fcn": xavier(ks[4], 4 * base_dim, num_class),
        "b_fcn": 0.01 * jax.random.normal(ks[5], (num_class,), jnp.float32),
    }


# ---------------------------------- main ------------------------------------ #

if __name__ == "__main__":
    # V=25 (NTU joints, required by the merge list), T divisible by 4 for the
    # two temporal reductions.
    N, C_in, T, V, M = 2, 3, 16, 25, 2
    base_dim, num_class = 32, 10

    key = jax.random.PRNGKey(0)
    k_x, k_p = jax.random.split(key)
    x = jax.random.normal(k_x, (N, C_in, T, V, M), jnp.float32)
    params = make_params(k_p, C_in, base_dim, num_class, T, V)

    fwd = jax.jit(model_forward)
    out = jax.block_until_ready(fwd(x, params))
    assert out.shape == (N, num_class), out.shape
    assert bool(jnp.all(jnp.isfinite(out)))
    print("KERNEL_OK")
</pallas_src>

<mosaic_0001>
module attributes {stable_mosaic.version = 11 : i64} {
  func.func @kernel(%arg0: i32, %arg1: memref<1x800x3xf32, #tpu.memory_space<vmem>>, %arg2: memref<800x32xf32, #tpu.memory_space<vmem>>, %arg3: memref<3x32xf32, #tpu.memory_space<vmem>>, %arg4: memref<96x64xf32, #tpu.memory_space<vmem>>, %arg5: memref<128x64xf32, #tpu.memory_space<vmem>>, %arg6: memref<256x128xf32, #tpu.memory_space<vmem>>, %arg7: memref<128x10xf32, #tpu.memory_space<vmem>>, %arg8: memref<1x10xf32, #tpu.memory_space<vmem>>, %arg9: memref<1x1x10xf32, #tpu.memory_space<vmem>>, %arg10: memref<800x32xf32, #tpu.memory_space<vmem>>) attributes {dimension_semantics = [#tpu.dimension_semantics<parallel>], iteration_bounds = array<i64: 2>, scalar_prefetch = 0 : i64, scratch_operands = 1 : i64, tpu.core_type = #tpu.core_type<tc>, window_params = [{transform_indices = @transform_0, window_bounds = array<i64: 1, 800, 3>}, {pipeline_mode = #tpu.pipeline_mode<synchronous>, transform_indices = @transform_1, window_bounds = array<i64: 800, 32>}, {pipeline_mode = #tpu.pipeline_mode<synchronous>, transform_indices = @transform_2, window_bounds = array<i64: 3, 32>}, {pipeline_mode = #tpu.pipeline_mode<synchronous>, transform_indices = @transform_3, window_bounds = array<i64: 96, 64>}, {pipeline_mode = #tpu.pipeline_mode<synchronous>, transform_indices = @transform_4, window_bounds = array<i64: 128, 64>}, {pipeline_mode = #tpu.pipeline_mode<synchronous>, transform_indices = @transform_5, window_bounds = array<i64: 256, 128>}, {pipeline_mode = #tpu.pipeline_mode<synchronous>, transform_indices = @transform_6, window_bounds = array<i64: 128, 10>}, {pipeline_mode = #tpu.pipeline_mode<synchronous>, transform_indices = @transform_7, window_bounds = array<i64: 1, 10>}, {transform_indices = @transform_8, window_bounds = array<i64: 1, 1, 10>}]} {
    %c0 = arith.constant 0 : index
    %c0_0 = arith.constant 0 : index
    %c0_1 = arith.constant 0 : index
    %0 = vector.load %arg1[%c0, %c0_0, %c0_1] : memref<1x800x3xf32, #tpu.memory_space<vmem>>, vector<1x800x3xf32>
    %1 = vector.shape_cast %0 : vector<1x800x3xf32> to vector<800x3xf32>
    %c0_2 = arith.constant 0 : index
    %c0_3 = arith.constant 0 : index
    %2 = vector.load %arg2[%c0_2, %c0_3] : memref<800x32xf32, #tpu.memory_space<vmem>>, vector<800x32xf32>
    %3 = vector.extract_strided_slice %1 {offsets = [0, 0], sizes = [800, 1], strides = [1, 1]} : vector<800x3xf32> to vector<800x1xf32>
    %c0_4 = arith.constant 0 : index
    %c0_5 = arith.constant 0 : index
    %4 = vector.load %arg3[%c0_4, %c0_5] : memref<3x32xf32, #tpu.memory_space<vmem>>, vector<1x32xf32>
    %5 = vector.broadcast %3 : vector<800x1xf32> to vector<800x32xf32>
    %6 = vector.broadcast %4 : vector<1x32xf32> to vector<800x32xf32>
    %7 = arith.mulf %5, %6 : vector<800x32xf32>
    %8 = arith.addf %2, %7 : vector<800x32xf32>
    %9 = vector.extract_strided_slice %1 {offsets = [0, 1], sizes = [800, 1], strides = [1, 1]} : vector<800x3xf32> to vector<800x1xf32>
    %c1 = arith.constant 1 : index
    %c0_6 = arith.constant 0 : index
    %10 = vector.load %arg3[%c1, %c0_6] : memref<3x32xf32, #tpu.memory_space<vmem>>, vector<1x32xf32>
    %11 = vector.broadcast %9 : vector<800x1xf32> to vector<800x32xf32>
    %12 = vector.broadcast %10 : vector<1x32xf32> to vector<800x32xf32>
    %13 = arith.mulf %11, %12 : vector<800x32xf32>
    %14 = arith.addf %8, %13 : vector<800x32xf32>
    %15 = vector.extract_strided_slice %1 {offsets = [0, 2], sizes = [800, 1], strides = [1, 1]} : vector<800x3xf32> to vector<800x1xf32>
    %c2 = arith.constant 2 : index
    %c0_7 = arith.constant 0 : index
    %16 = vector.load %arg3[%c2, %c0_7] : memref<3x32xf32, #tpu.memory_space<vmem>>, vector<1x32xf32>
    %17 = vector.broadcast %15 : vector<800x1xf32> to vector<800x32xf32>
    %18 = vector.broadcast %16 : vector<1x32xf32> to vector<800x32xf32>
    %19 = arith.mulf %17, %18 : vector<800x32xf32>
    %20 = arith.addf %14, %19 : vector<800x32xf32>
    %c0_8 = arith.constant 0 : index
    %c0_9 = arith.constant 0 : index
    %21 = vector.load %arg10[%c0_8, %c0_9] : memref<800x32xf32, #tpu.memory_space<vmem>>, vector<800x32xf32>
    tpu.vector_store %arg10[%c0_8, %c0_9], %20 {strides = array<i32>} : memref<800x32xf32, #tpu.memory_space<vmem>>, vector<800x32xf32>,
    %c640 = arith.constant 640 : index
    %c0_10 = arith.constant 0 : index
    %22 = vector.load %arg10[%c640, %c0_10] : memref<800x32xf32, #tpu.memory_space<vmem>>, vector<32x32xf32>
    %c32 = arith.constant 32 : index
    %c0_11 = arith.constant 0 : index
    %23 = vector.load %arg10[%c32, %c0_11] : memref<800x32xf32, #tpu.memory_space<vmem>>, vector<32x32xf32>
    %c0_12 = arith.constant 0 : index
    %c0_13 = arith.constant 0 : index
    %24 = vector.load %arg10[%c0_12, %c0_13] : memref<800x32xf32, #tpu.memory_space<vmem>>, vector<32x32xf32>
    %25 = tpu.concatenate %22, %23, %24 in 1 : vector<32x32xf32>, vector<32x32xf32>, vector<32x32xf32> -> vector<32x96xf32>
    %c256 = arith.constant 256 : index
    %c0_14 = arith.constant 0 : index
    %26 = vector.load %arg10[%c256, %c0_14] : memref<800x32xf32, #tpu.memory_space<vmem>>, vector<32x32xf32>
    %c288 = arith.constant 288 : index
    %c0_15 = arith.constant 0 : index
    %27 = vector.load %arg10[%c288, %c0_15] : memref<800x32xf32, #tpu.memory_space<vmem>>, vector<32x32xf32>
    %c320 = arith.constant 320 : index
    %c0_16 = arith.constant 0 : index
    %28 = vector.load %arg10[%c320, %c0_16] : memref<800x32xf32, #tpu.memory_space<vmem>>, vector<32x32xf32>
    %29 = tpu.concatenate %26, %27, %28 in 1 : vector<32x32xf32>, vector<32x32xf32>, vector<32x32xf32> -> vector<32x96xf32>
    %c352 = arith.constant 352 : index
    %c0_17 = arith.constant 0 : index
    %30 = vector.load %arg10[%c352, %c0_17] : memref<800x32xf32, #tpu.memory_space<vmem>>, vector<32x32xf32>
    %c736 = arith.constant 736 : index
    %c0_18 = arith.constant 0 : index
    %31 = vector.load %arg10[%c736, %c0_18] : memref<800x32xf32, #tpu.memory_space<vmem>>, vector<32x32xf32>
    %c768 = arith.constant 768 : index
    %c0_19 = arith.constant 0 : index
    %32 = vector.load %arg10[%c768, %c0_19] : memref<800x32xf32, #tpu.memory_space<vmem>>, vector<32x32xf32>
    %33 = tpu.concatenate %30, %31, %32 in 1 : vector<32x32xf32>, vector<32x32xf32>, vector<32x32xf32> -> vector<32x96xf32>
    %c128 = arith.constant 128 : index
    %c0_20 = arith.constant 0 : index
    %34 = vector.load %arg10[%c128, %c0_20] : memref<800x32xf32, #tpu.memory_space<vmem>>, vector<32x32xf32>
    %c160 = arith.constant 160 : index
    %c0_21 = arith.constant 0 : index
    %35 = vector.load %arg10[%c160, %c0_21] : memref<800x32xf32, #tpu.memory_space<vmem>>, vector<32x32xf32>
    %c192 = arith.constant 192 : index
    %c0_22 = arith.constant 0 : index
    %36 = vector.load %arg10[%c192, %c0_22] : memref<800x32xf32, #tpu.memory_space<vmem>>, vector<32x32xf32>
    %37 = tpu.concatenate %34, %35, %36 in 1 : vector<32x32xf32>, vector<32x32xf32>, vector<32x32xf32> -> vector<32x96xf32>
    %c224 = arith.constant 224 : index
    %c0_23 = arith.constant 0 : index
    %38 = vector.load %arg10[%c224, %c0_23] : memref<800x32xf32, #tpu.memory_space<vmem>>, vector<32x32xf32>
    %c672 = arith.constant 672 : index
    %c0_24 = arith.constant 0 : index
    %39 = vector.load %arg10[%c672, %c0_24] : memref<800x32xf32, #tpu.memory_space<vmem>>, vector<32x32xf32>
    %c704 = arith.constant 704 : index
    %c0_25 = arith.constant 0 : index
    %40 = vector.load %arg10[%c704, %c0_25] : memref<800x32xf32, #tpu.memory_space<vmem>>, vector<32x32xf32>
    %41 = tpu.concatenate %38, %39, %40 in 1 : vector<32x32xf32>, vector<32x32xf32>, vector<32x32xf32> -> vector<32x96xf32>
    %42 = tpu.concatenate %25, %29, %33, %37, %41 in 0 : vector<32x96xf32>, vector<32x96xf32>, vector<32x96xf32>, vector<32x96xf32>, vector<32x96xf32> -> vector<160x96xf32>
    %c0_26 = arith.constant 0 : index
    %c0_27 = arith.constant 0 : index
    %43 = vector.load %arg4[%c0_26, %c0_27] : memref<96x64xf32, #tpu.memory_space<vmem>>, vector<96x64xf32>
    %cst = arith.constant dense<0.000000e+00> : vector<160x64xf32>
    %44 = tpu.matmul %42, %43, %cst {dimension_numbers = #tpu.dot_dimension_numbers<[1], [0], [0], [1], [0, 0, 1, 1], [], []>} : vector<160x96xf32>, vector<96x64xf32>, vector<160x64xf32> -> vector<160x64xf32>
    %c64 = arith.constant 64 : index
    %c0_28 = arith.constant 0 : index
    %45 = vector.load %arg10[%c64, %c0_28] : memref<800x32xf32, #tpu.memory_space<vmem>>, vector<32x32xf32>
    %c96 = arith.constant 96 : index
    %c0_29 = arith.constant 0 : index
    %46 = vector.load %arg10[%c96, %c0_29] : memref<800x32xf32, #tpu.memory_space<vmem>>, vector<32x32xf32>
    %47 = tpu.concatenate %45, %46 in 1 : vector<32x32xf32>, vector<32x32xf32> -> vector<32x64xf32>
    %48 = vector.extract_strided_slice %44 {offsets = [0, 0], sizes = [32, 64], strides = [1, 1]} : vector<160x64xf32> to vector<32x64xf32>
    %49 = vector.extract_strided_slice %44 {offsets = [32, 0], sizes = [32, 64], strides = [1, 1]} : vector<160x64xf32> to vector<32x64xf32>
    %50 = vector.extract_strided_slice %44 {offsets = [64, 0], sizes = [32, 64], strides = [1, 1]} : vector<160x64xf32> to vector<32x64xf32>
    %51 = vector.extract_strided_slice %44 {offsets = [96, 0], sizes = [32, 64], strides = [1, 1]} : vector<160x64xf32> to vector<32x64xf32>
    %52 = vector.extract_strided_slice %44 {offsets = [128, 0], sizes = [32, 64], strides = [1, 1]} : vector<160x64xf32> to vector<32x64xf32>
    %c512 = arith.constant 512 : index
    %c0_30 = arith.constant 0 : index
    %53 = vector.load %arg10[%c512, %c0_30] : memref<800x32xf32, #tpu.memory_space<vmem>>, vector<32x32xf32>
    %c544 = arith.constant 544 : index
    %c0_31 = arith.constant 0 : index
    %54 = vector.load %arg10[%c544, %c0_31] : memref<800x32xf32, #tpu.memory_space<vmem>>, vector<32x32xf32>
    %55 = tpu.concatenate %53, %54 in 1 : vector<32x32xf32>, vector<32x32xf32> -> vector<32x64xf32>
    %c576 = arith.constant 576 : index
    %c0_32 = arith.constant 0 : index
    %56 = vector.load %arg10[%c576, %c0_32] : memref<800x32xf32, #tpu.memory_space<vmem>>, vector<32x32xf32>
    %c608 = arith.constant 608 : index
    %c0_33 = arith.constant 0 : index
    %57 = vector.load %arg10[%c608, %c0_33] : memref<800x32xf32, #tpu.memory_space<vmem>>, vector<32x32xf32>
    %58 = tpu.concatenate %56, %57 in 1 : vector<32x32xf32>, vector<32x32xf32> -> vector<32x64xf32>
    %c384 = arith.constant 384 : index
    %c0_34 = arith.constant 0 : index
    %59 = vector.load %arg10[%c384, %c0_34] : memref<800x32xf32, #tpu.memory_space<vmem>>, vector<32x32xf32>
    %c416 = arith.constant 416 : index
    %c0_35 = arith.constant 0 : index
    %60 = vector.load %arg10[%c416, %c0_35] : memref<800x32xf32, #tpu.memory_space<vmem>>, vector<32x32xf32>
    %61 = tpu.concatenate %59, %60 in 1 : vector<32x32xf32>, vector<32x32xf32> -> vector<32x64xf32>
    %c448 = arith.constant 448 : index
    %c0_36 = arith.constant 0 : index
    %62 = vector.load %arg10[%c448, %c0_36] : memref<800x32xf32, #tpu.memory_space<vmem>>, vector<32x32xf32>
    %c480 = arith.constant 480 : index
    %c0_37 = arith.constant 0 : index
    %63 = vector.load %arg10[%c480, %c0_37] : memref<800x32xf32, #tpu.memory_space<vmem>>, vector<32x32xf32>
    %64 = tpu.concatenate %62, %63 in 1 : vector<32x32xf32>, vector<32x32xf32> -> vector<32x64xf32>
    %65 = vector.extract_strided_slice %47 {offsets = [0, 0], sizes = [16, 64], strides = [1, 1]} : vector<32x64xf32> to vector<16x64xf32>
    %66 = vector.extract_strided_slice %47 {offsets = [16, 0], sizes = [16, 64], strides = [1, 1]} : vector<32x64xf32> to vector<16x64xf32>
    %67 = tpu.concatenate %65, %66 in 1 : vector<16x64xf32>, vector<16x64xf32> -> vector<16x128xf32>
    %68 = vector.extract_strided_slice %48 {offsets = [0, 0], sizes = [16, 64], strides = [1, 1]} : vector<32x64xf32> to vector<16x64xf32>
    %69 = vector.extract_strided_slice %48 {offsets = [16, 0], sizes = [16, 64], strides = [1, 1]} : vector<32x64xf32> to vector<16x64xf32>
    %70 = tpu.concatenate %68, %69 in 1 : vector<16x64xf32>, vector<16x64xf32> -> vector<16x128xf32>
    %71 = vector.extract_strided_slice %49 {offsets = [0, 0], sizes = [16, 64], strides = [1, 1]} : vector<32x64xf32> to vector<16x64xf32>
    %72 = vector.extract_strided_slice %49 {offsets = [16, 0], sizes = [16, 64], strides = [1, 1]} : vector<32x64xf32> to vector<16x64xf32>
    %73 = tpu.concatenate %71, %72 in 1 : vector<16x64xf32>, vector<16x64xf32> -> vector<16x128xf32>
    %74 = vector.extract_strided_slice %50 {offsets = [0, 0], sizes = [16, 64], strides = [1, 1]} : vector<32x64xf32> to vector<16x64xf32>
    %75 = vector.extract_strided_slice %50 {offsets = [16, 0], sizes = [16, 64], strides = [1, 1]} : vector<32x64xf32> to vector<16x64xf32>
    %76 = tpu.concatenate %74, %75 in 1 : vector<16x64xf32>, vector<16x64xf32> -> vector<16x128xf32>
    %77 = vector.extract_strided_slice %51 {offsets = [0, 0], sizes = [16, 64], strides = [1, 1]} : vector<32x64xf32> to vector<16x64xf32>
    %78 = vector.extract_strided_slice %51 {offsets = [16, 0], sizes = [16, 64], strides = [1, 1]} : vector<32x64xf32> to vector<16x64xf32>
    %79 = tpu.concatenate %77, %78 in 1 : vector<16x64xf32>, vector<16x64xf32> -> vector<16x128xf32>
    %80 = vector.extract_strided_slice %52 {offsets = [0, 0], sizes = [16, 64], strides = [1, 1]} : vector<32x64xf32> to vector<16x64xf32>
    %81 = vector.extract_strided_slice %52 {offsets = [16, 0], sizes = [16, 64], strides = [1, 1]} : vector<32x64xf32> to vector<16x64xf32>
    %82 = tpu.concatenate %80, %81 in 1 : vector<16x64xf32>, vector<16x64xf32> -> vector<16x128xf32>
    %83 = vector.extract_strided_slice %55 {offsets = [0, 0], sizes = [16, 64], strides = [1, 1]} : vector<32x64xf32> to vector<16x64xf32>
    %84 = vector.extract_strided_slice %55 {offsets = [16, 0], sizes = [16, 64], strides = [1, 1]} : vector<32x64xf32> to vector<16x64xf32>
    %85 = tpu.concatenate %83, %84 in 1 : vector<16x64xf32>, vector<16x64xf32> -> vector<16x128xf32>
    %86 = vector.extract_strided_slice %58 {offsets = [0, 0], sizes = [16, 64], strides = [1, 1]} : vector<32x64xf32> to vector<16x64xf32>
    %87 = vector.extract_strided_slice %58 {offsets = [16, 0], sizes = [16, 64], strides = [1, 1]} : vector<32x64xf32> to vector<16x64xf32>
    %88 = tpu.concatenate %86, %87 in 1 : vector<16x64xf32>, vector<16x64xf32> -> vector<16x128xf32>
    %89 = vector.extract_strided_slice %61 {offsets = [0, 0], sizes = [16, 64], strides = [1, 1]} : vector<32x64xf32> to vector<16x64xf32>
    %90 = vector.extract_strided_slice %61 {offsets = [16, 0], sizes = [16, 64], strides = [1, 1]} : vector<32x64xf32> to vector<16x64xf32>
    %91 = tpu.concatenate %89, %90 in 1 : vector<16x64xf32>, vector<16x64xf32> -> vector<16x128xf32>
    %92 = vector.extract_strided_slice %64 {offsets = [0, 0], sizes = [16, 64], strides = [1, 1]} : vector<32x64xf32> to vector<16x64xf32>
    %93 = vector.extract_strided_slice %64 {offsets = [16, 0], sizes = [16, 64], strides = [1, 1]} : vector<32x64xf32> to vector<16x64xf32>
    %94 = tpu.concatenate %92, %93 in 1 : vector<16x64xf32>, vector<16x64xf32> -> vector<16x128xf32>
    %95 = tpu.concatenate %67, %70, %73, %76, %79, %82, %85, %88, %91, %94 in 0 : vector<16x128xf32>, vector<16x128xf32>, vector<16x128xf32>, vector<16x128xf32>, vector<16x128xf32>, vector<16x128xf32>, vector<16x128xf32>, vector<16x128xf32>, vector<16x128xf32>, vector<16x128xf32> -> vector<160x128xf32>
    %c0_38 = arith.constant 0 : index
    %c0_39 = arith.constant 0 : index
    %96 = vector.load %arg5[%c0_38, %c0_39] : memref<128x64xf32, #tpu.memory_space<vmem>>, vector<128x64xf32>
    %cst_40 = arith.constant dense<0.000000e+00> : vector<160x64xf32>
    %97 = tpu.matmul %95, %96, %cst_40 {dimension_numbers = #tpu.dot_dimension_numbers<[1], [0], [0], [1], [0, 0, 1, 1], [], []>} : vector<160x128xf32>, vector<128x64xf32>, vector<160x64xf32> -> vector<160x64xf32>
    %98 = vector.extract_strided_slice %97 {offsets = [0, 0], sizes = [16, 64], strides = [1, 1]} : vector<160x64xf32> to vector<16x64xf32>
    %99 = vector.extract_strided_slice %97 {offsets = [16, 0], sizes = [16, 64], strides = [1, 1]} : vector<160x64xf32> to vector<16x64xf32>
    %100 = tpu.concatenate %98, %99 in 1 : vector<16x64xf32>, vector<16x64xf32> -> vector<16x128xf32>
    %101 = vector.extract_strided_slice %100 {offsets = [0, 0], sizes = [8, 128], strides = [1, 1]} : vector<16x128xf32> to vector<8x128xf32>
    %102 = vector.extract_strided_slice %100 {offsets = [8, 0], sizes = [8, 128], strides = [1, 1]} : vector<16x128xf32> to vector<8x128xf32>
    %103 = tpu.concatenate %101, %102 in 1 : vector<8x128xf32>, vector<8x128xf32> -> vector<8x256xf32>
    %104 = vector.extract_strided_slice %97 {offsets = [32, 0], sizes = [16, 64], strides = [1, 1]} : vector<160x64xf32> to vector<16x64xf32>
    %105 = vector.extract_strided_slice %97 {offsets = [48, 0], sizes = [16, 64], strides = [1, 1]} : vector<160x64xf32> to vector<16x64xf32>
    %106 = tpu.concatenate %104, %105 in 1 : vector<16x64xf32>, vector<16x64xf32> -> vector<16x128xf32>
    %107 = vector.extract_strided_slice %106 {offsets = [0, 0], sizes = [8, 128], strides = [1, 1]} : vector<16x128xf32> to vector<8x128xf32>
    %108 = vector.extract_strided_slice %106 {offsets = [8, 0], sizes = [8, 128], strides = [1, 1]} : vector<16x128xf32> to vector<8x128xf32>
    %109 = tpu.concatenate %107, %108 in 1 : vector<8x128xf32>, vector<8x128xf32> -> vector<8x256xf32>
    %110 = vector.extract_strided_slice %97 {offsets = [64, 0], sizes = [16, 64], strides = [1, 1]} : vector<160x64xf32> to vector<16x64xf32>
    %111 = vector.extract_strided_slice %97 {offsets = [80, 0], sizes = [16, 64], strides = [1, 1]} : vector<160x64xf32> to vector<16x64xf32>
    %112 = tpu.concatenate %110, %111 in 1 : vector<16x64xf32>, vector<16x64xf32> -> vector<16x128xf32>
    %113 = vector.extract_strided_slice %112 {offsets = [0, 0], sizes = [8, 128], strides = [1, 1]} : vector<16x128xf32> to vector<8x128xf32>
    %114 = vector.extract_strided_slice %112 {offsets = [8, 0], sizes = [8, 128], strides = [1, 1]} : vector<16x128xf32> to vector<8x128xf32>
    %115 = tpu.concatenate %113, %114 in 1 : vector<8x128xf32>, vector<8x128xf32> -> vector<8x256xf32>
    %116 = vector.extract_strided_slice %97 {offsets = [96, 0], sizes = [16, 64], strides = [1, 1]} : vector<160x64xf32> to vector<16x64xf32>
    %117 = vector.extract_strided_slice %97 {offsets = [112, 0], sizes = [16, 64], strides = [1, 1]} : vector<160x64xf32> to vector<16x64xf32>
    %118 = tpu.concatenate %116, %117 in 1 : vector<16x64xf32>, vector<16x64xf32> -> vector<16x128xf32>
    %119 = vector.extract_strided_slice %118 {offsets = [0, 0], sizes = [8, 128], strides = [1, 1]} : vector<16x128xf32> to vector<8x128xf32>
    %120 = vector.extract_strided_slice %118 {offsets = [8, 0], sizes = [8, 128], strides = [1, 1]} : vector<16x128xf32> to vector<8x128xf32>
    %121 = tpu.concatenate %119, %120 in 1 : vector<8x128xf32>, vector<8x128xf32> -> vector<8x256xf32>
    %122 = vector.extract_strided_slice %97 {offsets = [128, 0], sizes = [16, 64], strides = [1, 1]} : vector<160x64xf32> to vector<16x64xf32>
    %123 = vector.extract_strided_slice %97 {offsets = [144, 0], sizes = [16, 64], strides = [1, 1]} : vector<160x64xf32> to vector<16x64xf32>
    %124 = tpu.concatenate %122, %123 in 1 : vector<16x64xf32>, vector<16x64xf32> -> vector<16x128xf32>
    %125 = vector.extract_strided_slice %124 {offsets = [0, 0], sizes = [8, 128], strides = [1, 1]} : vector<16x128xf32> to vector<8x128xf32>
    %126 = vector.extract_strided_slice %124 {offsets = [8, 0], sizes = [8, 128], strides = [1, 1]} : vector<16x128xf32> to vector<8x128xf32>
    %127 = tpu.concatenate %125, %126 in 1 : vector<8x128xf32>, vector<8x128xf32> -> vector<8x256xf32>
    %128 = tpu.concatenate %103, %109, %115, %121, %127 in 0 : vector<8x256xf32>, vector<8x256xf32>, vector<8x256xf32>, vector<8x256xf32>, vector<8x256xf32> -> vector<40x256xf32>
    %c0_41 = arith.constant 0 : index
    %c0_42 = arith.constant 0 : index
    %129 = vector.load %arg6[%c0_41, %c0_42] : memref<256x128xf32, #tpu.memory_space<vmem>>, vector<256x128xf32>
    %cst_43 = arith.constant dense<0.000000e+00> : vector<40x128xf32>
    %130 = tpu.matmul %128, %129, %cst_43 {dimension_numbers = #tpu.dot_dimension_numbers<[1], [0], [0], [1], [0, 0, 1, 1], [], []>} : vector<40x256xf32>, vector<256x128xf32>, vector<40x128xf32> -> vector<40x128xf32>
    %cst_44 = arith.constant dense<0.000000e+00> : vector<128xf32>
    %131 = vector.multi_reduction <add>, %130, %cst_44 [0] : vector<40x128xf32> to vector<128xf32>
    %132 = vector.shape_cast %131 : vector<128xf32> to vector<1x128xf32>
    %cst_45 = arith.constant 2.500000e-02 : f32
    %133 = vector.broadcast %cst_45 : f32 to vector<1x128xf32>
    %134 = arith.mulf %132, %133 : vector<1x128xf32>
    %c0_46 = arith.constant 0 : index
    %c0_47 = arith.constant 0 : index
    %135 = vector.load %arg7[%c0_46, %c0_47] : memref<128x10xf32, #tpu.memory_space<vmem>>, vector<128x10xf32>
    %cst_48 = arith.constant dense<0.000000e+00> : vector<1x10xf32>
    %136 = tpu.matmul %134, %135, %cst_48 {dimension_numbers = #tpu.dot_dimension_numbers<[1], [0], [0], [1], [0, 0, 1, 1], [], []>} : vector<1x128xf32>, vector<128x10xf32>, vector<1x10xf32> -> vector<1x10xf32>
    %c0_49 = arith.constant 0 : index
    %c0_50 = arith.constant 0 : index
    %137 = vector.load %arg8[%c0_49, %c0_50] : memref<1x10xf32, #tpu.memory_space<vmem>>, vector<1x10xf32>
    %138 = arith.addf %136, %137 : vector<1x10xf32>
    %c0_51 = arith.constant 0 : index
    %c0_52 = arith.constant 0 : index
    %c0_53 = arith.constant 0 : index
    %139 = vector.load %arg9[%c0_51, %c0_52, %c0_53] : memref<1x1x10xf32, #tpu.memory_space<vmem>>, vector<1x1x10xf32>
    %140 = vector.shape_cast %139 : vector<1x1x10xf32> to vector<1x10xf32>
    %141 = vector.shape_cast %138 : vector<1x10xf32> to vector<1x1x10xf32>
    tpu.vector_store %arg9[%c0_51, %c0_52, %c0_53], %141 {strides = array<i32>} : memref<1x1x10xf32, #tpu.memory_space<vmem>>, vector<1x1x10xf32>,
    return
  }
  func.func @transform_0(%arg0: i32) -> (i32, i32, i32) {
    %c0_i32 = arith.constant 0 : i32
    %c0_i32_0 = arith.constant 0 : i32
    %c0_i32_1 = arith.constant 0 : i32
    return %arg0, %c0_i32, %c0_i32_0 : i32, i32, i32
  }
  func.func @transform_1(%arg0: i32) -> (i32, i32) {
    %c0_i32 = arith.constant 0 : i32
    %c0_i32_0 = arith.constant 0 : i32
    %c0_i32_1 = arith.constant 0 : i32
    return %c0_i32, %c0_i32_0 : i32, i32
  }
  func.func @transform_2(%arg0: i32) -> (i32, i32) {
    %c0_i32 = arith.constant 0 : i32
    %c0_i32_0 = arith.constant 0 : i32
    %c0_i32_1 = arith.constant 0 : i32
    return %c0_i32, %c0_i32_0 : i32, i32
  }
  func.func @transform_3(%arg0: i32) -> (i32, i32) {
    %c0_i32 = arith.constant 0 : i32
    %c0_i32_0 = arith.constant 0 : i32
    %c0_i32_1 = arith.constant 0 : i32
    return %c0_i32, %c0_i32_0 : i32, i32
  }
  func.func @transform_4(%arg0: i32) -> (i32, i32) {
    %c0_i32 = arith.constant 0 : i32
    %c0_i32_0 = arith.constant 0 : i32
    %c0_i32_1 = arith.constant 0 : i32
    return %c0_i32, %c0_i32_0 : i32, i32
  }
  func.func @transform_5(%arg0: i32) -> (i32, i32) {
    %c0_i32 = arith.constant 0 : i32
    %c0_i32_0 = arith.constant 0 : i32
    %c0_i32_1 = arith.constant 0 : i32
    return %c0_i32, %c0_i32_0 : i32, i32
  }
  func.func @transform_6(%arg0: i32) -> (i32, i32) {
    %c0_i32 = arith.constant 0 : i32
    %c0_i32_0 = arith.constant 0 : i32
    %c0_i32_1 = arith.constant 0 : i32
    return %c0_i32, %c0_i32_0 : i32, i32
  }
  func.func @transform_7(%arg0: i32) -> (i32, i32) {
    %c0_i32 = arith.constant 0 : i32
    %c0_i32_0 = arith.constant 0 : i32
    %c0_i32_1 = arith.constant 0 : i32
    return %c0_i32, %c0_i32_0 : i32, i32
  }
  func.func @transform_8(%arg0: i32) -> (i32, i32, i32) {
    %c0_i32 = arith.constant 0 : i32
    %c0_i32_0 = arith.constant 0 : i32
    %c0_i32_1 = arith.constant 0 : i32
    return %arg0, %c0_i32, %c0_i32_0 : i32, i32, i32
  }
}

</mosaic_0001>

<bundles_post_ra>
// kernel: model_forward.1
= control target key start
LH: loop header
LB: loop body
LE: loop exit
PB: predicated region body
PF: predicated region fallthrough
CT: control target
= control target key end

     0   :  { %13 = vsyncpa [#allocation4], 0  ;;  %s6448_s0 = inlined_call_operand.vmem [shape: f32[2,800,3], index: 0, kind: input, shape index: {}]   ;;  %s6449_s1 = inlined_call_operand.vmem [shape: f32[800,32], index: 1, kind: input, shape index: {}]   ;;  %s6450_s2 = inlined_call_operand.vmem [shape: f32[3,32], index: 2, kind: input, shape index: {}]   ;;  %s6451_s3 = inlined_call_operand.vmem [shape: f32[96,64], index: 3, kind: input, shape index: {}]   ;;  %s6452_s4 = inlined_call_operand.vmem [shape: f32[128,64], index: 4, kind: input, shape index: {}]   ;;  %s6453_s5 = inlined_call_operand.vmem [shape: f32[256,128], index: 5, kind: input, shape index: {}]   ;;  %s6454_s6 = inlined_call_operand.vmem [shape: f32[128,10], index: 6, kind: input, shape index: {}]   ;;  %s6455_s7 = inlined_call_operand.vmem [shape: f32[1,10], index: 7, kind: input, shape index: {}]   ;;  %s6456_s8 = inlined_call_operand.hbm [shape: f32[2,1,10], index: 8, kind: output, shape index: {}]  }
   0x1   :  { %15 = vsyncpa [#allocation4 + $0x1], 0  ;;  %s3938_s27 = smov 0   ;;  %s3940_s28 = smov 0  }
   0x2   :  { %s3942_s29 = smov 0   ;;  %s3944_s30 = smov 0  }
   0x3 LB: > { %s3959_s9 = sadd.s32 4294967295, %s3886_s30   ;;  %s3518_s10 = sadd.s32 4294967294, %s3886_s30   ;;  %s3886_s30 = sphi %s3944_s30, %s6927_s30   ;;  %s3882_s29 = sphi %s3942_s29, %s6926_s29   ;;  %s3878_s28 = sphi %s3940_s28, %s6925_s28   ;;  %s3874_s27 = sphi %s3938_s27, %s6924_s27  }
   0x4   : > { %s3963_s11 = sadd.s32 1, %s3886_s30   ;;  %s201_s12 = sadd.s32 1, %s3882_s29 }
   0x5   : > { %s198_s13 = ssub.s32 %s3886_s30, %s3963_s11  ;;  %p211_p0 = scmp.ne.s32.totalorder %s3882_s29, %s3878_s28 }
   0x6   : > { %p199_p1 = scmp.eq.s32.totalorder %s198_s13, 0  ;;  %p212_p2 = scmp.eq.s32.totalorder %s3959_s9, 1 }
   0x7   : > { %p217_p3 = scmp.ne.s32.totalorder %s3878_s28, %s3874_s27  ;;  %p218_p4 = scmp.eq.s32.totalorder %s3518_s10, 1 }
   0x8   : > { %s3974_s14 = scalar_select %p199_p1, %s3882_s29, %s201_s12  }
   0x9   : > { %p3976_p5 = por %p212_p2, %p211_p0  ;;  %p3980_p6 = por %p218_p4, %p217_p3 }
   0xa   : > { %p3521_p7 = scmp.ge.s32.totalorder %s3886_s30, 1  ;;  %p265_p8 = scmp.lt.s32.totalorder %s3886_s30, 3 }
   0xc   : > { %p266_p9 = pnand %p3521_p7, %p265_p8 }
   0xe   : > { %269 = sbr.rel (%p266_p9) target bundleno = 2077 (0x81d), region = 52 }
  0x13   : > { %p298_p10 = scmp.lt.s32.totalorder %s3959_s9, 1  ;;  %v3888_v0 = vmov 0   ;;  %vm2409_vm0 = vcmask 261120   ;;  %s3892_s25 = smov 64   ;;  %vm2558_vm1 = vcmask 523264   ;;  %vm2783_vm2 = vcmask 785408  }
  0x14   : > { %3620 = vset.pattern.permute.xlu2 %v3888_v0  ;;  %3619 = vset.pattern.permute.xlu1 %v3888_v0  ;;  %s3459_s23 = scalar_lea.hbm %s6456_s8, %s3959_s9  ;;  %vm3448_vm3 = vcmask 73728   ;;  %s3844_s20 = scalar_lea.hbm %s6456_s8, 2 }
  0x15   : > { %3618 = vset.pattern.permute.xlu0 %v3888_v0  ;;  %s299_s17 = scalar_select %p298_p10, %s3959_s9, 1 }
  0x16   : > { %s3463_s13 = sshll.u32 %s3459_s23, 4  ;;  %s3464_s13 = int_to_ptr.hbm [resolvable:$true] %s3463_s13 }
  0x17   : > { %s3573_s18 = smul.u32 800, %s299_s17  ;;  %s3891_s17 = smov 32  }
  0x18   : > { %s3838_s19 = sshra.s32 %s3464_s13, 4  ;;  %s3839_s19 = int_to_ptr.hbm [resolvable:$true] %s3838_s19 }
  0x19   : > { %s3991_s21 = scalar_lea.vmem %s6448_s0, %s3573_s18  ;;  %p3845_p0 = scmp.lt.s32.totalorder %s3839_s19, %s6456_s8 }
  0x1a   : > { %v3994_v1 = vld [vmem:[%s3991_s21 + $0x20] sm:$0xff]  ;;  %v3997_v2 = vld [vmem:[%s3991_s21 + $0x10] sm:$0xff]  ;;  %v4006_v4 = vld [vmem:[%s3991_s21 + $0x28] sm:$0xff] }
  0x1b   : > { %v4000_v3 = vld [vmem:[%s3991_s21] sm:$0xff]  ;;  %526 = vperm.xlu2 %3620, %v3994_v1   ;;  %516 = vperm.xlu1 %3619, %v3997_v2   ;;  %v4009_v5 = vld [vmem:[%s3991_s21 + $0x18] sm:$0xff]  ;;  %v4012_v6 = vld [vmem:[%s3991_s21 + $0x8] sm:$0xff] }
  0x1c   : > { %506 = vperm.xlu0 %3618, %v4000_v3   ;;  %6510 = vst [vmem:[#allocation6_spill] sm:$0xff] %v4012_v6  ;;  %v4018_v7 = vld [vmem:[%s3991_s21 + $0x40] sm:$0xff]  ;;  %v4021_v8 = vld [vmem:[%s3991_s21 + $0x38] sm:$0xff]  ;;  %v4024_v9 = vld [vmem:[%s3991_s21 + $0x30] sm:$0xff] }
  0x1d   : > { %v4030_v10 = vld [vmem:[%s3991_s21 + $0x58] sm:$0xff]  ;;  %v4033_v11 = vld [vmem:[%s3991_s21 + $0x50] sm:$0xff]  ;;  %v4036_v12 = vld [vmem:[%s3991_s21 + $0x48] sm:$0xff] }
  0x1e   : > { %v4042_v13 = vld [vmem:[%s3991_s21 + $0x70] sm:$0xff]  ;;  %v4045_v14 = vld [vmem:[%s3991_s21 + $0x68] sm:$0xff]  ;;  %v4048_v15 = vld [vmem:[%s3991_s21 + $0x60] sm:$0xff] }
  0x1f   : > { %v4054_v16 = vld [vmem:[%s3991_s21 + $0x88] sm:$0xff]  ;;  %v4057_v17 = vld [vmem:[%s3991_s21 + $0x80] sm:$0xff]  ;;  %v4060_v18 = vld [vmem:[%s3991_s21 + $0x78] sm:$0xff] }
  0x20   : > { %v4066_v19 = vld [vmem:[%s3991_s21 + $0xa0] sm:$0xff]  ;;  %v4069_v20 = vld [vmem:[%s3991_s21 + $0x98] sm:$0xff]  ;;  %v4072_v21 = vld [vmem:[%s3991_s21 + $0x90] sm:$0xff] }
  0x21   : > { %v4078_v22 = vld [vmem:[%s3991_s21 + $0xb8] sm:$0xff]  ;;  %v4081_v23 = vld [vmem:[%s3991_s21 + $0xb0] sm:$0xff]  ;;  %v4084_v24 = vld [vmem:[%s3991_s21 + $0xa8] sm:$0xff] }
  0x22   : > { %v4090_v25 = vld [vmem:[%s3991_s21 + $0xd0] sm:$0xff]  ;;  %v4093_v26 = vld [vmem:[%s3991_s21 + $0xc8] sm:$0xff]  ;;  %v4096_v27 = vld [vmem:[%s3991_s21 + $0xc0] sm:$0xff] }
  0x23   : > { %531 = vperm.xlu2 %3620, %v4006_v4   ;;  %521 = vperm.xlu1 %3619, %v4009_v5   ;;  %v4102_v28 = vld [vmem:[%s3991_s21 + $0xe8] sm:$0xff]  ;;  %v4105_v29 = vld [vmem:[%s3991_s21 + $0xe0] sm:$0xff]  ;;  %v4108_v30 = vld [vmem:[%s3991_s21 + $0xd8] sm:$0xff] }
  0x24   : > { %511 = vperm.xlu0 %3618, %v4012_v6   ;;  %v4114_v31 = vld [vmem:[%s3991_s21 + $0x100] sm:$0xff]  ;;  %v4117_v32 = vld [vmem:[%s3991_s21 + $0xf8] sm:$0xff]  ;;  %v4120_v33 = vld [vmem:[%s3991_s21 + $0xf0] sm:$0xff] }
  0x25   : > { %v4126_v34 = vld [vmem:[%s3991_s21 + $0x118] sm:$0xff]  ;;  %v4129_v35 = vld [vmem:[%s3991_s21 + $0x110] sm:$0xff]  ;;  %v4132_v36 = vld [vmem:[%s3991_s21 + $0x108] sm:$0xff] }
  0x26   : > { %v4140_v38 = vld [vmem:[%s3991_s21 + $0x130] sm:$0xff]  ;;  %v4143_v39 = vld [vmem:[%s3991_s21 + $0x128] sm:$0xff]  ;;  %v4146_v40 = vld [vmem:[%s3991_s21 + $0x120] sm:$0xff] }
  0x27   : > { %v4154_v42 = vld [vmem:[%s3991_s21 + $0x148] sm:$0xff]  ;;  %v4157_v43 = vld [vmem:[%s3991_s21 + $0x140] sm:$0xff]  ;;  %v4160_v44 = vld [vmem:[%s3991_s21 + $0x138] sm:$0xff] }
  0x28   : > { %v4168_v46 = vld [vmem:[%s3991_s21 + $0x160] sm:$0xff]  ;;  %v4171_v47 = vld [vmem:[%s3991_s21 + $0x158] sm:$0xff]  ;;  %v4174_v48 = vld [vmem:[%s3991_s21 + $0x150] sm:$0xff] }
  0x29   : > { %v4186_v52 = vld [vmem:[%s3991_s21 + $0x178] sm:$0xff]  ;;  %v4189_v53 = vld [vmem:[%s3991_s21 + $0x170] sm:$0xff]  ;;  %v4192_v54 = vld [vmem:[%s3991_s21 + $0x168] sm:$0xff] }
  0x2a   : > { %v4204_v58 = vld [vmem:[%s3991_s21 + $0x190] sm:$0xff]  ;;  %v4207_v59 = vld [vmem:[%s3991_s21 + $0x188] sm:$0xff]  ;;  %v4210_v60 = vld [vmem:[%s3991_s21 + $0x180] sm:$0xff] }
  0x2b   : > { %546 = vperm.xlu2 %3620, %v4018_v7   ;;  %541 = vperm.xlu1 %3619, %v4021_v8   ;;  %v4222_v0 = vld [vmem:[%s3991_s21 + $0x1a8] sm:$0xff] }
  0x2c   : > { %536 = vperm.xlu0 %3618, %v4024_v9  }
  0x33   : > { %561 = vperm.xlu2 %3620, %v4030_v10   ;;  %556 = vperm.xlu1 %3619, %v4033_v11  }
  0x34   : > { %551 = vperm.xlu0 %3618, %v4036_v12  }
  0x3b   : > { %576 = vperm.xlu2 %3620, %v4042_v13   ;;  %571 = vperm.xlu1 %3619, %v4045_v14  }
  0x3c   : > { %566 = vperm.xlu0 %3618, %v4048_v15  }
  0x43   : > { %591 = vperm.xlu2 %3620, %v4054_v16   ;;  %586 = vperm.xlu1 %3619, %v4057_v17  }
  0x44   : > { %581 = vperm.xlu0 %3618, %v4060_v18  }
  0x4b   : > { %606 = vperm.xlu2 %3620, %v4066_v19   ;;  %601 = vperm.xlu1 %3619, %v4069_v20  }
  0x4c   : > { %596 = vperm.xlu0 %3618, %v4072_v21  }
  0x53   : > { %621 = vperm.xlu2 %3620, %v4078_v22   ;;  %616 = vperm.xlu1 %3619, %v4081_v23  }
  0x54   : > { %611 = vperm.xlu0 %3618, %v4084_v24  }
  0x5b   : > { %636 = vperm.xlu2 %3620, %v4090_v25   ;;  %631 = vperm.xlu1 %3619, %v4093_v26  }
  0x5c   : > { %626 = vperm.xlu0 %3618, %v4096_v27  }
  0x63   : > { %651 = vperm.xlu2 %3620, %v4102_v28   ;;  %646 = vperm.xlu1 %3619, %v4105_v29  }
  0x64   : > { %641 = vperm.xlu0 %3618, %v4108_v30  }
  0x6b   : > { %666 = vperm.xlu2 %3620, %v4114_v31   ;;  %661 = vperm.xlu1 %3619, %v4117_v32  }
  0x6c   : > { %656 = vperm.xlu0 %3618, %v4120_v33  }
  0x73   : > { %681 = vperm.xlu2 %3620, %v4126_v34   ;;  %676 = vperm.xlu1 %3619, %v4129_v35  }
  0x74   : > { %671 = vperm.xlu0 %3618, %v4132_v36  }
  0x75   : > { %v4137_v37 = vpop.permute.xlu2 %526 }
  0x76   : > { %6511 = vst [vmem:[#allocation7_spill] sm:$0xff] %v4137_v37  ;;  %v4264_v37 = vld [vmem:[%s3991_s21 + $0x1c8] sm:$0xff] }
  0x77   : > { %6533 = vst [vmem:[#allocation29_spill] sm:$0xff] %v4264_v37 }
  0x7b   : > { %696 = vperm.xlu2 %3620, %v4140_v38   ;;  %691 = vperm.xlu1 %3619, %v4143_v39  }
  0x7c   : > { %686 = vperm.xlu0 %3618, %v4146_v40  }
  0x7d   : > { %v4151_v41 = vpop.permute.xlu2 %531 }
  0x7e   : > { %6512 = vst [vmem:[#allocation8_spill] sm:$0xff] %v4151_v41  ;;  %v4243_v41 = vld [vmem:[%s3991_s21 + $0x1b8] sm:$0xff] }
  0x7f   : > { %6527 = vst [vmem:[#allocation23_spill] sm:$0xff] %v4243_v41 }
  0x83   : > { %711 = vperm.xlu2 %3620, %v4154_v42   ;;  %706 = vperm.xlu1 %3619, %v4157_v43  }
  0x84   : > { %701 = vperm.xlu0 %3618, %v4160_v44  }
  0x85   : > { %v4165_v45 = vpop.permute.xlu2 %546 }
  0x86   : > { %6513 = vst [vmem:[#allocation9_spill] sm:$0xff] %v4165_v45 }
  0x8b   : > { %726 = vperm.xlu2 %3620, %v4168_v46   ;;  %721 = vperm.xlu1 %3619, %v4171_v47  }
  0x8c   : > { %716 = vperm.xlu0 %3618, %v4174_v48  }
  0x8d   : > { %v4179_v49 = vpop.permute.xlu2 %561  ;;  %v4181_v50 = vpop.permute.xlu1 %516 }
  0x8e   : > { %6514 = vst [vmem:[#allocation10_spill] sm:$0xff] %v4179_v49  ;;  %v4183_v51 = vpop.permute.xlu0 %506  ;;  %v4225_v49 = vld [vmem:[%s3991_s21 + $0x1a0] sm:$0xff] }
  0x8f   : > { %6515 = vst [vmem:[#allocation11_spill] sm:$0xff] %v4181_v50  ;;  %v4276_v50 = vld [vmem:[%s3991_s21 + $0x1f0] sm:$0xff] }
  0x90   : > { %6516 = vst [vmem:[#allocation12_spill] sm:$0xff] %v4183_v51  ;;  %v4261_v51 = vld [vmem:[%s3991_s21 + $0x1d0] sm:$0xff] }
  0x91   : > { %6532 = vst [vmem:[#allocation28_spill] sm:$0xff] %v4261_v51 }
  0x92   : > { %6537 = vst [vmem:[#allocation33_spill] sm:$0xff] %v4276_v50 }
  0x93   : > { %741 = vperm.xlu2 %3620, %v4186_v52   ;;  %736 = vperm.xlu1 %3619, %v4189_v53  }
  0x94   : > { %731 = vperm.xlu0 %3618, %v4192_v54  }
  0x95   : > { %v4197_v55 = vpop.permute.xlu2 %576  ;;  %v4199_v56 = vpop.permute.xlu1 %521 }
  0x96   : > { %6517 = vst [vmem:[#allocation13_spill] sm:$0xff] %v4197_v55  ;;  %v4201_v57 = vpop.permute.xlu0 %511  ;;  %v4228_v55 = vld [vmem:[%s3991_s21 + $0x198] sm:$0xff] }
  0x97   : > { %6518 = vst [vmem:[#allocation14_spill] sm:$0xff] %v4199_v56  ;;  %v4240_v56 = vld [vmem:[%s3991_s21 + $0x1c0] sm:$0xff] }
  0x98   : > { %6519 = vst [vmem:[#allocation15_spill] sm:$0xff] %v4201_v57  ;;  %v4246_v57 = vld [vmem:[%s3991_s21 + $0x1b0] sm:$0xff] }
  0x99   : > { %6526 = vst [vmem:[#allocation22_spill] sm:$0xff] %v4240_v56 }
  0x9b   : > { %756 = vperm.xlu2 %3620, %v4204_v58   ;;  %751 = vperm.xlu1 %3619, %v4207_v59  }
  0x9c   : > { %746 = vperm.xlu0 %3618, %v4210_v60  }
  0x9d   : > { %v4215_v61 = vpop.permute.xlu2 %591  ;;  %v4217_v62 = vpop.permute.xlu1 %541 }
  0x9e   : > { %6520 = vst [vmem:[#allocation16_spill] sm:$0xff] %v4215_v61  ;;  %v4219_v63 = vpop.permute.xlu0 %536 }
  0x9f   : > { %6521 = vst [vmem:[#allocation17_spill] sm:$0xff] %v4217_v62  ;;  %v4258_v62 = vld [vmem:[%s3991_s21 + $0x1d8] sm:$0xff] }
  0xa0   : > { %6522 = vst [vmem:[#allocation18_spill] sm:$0xff] %v4219_v63 }
  0xa1   : > { %6531 = vst [vmem:[#allocation27_spill] sm:$0xff] %v4258_v62 }
  0xa3   : > { %771 = vperm.xlu2 %3620, %v4222_v0   ;;  %766 = vperm.xlu1 %3619, %v4225_v49  }
  0xa4   : > { %761 = vperm.xlu0 %3618, %v4228_v55  }
  0xa5   : > { %v4233_v61 = vpop.permute.xlu2 %606  ;;  %v4235_v45 = vpop.permute.xlu1 %556 }
  0xa6   : > { %6523 = vst [vmem:[#allocation19_spill] sm:$0xff] %v4233_v61  ;;  %v4237_v63 = vpop.permute.xlu0 %551 }
  0xa7   : > { %6524 = vst [vmem:[#allocation20_spill] sm:$0xff] %v4235_v45 }
  0xa8   : > { %6525 = vst [vmem:[#allocation21_spill] sm:$0xff] %v4237_v63 }
  0xab   : > { %786 = vperm.xlu2 %3620, %v4240_v56   ;;  %781 = vperm.xlu1 %3619, %v4243_v41   ;;  %v4279_v56 = vld [vmem:[%s3991_s21 + $0x1e8] sm:$0xff]  ;;  %v4282_v41 = vld [vmem:[%s3991_s21 + $0x1e0] sm:$0xff] }
  0xac   : > { %776 = vperm.xlu0 %3618, %v4246_v57   ;;  %6538 = vst [vmem:[#allocation34_spill] sm:$0xff] %v4279_v56 }
  0xad   : > { %v4251_v61 = vpop.permute.xlu2 %621  ;;  %v4253_v45 = vpop.permute.xlu1 %571  ;;  %6539 = vst [vmem:[#allocation35_spill] sm:$0xff] %v4282_v41 }
  0xae   : > { %6528 = vst [vmem:[#allocation24_spill] sm:$0xff] %v4251_v61  ;;  %v4255_v63 = vpop.permute.xlu0 %566 }
  0xaf   : > { %6529 = vst [vmem:[#allocation25_spill] sm:$0xff] %v4253_v45 }
  0xb0   : > { %6530 = vst [vmem:[#allocation26_spill] sm:$0xff] %v4255_v63 }
  0xb3   : > { %801 = vperm.xlu2 %3620, %v4258_v62   ;;  %796 = vperm.xlu1 %3619, %v4261_v51   ;;  %v4294_v62 = vld [vmem:[%s3991_s21 + $0x208] sm:$0xff]  ;;  %v4297_v51 = vld [vmem:[%s3991_s21 + $0x200] sm:$0xff] }
  0xb4   : > { %791 = vperm.xlu0 %3618, %v4264_v37   ;;  %6543 = vst [vmem:[#allocation39_spill] sm:$0xff] %v4294_v62  ;;  %v4300_v37 = vld [vmem:[%s3991_s21 + $0x1f8] sm:$0xff] }
  0xb5   : > { %v4269_v61 = vpop.permute.xlu2 %636  ;;  %v4271_v45 = vpop.permute.xlu1 %586  ;;  %6544 = vst [vmem:[#allocation40_spill] sm:$0xff] %v4297_v51 }
  0xb6   : > { %6534 = vst [vmem:[#allocation30_spill] sm:$0xff] %v4269_v61  ;;  %v4273_v63 = vpop.permute.xlu0 %581 }
  0xb7   : > { %6535 = vst [vmem:[#allocation31_spill] sm:$0xff] %v4271_v45 }
  0xb8   : > { %6536 = vst [vmem:[#allocation32_spill] sm:$0xff] %v4273_v63 }
  0xb9   : > { %6545 = vst [vmem:[#allocation41_spill] sm:$0xff] %v4300_v37 }
  0xbb   : > { %816 = vperm.xlu2 %3620, %v4276_v50   ;;  %811 = vperm.xlu1 %3619, %v4279_v56   ;;  %v4312_v50 = vld [vmem:[%s3991_s21 + $0x220] sm:$0xff]  ;;  %v4315_v56 = vld [vmem:[%s3991_s21 + $0x218] sm:$0xff] }
  0xbc   : > { %806 = vperm.xlu0 %3618, %v4282_v41   ;;  %6549 = vst [vmem:[#allocation45_spill] sm:$0xff] %v4312_v50  ;;  %v4318_v41 = vld [vmem:[%s3991_s21 + $0x210] sm:$0xff] }
  0xbd   : > { %v4287_v61 = vpop.permute.xlu2 %651  ;;  %v4289_v45 = vpop.permute.xlu1 %601  ;;  %6550 = vst [vmem:[#allocation46_spill] sm:$0xff] %v4315_v56 }
  0xbe   : > { %6540 = vst [vmem:[#allocation36_spill] sm:$0xff] %v4287_v61  ;;  %v4291_v63 = vpop.permute.xlu0 %596 }
  0xbf   : > { %6541 = vst [vmem:[#allocation37_spill] sm:$0xff] %v4289_v45 }
  0xc0   : > { %6542 = vst [vmem:[#allocation38_spill] sm:$0xff] %v4291_v63 }
  0xc1   : > { %6551 = vst [vmem:[#allocation47_spill] sm:$0xff] %v4318_v41 }
  0xc3   : > { %831 = vperm.xlu2 %3620, %v4294_v62   ;;  %826 = vperm.xlu1 %3619, %v4297_v51   ;;  %v4330_v62 = vld [vmem:[%s3991_s21 + $0x238] sm:$0xff]  ;;  %v4333_v51 = vld [vmem:[%s3991_s21 + $0x230] sm:$0xff] }
  0xc4   : > { %821 = vperm.xlu0 %3618, %v4300_v37   ;;  %6555 = vst [vmem:[#allocation51_spill] sm:$0xff] %v4330_v62  ;;  %v4336_v37 = vld [vmem:[%s3991_s21 + $0x228] sm:$0xff] }
  0xc5   : > { %v4305_v61 = vpop.permute.xlu2 %666  ;;  %v4307_v45 = vpop.permute.xlu1 %616  ;;  %6556 = vst [vmem:[#allocation52_spill] sm:$0xff] %v4333_v51 }
  0xc6   : > { %6546 = vst [vmem:[#allocation42_spill] sm:$0xff] %v4305_v61  ;;  %v4309_v63 = vpop.permute.xlu0 %611 }
  0xc7   : > { %6547 = vst [vmem:[#allocation43_spill] sm:$0xff] %v4307_v45 }
  0xc8   : > { %6548 = vst [vmem:[#allocation44_spill] sm:$0xff] %v4309_v63 }
  0xc9   : > { %6557 = vst [vmem:[#allocation53_spill] sm:$0xff] %v4336_v37 }
  0xcb   : > { %846 = vperm.xlu2 %3620, %v4312_v50   ;;  %841 = vperm.xlu1 %3619, %v4315_v56   ;;  %v4348_v50 = vld [vmem:[%s3991_s21 + $0x250] sm:$0xff]  ;;  %v4351_v56 = vld [vmem:[%s3991_s21 + $0x248] sm:$0xff] }
  0xcc   : > { %836 = vperm.xlu0 %3618, %v4318_v41   ;;  %6561 = vst [vmem:[#allocation57_spill] sm:$0xff] %v4348_v50  ;;  %v4354_v41 = vld [vmem:[%s3991_s21 + $0x240] sm:$0xff] }
  0xcd   : > { %v4323_v61 = vpop.permute.xlu2 %681  ;;  %v4325_v45 = vpop.permute.xlu1 %631  ;;  %6562 = vst [vmem:[#allocation58_spill] sm:$0xff] %v4351_v56 }
  0xce   : > { %6552 = vst [vmem:[#allocation48_spill] sm:$0xff] %v4323_v61  ;;  %v4327_v63 = vpop.permute.xlu0 %626 }
  0xcf   : > { %6553 = vst [vmem:[#allocation49_spill] sm:$0xff] %v4325_v45 }
  0xd0   : > { %6554 = vst [vmem:[#allocation50_spill] sm:$0xff] %v4327_v63 }
  0xd1   : > { %6563 = vst [vmem:[#allocation59_spill] sm:$0xff] %v4354_v41 }
  0xd3   : > { %861 = vperm.xlu2 %3620, %v4330_v62   ;;  %856 = vperm.xlu1 %3619, %v4333_v51   ;;  %v4366_v62 = vld [vmem:[%s3991_s21 + $0x268] sm:$0xff]  ;;  %v4369_v51 = vld [vmem:[%s3991_s21 + $0x260] sm:$0xff] }
  0xd4   : > { %851 = vperm.xlu0 %3618, %v4336_v37   ;;  %6567 = vst [vmem:[#allocation63_spill] sm:$0xff] %v4366_v62  ;;  %v4372_v37 = vld [vmem:[%s3991_s21 + $0x258] sm:$0xff] }
  0xd5   : > { %v4341_v61 = vpop.permute.xlu2 %696  ;;  %v4343_v45 = vpop.permute.xlu1 %646  ;;  %6568 = vst [vmem:[#allocation64_spill] sm:$0xff] %v4369_v51 }
  0xd6   : > { %6558 = vst [vmem:[#allocation54_spill] sm:$0xff] %v4341_v61  ;;  %v4345_v63 = vpop.permute.xlu0 %641 }
  0xd7   : > { %6559 = vst [vmem:[#allocation55_spill] sm:$0xff] %v4343_v45 }
  0xd8   : > { %6560 = vst [vmem:[#allocation56_spill] sm:$0xff] %v4345_v63 }
  0xd9   : > { %6569 = vst [vmem:[#allocation65_spill] sm:$0xff] %v4372_v37 }
  0xdb   : > { %876 = vperm.xlu2 %3620, %v4348_v50   ;;  %871 = vperm.xlu1 %3619, %v4351_v56   ;;  %v4384_v50 = vld [vmem:[%s3991_s21 + $0x280] sm:$0xff]  ;;  %v4387_v56 = vld [vmem:[%s3991_s21 + $0x278] sm:$0xff] }
  0xdc   : > { %866 = vperm.xlu0 %3618, %v4354_v41   ;;  %6573 = vst [vmem:[#allocation69_spill] sm:$0xff] %v4384_v50  ;;  %v4390_v41 = vld [vmem:[%s3991_s21 + $0x270] sm:$0xff] }
  0xdd   : > { %v4359_v61 = vpop.permute.xlu2 %711  ;;  %v4361_v45 = vpop.permute.xlu1 %661  ;;  %6574 = vst [vmem:[#allocation70_spill] sm:$0xff] %v4387_v56 }
  0xde   : > { %6564 = vst [vmem:[#allocation60_spill] sm:$0xff] %v4359_v61  ;;  %v4363_v63 = vpop.permute.xlu0 %656 }
  0xdf   : > { %6565 = vst [vmem:[#allocation61_spill] sm:$0xff] %v4361_v45 }
  0xe0   : > { %6566 = vst [vmem:[#allocation62_spill] sm:$0xff] %v4363_v63 }
  0xe1   : > { %6575 = vst [vmem:[#allocation71_spill] sm:$0xff] %v4390_v41 }
  0xe3   : > { %891 = vperm.xlu2 %3620, %v4366_v62   ;;  %886 = vperm.xlu1 %3619, %v4369_v51   ;;  %v4402_v62 = vld [vmem:[%s3991_s21 + $0x298] sm:$0xff]  ;;  %v4405_v51 = vld [vmem:[%s3991_s21 + $0x290] sm:$0xff] }
  0xe4   : > { %881 = vperm.xlu0 %3618, %v4372_v37   ;;  %6579 = vst [vmem:[#allocation75_spill] sm:$0xff] %v4402_v62  ;;  %v4408_v37 = vld [vmem:[%s3991_s21 + $0x288] sm:$0xff] }
  0xe5   : > { %v4377_v61 = vpop.permute.xlu2 %726  ;;  %v4379_v45 = vpop.permute.xlu1 %676  ;;  %6580 = vst [vmem:[#allocation76_spill] sm:$0xff] %v4405_v51 }
  0xe6   : > { %6570 = vst [vmem:[#allocation66_spill] sm:$0xff] %v4377_v61  ;;  %v4381_v63 = vpop.permute.xlu0 %671 }
  0xe7   : > { %6571 = vst [vmem:[#allocation67_spill] sm:$0xff] %v4379_v45 }
  0xe8   : > { %6572 = vst [vmem:[#allocation68_spill] sm:$0xff] %v4381_v63 }
  0xe9   : > { %6581 = vst [vmem:[#allocation77_spill] sm:$0xff] %v4408_v37 }
  0xeb   : > { %906 = vperm.xlu2 %3620, %v4384_v50   ;;  %901 = vperm.xlu1 %3619, %v4387_v56   ;;  %v4420_v50 = vld [vmem:[%s3991_s21 + $0x2b0] sm:$0xff]  ;;  %v4423_v56 = vld [vmem:[%s3991_s21 + $0x2a8] sm:$0xff] }
  0xec   : > { %896 = vperm.xlu0 %3618, %v4390_v41   ;;  %6585 = vst [vmem:[#allocation81_spill] sm:$0xff] %v4420_v50  ;;  %v4426_v41 = vld [vmem:[%s3991_s21 + $0x2a0] sm:$0xff] }
  0xed   : > { %v4395_v61 = vpop.permute.xlu2 %741  ;;  %v4397_v45 = vpop.permute.xlu1 %691  ;;  %6586 = vst [vmem:[#allocation82_spill] sm:$0xff] %v4423_v56 }
  0xee   : > { %6576 = vst [vmem:[#allocation72_spill] sm:$0xff] %v4395_v61  ;;  %v4399_v63 = vpop.permute.xlu0 %686 }
  0xef   : > { %6577 = vst [vmem:[#allocation73_spill] sm:$0xff] %v4397_v45 }
  0xf0   : > { %6578 = vst [vmem:[#allocation74_spill] sm:$0xff] %v4399_v63 }
  0xf1   : > { %6587 = vst [vmem:[#allocation83_spill] sm:$0xff] %v4426_v41 }
  0xf3   : > { %921 = vperm.xlu2 %3620, %v4402_v62   ;;  %916 = vperm.xlu1 %3619, %v4405_v51   ;;  %v4438_v62 = vld [vmem:[%s3991_s21 + $0x2c8] sm:$0xff]  ;;  %v4441_v51 = vld [vmem:[%s3991_s21 + $0x2c0] sm:$0xff] }
  0xf4   : > { %911 = vperm.xlu0 %3618, %v4408_v37   ;;  %6591 = vst [vmem:[#allocation87_spill] sm:$0xff] %v4438_v62  ;;  %v4444_v37 = vld [vmem:[%s3991_s21 + $0x2b8] sm:$0xff] }
  0xf5   : > { %v4413_v61 = vpop.permute.xlu2 %756  ;;  %v4415_v45 = vpop.permute.xlu1 %706  ;;  %6592 = vst [vmem:[#allocation88_spill] sm:$0xff] %v4441_v51 }
  0xf6   : > { %6582 = vst [vmem:[#allocation78_spill] sm:$0xff] %v4413_v61  ;;  %v4417_v63 = vpop.permute.xlu0 %701 }
  0xf7   : > { %6583 = vst [vmem:[#allocation79_spill] sm:$0xff] %v4415_v45 }
  0xf8   : > { %6584 = vst [vmem:[#allocation80_spill] sm:$0xff] %v4417_v63 }
  0xf9   : > { %6593 = vst [vmem:[#allocation89_spill] sm:$0xff] %v4444_v37 }
  0xfb   : > { %936 = vperm.xlu2 %3620, %v4420_v50   ;;  %931 = vperm.xlu1 %3619, %v4423_v56   ;;  %v4456_v50 = vld [vmem:[%s3991_s21 + $0x2e0] sm:$0xff]  ;;  %v4459_v56 = vld [vmem:[%s3991_s21 + $0x2d8] sm:$0xff] }
  0xfc   : > { %926 = vperm.xlu0 %3618, %v4426_v41   ;;  %6597 = vst [vmem:[#allocation93_spill] sm:$0xff] %v4456_v50  ;;  %v4462_v41 = vld [vmem:[%s3991_s21 + $0x2d0] sm:$0xff] }
  0xfd   : > { %v4431_v61 = vpop.permute.xlu2 %771  ;;  %v4433_v45 = vpop.permute.xlu1 %721  ;;  %6598 = vst [vmem:[#allocation94_spill] sm:$0xff] %v4459_v56 }
  0xfe   : > { %6588 = vst [vmem:[#allocation84_spill] sm:$0xff] %v4431_v61  ;;  %v4435_v63 = vpop.permute.xlu0 %716 }
  0xff   : > { %6589 = vst [vmem:[#allocation85_spill] sm:$0xff] %v4433_v45 }
 0x100   : > { %6590 = vst [vmem:[#allocation86_spill] sm:$0xff] %v4435_v63 }
 0x101   : > { %6599 = vst [vmem:[#allocation95_spill] sm:$0xff] %v4462_v41 }
 0x103   : > { %951 = vperm.xlu2 %3620, %v4438_v62   ;;  %946 = vperm.xlu1 %3619, %v4441_v51   ;;  %v4474_v62 = vld [vmem:[%s3991_s21 + $0x2f8] sm:$0xff]  ;;  %v4477_v51 = vld [vmem:[%s3991_s21 + $0x2f0] sm:$0xff] }
 0x104   : > { %941 = vperm.xlu0 %3618, %v4444_v37   ;;  %6603 = vst [vmem:[#allocation99_spill] sm:$0xff] %v4474_v62  ;;  %v4480_v37 = vld [vmem:[%s3991_s21 + $0x2e8] sm:$0xff] }
 0x105   : > { %v4449_v61 = vpop.permute.xlu2 %786  ;;  %v4451_v45 = vpop.permute.xlu1 %736  ;;  %6604 = vst [vmem:[#allocation100_spill] sm:$0xff] %v4477_v51 }
 0x106   : > { %6594 = vst [vmem:[#allocation90_spill] sm:$0xff] %v4449_v61  ;;  %v4453_v63 = vpop.permute.xlu0 %731 }
 0x107   : > { %6595 = vst [vmem:[#allocation91_spill] sm:$0xff] %v4451_v45 }
 0x108   : > { %6596 = vst [vmem:[#allocation92_spill] sm:$0xff] %v4453_v63 }
 0x10b   : > { %966 = vperm.xlu2 %3620, %v4456_v50   ;;  %961 = vperm.xlu1 %3619, %v4459_v56   ;;  %v4495_v56 = vld [vmem:[%s3991_s21 + $0x308] sm:$0xff] }
 0x10c   : > { %956 = vperm.xlu0 %3618, %v4462_v41   ;;  %6609 = vst [vmem:[#allocation105_spill] sm:$0xff] %v4495_v56  ;;  %v4498_v41 = vld [vmem:[%s3991_s21 + $0x300] sm:$0xff] }
 0x10d   : > { %v4467_v61 = vpop.permute.xlu2 %801  ;;  %v4469_v45 = vpop.permute.xlu1 %751 }
 0x10e   : > { %6600 = vst [vmem:[#allocation96_spill] sm:$0xff] %v4467_v61  ;;  %v4471_v63 = vpop.permute.xlu0 %746 }
 0x10f   : > { %6601 = vst [vmem:[#allocation97_spill] sm:$0xff] %v4469_v45 }
 0x110   : > { %6602 = vst [vmem:[#allocation98_spill] sm:$0xff] %v4471_v63  ;;  %v4492_v63 = vld [vmem:[%s3991_s21 + $0x310] sm:$0xff] }
 0x111   : > { %6608 = vst [vmem:[#allocation104_spill] sm:$0xff] %v4492_v63 }
 0x113   : > { %981 = vperm.xlu2 %3620, %v4474_v62   ;;  %976 = vperm.xlu1 %3619, %v4477_v51  }
 0x114   : > { %971 = vperm.xlu0 %3618, %v4480_v37  }
 0x115   : > { %v4485_v50 = vpop.permute.xlu2 %816  ;;  %v4487_v61 = vpop.permute.xlu1 %766 }
 0x116   : > { %6605 = vst [vmem:[#allocation101_spill] sm:$0xff] %v4485_v50  ;;  %v4489_v45 = vpop.permute.xlu0 %761 }
 0x117   : > { %6606 = vst [vmem:[#allocation102_spill] sm:$0xff] %v4487_v61  ;;  %v4510_v61 = vld [vmem:[%s3991_s21 + $0x318] sm:$0xff] }
 0x118   : > { %6607 = vst [vmem:[#allocation103_spill] sm:$0xff] %v4489_v45  ;;  %v3889_v45 = vmov 1  }
 0x11b   : > { %996 = vperm.xlu2 %3620, %v4492_v63   ;;  %991 = vperm.xlu1 %3619, %v4495_v56  }
 0x11c   : > { %986 = vperm.xlu0 %3618, %v4498_v41  }
 0x11d   : > { %v4503_v62 = vpop.permute.xlu2 %831  ;;  %v4505_v51 = vpop.permute.xlu1 %781 }
 0x11e   : > { %6610 = vst [vmem:[#allocation106_spill] sm:$0xff] %v4503_v62  ;;  %v4507_v50 = vpop.permute.xlu0 %776 }
 0x11f   : > { %6611 = vst [vmem:[#allocation107_spill] sm:$0xff] %v4505_v51 }
 0x120   : > { %6612 = vst [vmem:[#allocation108_spill] sm:$0xff] %v4507_v50 }
 0x123   : > { %3622 = vset.pattern.permute.xlu2 %v3889_v45  ;;  %3621 = vset.pattern.permute.xlu1 %v3889_v45 }
 0x124   : > { %1001 = vperm.xlu0 %3618, %v4510_v61   ;;  %1211 = vperm.xlu2 %3622, %v4012_v6  }
 0x125   : > { %1207 = vperm.xlu1 %3621, %v4000_v3   ;;  %v4515_v63 = vpop.permute.xlu2 %846  ;;  %v4517_v56 = vpop.permute.xlu1 %796 }
 0x126   : > { %6613 = vst [vmem:[#allocation109_spill] sm:$0xff] %v4515_v63  ;;  %v4519_v62 = vpop.permute.xlu0 %791 }
 0x127   : > { %6614 = vst [vmem:[#allocation110_spill] sm:$0xff] %v4517_v56 }
 0x128   : > { %6615 = vst [vmem:[#allocation111_spill] sm:$0xff] %v4519_v62 }
 0x12c   : > { %3623 = vset.pattern.permute.xlu0 %v3889_v45  ;;  %1223 = vperm.xlu2 %3622, %v3994_v1  }
 0x12d   : > { %1219 = vperm.xlu1 %3621, %v4009_v5   ;;  %1215 = vperm.xlu0 %3623, %v3997_v2   ;;  %v4524_v51 = vpop.permute.xlu2 %861  ;;  %v4526_v50 = vpop.permute.xlu1 %811 }
 0x12e   : > { %6616 = vst [vmem:[#allocation112_spill] sm:$0xff] %v4524_v51  ;;  %v4528_v6 = vpop.permute.xlu0 %806 }
 0x12f   : > { %6617 = vst [vmem:[#allocation113_spill] sm:$0xff] %v4526_v50 }
 0x130   : > { %6618 = vst [vmem:[#allocation114_spill] sm:$0xff] %v4528_v6 }
 0x134   : > { %1231 = vperm.xlu2 %3622, %v4024_v9  }
 0x135   : > { %1227 = vperm.xlu1 %3621, %v4006_v4   ;;  %1235 = vperm.xlu0 %3623, %v4021_v8   ;;  %v4533_v63 = vpop.permute.xlu2 %876  ;;  %v4535_v45 = vpop.permute.xlu1 %826 }
 0x136   : > { %6619 = vst [vmem:[#allocation115_spill] sm:$0xff] %v4533_v63  ;;  %v4537_v62 = vpop.permute.xlu0 %821 }
 0x137   : > { %6620 = vst [vmem:[#allocation116_spill] sm:$0xff] %v4535_v45 }
 0x138   : > { %6621 = vst [vmem:[#allocation117_spill] sm:$0xff] %v4537_v62 }
 0x13c   : > { %1243 = vperm.xlu2 %3622, %v4036_v12  }
 0x13d   : > { %1239 = vperm.xlu1 %3621, %v4018_v7   ;;  %1247 = vperm.xlu0 %3623, %v4033_v11   ;;  %v4542_v50 = vpop.permute.xlu2 %891  ;;  %v4544_v6 = vpop.permute.xlu1 %841 }
 0x13e   : > { %6622 = vst [vmem:[#allocation118_spill] sm:$0xff] %v4542_v50  ;;  %v4546_v56 = vpop.permute.xlu0 %836 }
 0x13f   : > { %6623 = vst [vmem:[#allocation119_spill] sm:$0xff] %v4544_v6 }
 0x140   : > { %6624 = vst [vmem:[#allocation120_spill] sm:$0xff] %v4546_v56 }
 0x144   : > { %1255 = vperm.xlu2 %3622, %v4048_v15  }
 0x145   : > { %1251 = vperm.xlu1 %3621, %v4030_v10   ;;  %1259 = vperm.xlu0 %3623, %v4045_v14   ;;  %v4551_v45 = vpop.permute.xlu2 %906  ;;  %v4553_v62 = vpop.permute.xlu1 %856 }
 0x146   : > { %6625 = vst [vmem:[#allocation121_spill] sm:$0xff] %v4553_v62  ;;  %v4555_v63 = vpop.permute.xlu0 %851 }
 0x147   : > { %6626 = vst [vmem:[#allocation122_spill] sm:$0xff] %v4555_v63 }
 0x14c   : > { %1267 = vperm.xlu2 %3622, %v4060_v18  }
 0x14d   : > { %1263 = vperm.xlu1 %3621, %v4042_v13   ;;  %1271 = vperm.xlu0 %3623, %v4057_v17   ;;  %v4560_v11 = vpop.permute.xlu2 %921  ;;  %v4562_v56 = vpop.permute.xlu1 %871 }
 0x14e   : > { %6627 = vst [vmem:[#allocation123_spill] sm:$0xff] %v4562_v56  ;;  %v4564_v15 = vpop.permute.xlu0 %866 }
 0x14f   : > { %6628 = vst [vmem:[#allocation124_spill] sm:$0xff] %v4564_v15 }
 0x154   : > { %1279 = vperm.xlu2 %3622, %v4072_v21  }
 0x155   : > { %1275 = vperm.xlu1 %3621, %v4054_v16   ;;  %1283 = vperm.xlu0 %3623, %v4069_v20   ;;  %v4569_v10 = vpop.permute.xlu2 %936  ;;  %v4571_v14 = vpop.permute.xlu1 %886 }
 0x156   : > { %6629 = vst [vmem:[#allocation125_spill] sm:$0xff] %v4569_v10  ;;  %v4573_v18 = vpop.permute.xlu0 %881  ;;  %v6696_v10 = vld [vmem:[#allocation76_spill] sm:$0xff] }
 0x157   : > { %6630 = vst [vmem:[#allocation126_spill] sm:$0xff] %v4571_v14 }
 0x158   : > { %6631 = vst [vmem:[#allocation127_spill] sm:$0xff] %v4573_v18 }
 0x15c   : > { %1291 = vperm.xlu2 %3622, %v4084_v24  }
 0x15d   : > { %1287 = vperm.xlu1 %3621, %v4066_v19   ;;  %1295 = vperm.xlu0 %3623, %v4081_v23   ;;  %v4578_v13 = vpop.permute.xlu2 %951  ;;  %v4580_v17 = vpop.permute.xlu1 %901 }
 0x15e   : > { %6632 = vst [vmem:[#allocation128_spill] sm:$0xff] %v4578_v13  ;;  %v4582_v21 = vpop.permute.xlu0 %896 }
 0x15f   : > { %6633 = vst [vmem:[#allocation129_spill] sm:$0xff] %v4580_v17  ;;  %v6655_v17 = vld [vmem:[#allocation28_spill] sm:$0xff] }
 0x160   : > { %6634 = vst [vmem:[#allocation130_spill] sm:$0xff] %v4582_v21 }
 0x164   : > { %1303 = vperm.xlu2 %3622, %v4096_v27  }
 0x165   : > { %1299 = vperm.xlu1 %3621, %v4078_v22   ;;  %1307 = vperm.xlu0 %3623, %v4093_v26   ;;  %v4587_v16 = vpop.permute.xlu2 %966  ;;  %v4589_v20 = vpop.permute.xlu1 %916 }
 0x166   : > { %v4591_v24 = vpop.permute.xlu0 %911 }
 0x16c   : > { %1315 = vperm.xlu2 %3622, %v4108_v30  }
 0x16d   : > { %1311 = vperm.xlu1 %3621, %v4090_v25   ;;  %1319 = vperm.xlu0 %3623, %v4105_v29   ;;  %v4596_v19 = vpop.permute.xlu2 %981  ;;  %v4598_v23 = vpop.permute.xlu1 %931 }
 0x16e   : > { %6635 = vst [vmem:[#allocation131_spill] sm:$0xff] %v4596_v19  ;;  %v4600_v27 = vpop.permute.xlu0 %926 }
 0x16f   : > { %6636 = vst [vmem:[#allocation132_spill] sm:$0xff] %v4598_v23  ;;  %v6703_v23 = vld [vmem:[#allocation81_spill] sm:$0xff] }
 0x170   : > { %6637 = vst [vmem:[#allocation133_spill] sm:$0xff] %v4600_v27 }
 0x174   : > { %1327 = vperm.xlu2 %3622, %v4120_v33  }
 0x175   : > { %1323 = vperm.xlu1 %3621, %v4102_v28   ;;  %1331 = vperm.xlu0 %3623, %v4117_v32   ;;  %v4605_v22 = vpop.permute.xlu2 %996  ;;  %v4607_v26 = vpop.permute.xlu1 %946 }
 0x176   : > { %6638 = vst [vmem:[#allocation134_spill] sm:$0xff] %v4605_v22  ;;  %v4609_v30 = vpop.permute.xlu0 %941 }
 0x177   : > { %6639 = vst [vmem:[#allocation135_spill] sm:$0xff] %v4607_v26 }
 0x178   : > { %6640 = vst [vmem:[#allocation136_spill] sm:$0xff] %v4609_v30 }
 0x17c   : > { %1339 = vperm.xlu2 %3622, %v4132_v36  }
 0x17d   : > { %1335 = vperm.xlu1 %3621, %v4114_v31   ;;  %1343 = vperm.xlu0 %3623, %v4129_v35   ;;  %v4614_v25 = vpop.permute.xlu1 %961 }
 0x17e   : > { %6641 = vst [vmem:[#allocation137_spill] sm:$0xff] %v4614_v25  ;;  %v4616_v29 = vpop.permute.xlu0 %956  ;;  %v4618_v33 = vpop.permute.xlu2 %1211  ;;  %v6691_v25 = vld [vmem:[#allocation70_spill] sm:$0xff] }
 0x17f   : > { %6642 = vst [vmem:[#allocation138_spill] sm:$0xff] %v4616_v29 }
 0x184   : > { %1351 = vperm.xlu2 %3622, %v4146_v40  }
 0x185   : > { %1347 = vperm.xlu1 %3621, %v4126_v34   ;;  %1355 = vperm.xlu0 %3623, %v4143_v39   ;;  %v4623_v28 = vpop.permute.xlu1 %976 }
 0x186   : > { %6643 = vst [vmem:[#allocation139_spill] sm:$0xff] %v4623_v28  ;;  %v4625_v32 = vpop.permute.xlu0 %971  ;;  %v4627_v36 = vpop.permute.xlu2 %1223  ;;  %v6708_v28 = vld [vmem:[#allocation95_spill] sm:$0xff] }
 0x18c   : > { %1363 = vperm.xlu2 %3622, %v4160_v44  }
 0x18d   : > { %1359 = vperm.xlu1 %3621, %v4140_v38   ;;  %1367 = vperm.xlu0 %3623, %v4157_v43   ;;  %v4632_v31 = vpop.permute.xlu1 %991 }
 0x18e   : > { %v4634_v35 = vpop.permute.xlu0 %986  ;;  %v4636_v15 = vpop.permute.xlu2 %1231 }
 0x194   : > { %1375 = vperm.xlu2 %3622, %v4174_v48  }
 0x195   : > { %1371 = vperm.xlu1 %3621, %v4154_v42   ;;  %1379 = vperm.xlu0 %3623, %v4171_v47  }
 0x196   : > { %v4641_v34 = vpop.permute.xlu0 %1001  ;;  %v4643_v56 = vpop.permute.xlu2 %1243 }
 0x197   : > { %6644 = vst [vmem:[#allocation140_spill] sm:$0xff] %v4641_v34  ;;  %v4645_v44 = vpop.permute.xlu1 %1207 }
 0x19c   : > { %1387 = vperm.xlu2 %3622, %v4192_v54  }
 0x19d   : > { %1383 = vperm.xlu1 %3621, %v4168_v46   ;;  %1391 = vperm.xlu0 %3623, %v4189_v53  }
 0x19e   : > { %v4650_v18 = vpop.permute.xlu2 %1255 }
 0x19f   : > { %6645 = vst [vmem:[#allocation141_spill] sm:$0xff] %v4650_v18  ;;  %v4652_v62 = vpop.permute.xlu1 %1219  ;;  %v4654_v14 = vpop.permute.xlu0 %1215  ;;  %v6661_v18 = vld [vmem:[#allocation34_spill] sm:$0xff] }
 0x1a4   : > { %1399 = vperm.xlu2 %3622, %v4210_v60  }
 0x1a5   : > { %1395 = vperm.xlu1 %3621, %v4186_v52   ;;  %1403 = vperm.xlu0 %3623, %v4207_v59   ;;  %v6649_v52 = vld [vmem:[#allocation23_spill] sm:$0xff] }
 0x1a6   : > { %v4659_v47 = vpop.permute.xlu2 %1267 }
 0x1a7   : > { %6646 = vst [vmem:[#allocation142_spill] sm:$0xff] %v4659_v47  ;;  %v4661_v50 = vpop.permute.xlu1 %1227  ;;  %v4663_v54 = vpop.permute.xlu0 %1235  ;;  %v6673_v47 = vld [vmem:[#allocation46_spill] sm:$0xff] }
 0x1ac   : > { %1411 = vperm.xlu2 %3622, %v4228_v55  }
 0x1ad   : > { %1407 = vperm.xlu1 %3621, %v4204_v58   ;;  %1415 = vperm.xlu0 %3623, %v4225_v49   ;;  %v6653_v58 = vld [vmem:[#allocation29_spill] sm:$0xff]  ;;  %v6654_v49 = vld [vmem:[#allocation22_spill] sm:$0xff] }
 0x1ae   : > { %v4668_v46 = vpop.permute.xlu2 %1279 }
 0x1af   : > { %6647 = vst [vmem:[#allocation143_spill] sm:$0xff] %v4668_v46  ;;  %v4670_v53 = vpop.permute.xlu1 %1239  ;;  %v4672_v60 = vpop.permute.xlu0 %1247  ;;  %v6687_v46 = vld [vmem:[#allocation64_spill] sm:$0xff] }
 0x1b0   : > { %6648 = vst [vmem:[#allocation144_spill] sm:$0xff] %v4672_v60 }
 0x1b4   : > { %1423 = vperm.xlu2 %3622, %v4246_v57  }
 0x1b5   : > { %1419 = vperm.xlu1 %3621, %v4222_v0   ;;  %1427 = vperm.xlu0 %3623, %v6649_v52   ;;  %v6659_v0 = vld [vmem:[#allocation35_spill] sm:$0xff] }
 0x1b6   : > { %v4677_v59 = vpop.permute.xlu2 %1291  ;;  %v6660_v52 = vld [vmem:[#allocation27_spill] sm:$0xff] }
 0x1b7   : > { %6650 = vst [vmem:[#allocation23_spill] sm:$0xff] %v4677_v59  ;;  %v4679_v6 = vpop.permute.xlu1 %1251  ;;  %v4681_v55 = vpop.permute.xlu0 %1259  ;;  %v6678_v59 = vld [vmem:[#allocation52_spill] sm:$0xff] }
 0x1b8   : > { %6651 = vst [vmem:[#allocation145_spill] sm:$0xff] %v4679_v6  ;;  %v6667_v6 = vld [vmem:[#allocation40_spill] sm:$0xff] }
 0x1b9   : > { %6652 = vst [vmem:[#allocation146_spill] sm:$0xff] %v4681_v55 }
 0x1bc   : > { %1435 = vperm.xlu2 %3622, %v6653_v58  }
 0x1bd   : > { %1431 = vperm.xlu1 %3621, %v6654_v49   ;;  %1439 = vperm.xlu0 %3623, %v6655_v17   ;;  %v6665_v49 = vld [vmem:[#allocation41_spill] sm:$0xff] }
 0x1be   : > { %v4686_v51 = vpop.permute.xlu2 %1303  ;;  %v6666_v17 = vld [vmem:[#allocation33_spill] sm:$0xff] }
 0x1bf   : > { %6656 = vst [vmem:[#allocation29_spill] sm:$0xff] %v4686_v51  ;;  %v4688_v63 = vpop.permute.xlu1 %1263  ;;  %v4690_v57 = vpop.permute.xlu0 %1271 }
 0x1c0   : > { %6657 = vst [vmem:[#allocation22_spill] sm:$0xff] %v4688_v63 }
 0x1c1   : > { %6658 = vst [vmem:[#allocation28_spill] sm:$0xff] %v4690_v57 }
 0x1c4   : > { %1447 = vperm.xlu2 %3622, %v6659_v0  }
 0x1c5   : > { %1443 = vperm.xlu1 %3621, %v6660_v52   ;;  %1451 = vperm.xlu0 %3623, %v6661_v18   ;;  %v6671_v52 = vld [vmem:[#allocation47_spill] sm:$0xff] }
 0x1c6   : > { %v4695_v21 = vpop.permute.xlu2 %1315  ;;  %v6672_v18 = vld [vmem:[#allocation39_spill] sm:$0xff] }
 0x1c7   : > { %6662 = vst [vmem:[#allocation35_spill] sm:$0xff] %v4695_v21  ;;  %v4697_v55 = vpop.permute.xlu1 %1275  ;;  %v4699_v58 = vpop.permute.xlu0 %1283 }
 0x1c8   : > { %6663 = vst [vmem:[#allocation27_spill] sm:$0xff] %v4697_v55 }
 0x1c9   : > { %6664 = vst [vmem:[#allocation34_spill] sm:$0xff] %v4699_v58 }
 0x1cc   : > { %1459 = vperm.xlu2 %3622, %v6665_v49  }
 0x1cd   : > { %1455 = vperm.xlu1 %3621, %v6666_v17   ;;  %1463 = vperm.xlu0 %3623, %v6667_v6   ;;  %v6676_v17 = vld [vmem:[#allocation53_spill] sm:$0xff] }
 0x1ce   : > { %v4704_v60 = vpop.permute.xlu2 %1327  ;;  %v6677_v6 = vld [vmem:[#allocation45_spill] sm:$0xff] }
 0x1cf   : > { %6668 = vst [vmem:[#allocation41_spill] sm:$0xff] %v4704_v60  ;;  %v4706_v57 = vpop.permute.xlu1 %1287  ;;  %v4708_v0 = vpop.permute.xlu0 %1295 }
 0x1d0   : > { %6669 = vst [vmem:[#allocation33_spill] sm:$0xff] %v4706_v57  ;;  %v6682_v57 = vld [vmem:[#allocation58_spill] sm:$0xff] }
 0x1d1   : > { %6670 = vst [vmem:[#allocation40_spill] sm:$0xff] %v4708_v0 }
 0x1d4   : > { %1471 = vperm.xlu2 %3622, %v6671_v52  }
 0x1d5   : > { %1467 = vperm.xlu1 %3621, %v6672_v18   ;;  %1475 = vperm.xlu0 %3623, %v6673_v47   ;;  %v6680_v18 = vld [vmem:[#allocation59_spill] sm:$0xff] }
 0x1d6   : > { %v4713_v55 = vpop.permute.xlu2 %1339  ;;  %v6681_v47 = vld [vmem:[#allocation51_spill] sm:$0xff] }
 0x1d7   : > { %v4715_v63 = vpop.permute.xlu1 %1299  ;;  %v4717_v49 = vpop.permute.xlu0 %1307 }
 0x1d8   : > { %6674 = vst [vmem:[#allocation47_spill] sm:$0xff] %v4715_v63 }
 0x1d9   : > { %6675 = vst [vmem:[#allocation39_spill] sm:$0xff] %v4717_v49 }
 0x1dc   : > { %1483 = vperm.xlu2 %3622, %v6676_v17  }
 0x1dd   : > { %1479 = vperm.xlu1 %3621, %v6677_v6   ;;  %1487 = vperm.xlu0 %3623, %v6678_v59   ;;  %v6685_v6 = vld [vmem:[#allocation65_spill] sm:$0xff] }
 0x1de   : > { %v4722_v60 = vpop.permute.xlu2 %1351  ;;  %v6686_v59 = vld [vmem:[#allocation57_spill] sm:$0xff] }
 0x1df   : > { %v4724_v51 = vpop.permute.xlu1 %1311  ;;  %v4726_v52 = vpop.permute.xlu0 %1319 }
 0x1e0   : > { %6679 = vst [vmem:[#allocation46_spill] sm:$0xff] %v4726_v52 }
 0x1e4   : > { %1495 = vperm.xlu2 %3622, %v6680_v18  }
 0x1e5   : > { %1491 = vperm.xlu1 %3621, %v6681_v47   ;;  %1499 = vperm.xlu0 %3623, %v6682_v57   ;;  %v6689_v47 = vld [vmem:[#allocation71_spill] sm:$0xff] }
 0x1e6   : > { %v4731_v58 = vpop.permute.xlu2 %1363  ;;  %v6690_v57 = vld [vmem:[#allocation63_spill] sm:$0xff] }
 0x1e7   : > { %v4733_v49 = vpop.permute.xlu1 %1323  ;;  %v4735_v17 = vpop.permute.xlu0 %1331 }
 0x1e8   : > { %6683 = vst [vmem:[#allocation53_spill] sm:$0xff] %v4733_v49 }
 0x1e9   : > { %6684 = vst [vmem:[#allocation45_spill] sm:$0xff] %v4735_v17 }
 0x1ec   : > { %1507 = vperm.xlu2 %3622, %v6685_v6  }
 0x1ed   : > { %1503 = vperm.xlu1 %3621, %v6686_v59   ;;  %1511 = vperm.xlu0 %3623, %v6687_v46   ;;  %v6694_v59 = vld [vmem:[#allocation77_spill] sm:$0xff] }
 0x1ee   : > { %v4740_v30 = vpop.permute.xlu2 %1375  ;;  %v6695_v46 = vld [vmem:[#allocation69_spill] sm:$0xff] }
 0x1ef   : > { %v4742_v52 = vpop.permute.xlu1 %1335  ;;  %v4744_v18 = vpop.permute.xlu0 %1343 }
 0x1f0   : > { %6688 = vst [vmem:[#allocation52_spill] sm:$0xff] %v4744_v18  ;;  %v6702_v18 = vld [vmem:[#allocation89_spill] sm:$0xff] }
 0x1f4   : > { %1519 = vperm.xlu2 %3622, %v6689_v47  }
 0x1f5   : > { %1515 = vperm.xlu1 %3621, %v6690_v57   ;;  %1523 = vperm.xlu0 %3623, %v6691_v25   ;;  %v6698_v57 = vld [vmem:[#allocation83_spill] sm:$0xff] }
 0x1f6   : > { %v4749_v49 = vpop.permute.xlu2 %1387  ;;  %v6699_v25 = vld [vmem:[#allocation75_spill] sm:$0xff] }
 0x1f7   : > { %6692 = vst [vmem:[#allocation59_spill] sm:$0xff] %v4749_v49  ;;  %v4751_v17 = vpop.permute.xlu1 %1347  ;;  %v4753_v6 = vpop.permute.xlu0 %1355  ;;  %v6700_v49 = vld [vmem:[#allocation82_spill] sm:$0xff] }
 0x1f8   : > { %6693 = vst [vmem:[#allocation51_spill] sm:$0xff] %v4751_v17 }
 0x1fc   : > { %1531 = vperm.xlu2 %3622, %v6694_v59  }
 0x1fd   : > { %1527 = vperm.xlu1 %3621, %v6695_v46   ;;  %1535 = vperm.xlu0 %3623, %v6696_v10  }
 0x1fe   : > { %v4758_v13 = vpop.permute.xlu2 %1399 }
 0x1ff   : > { %6697 = vst [vmem:[#allocation58_spill] sm:$0xff] %v4758_v13  ;;  %v4760_v29 = vpop.permute.xlu1 %1359  ;;  %v4762_v47 = vpop.permute.xlu0 %1367  ;;  %v6704_v13 = vld [vmem:[#allocation88_spill] sm:$0xff] }
 0x204   : > { %1543 = vperm.xlu2 %3622, %v6698_v57  }
 0x205   : > { %1539 = vperm.xlu1 %3621, %v6699_v25   ;;  %1547 = vperm.xlu0 %3623, %v6700_v49   ;;  %v6709_v49 = vld [vmem:[#allocation87_spill] sm:$0xff] }
 0x206   : > { %v4767_v17 = vpop.permute.xlu2 %1411 }
 0x207   : > { %6701 = vst [vmem:[#allocation65_spill] sm:$0xff] %v4767_v17  ;;  %v4769_v27 = vpop.permute.xlu1 %1371  ;;  %v4771_v26 = vpop.permute.xlu0 %1379  ;;  %v6710_v17 = vld [vmem:[#allocation94_spill] sm:$0xff] }
 0x20c   : > { %1555 = vperm.xlu2 %3622, %v6702_v18  }
 0x20d   : > { %1551 = vperm.xlu1 %3621, %v6703_v23   ;;  %1559 = vperm.xlu0 %3623, %v6704_v13   ;;  %v6714_v13 = vld [vmem:[#allocation93_spill] sm:$0xff]  ;;  %v6715_v23 = vld [vmem:[#allocation100_spill] sm:$0xff] }
 0x20e   : > { %v4776_v19 = vpop.permute.xlu2 %1423 }
 0x20f   : > { %6705 = vst [vmem:[#allocation57_spill] sm:$0xff] %v4776_v19  ;;  %v4778_v21 = vpop.permute.xlu1 %1383  ;;  %v4780_v57 = vpop.permute.xlu0 %1391 }
 0x210   : > { %6706 = vst [vmem:[#allocation64_spill] sm:$0xff] %v4778_v21  ;;  %v6724_v21 = vld [vmem:[#allocation104_spill] sm:$0xff] }
 0x211   : > { %6707 = vst [vmem:[#allocation71_spill] sm:$0xff] %v4780_v57 }
 0x214   : > { %1567 = vperm.xlu2 %3622, %v6708_v28  }
 0x215   : > { %1563 = vperm.xlu1 %3621, %v6709_v49   ;;  %1571 = vperm.xlu0 %3623, %v6710_v17   ;;  %v6719_v17 = vld [vmem:[#allocation99_spill] sm:$0xff]  ;;  %v6720_v49 = vld [vmem:[#allocation105_spill] sm:$0xff] }
 0x216   : > { %v4785_v34 = vpop.permute.xlu2 %1435 }
 0x217   : > { %6711 = vst [vmem:[#allocation63_spill] sm:$0xff] %v4785_v34  ;;  %v4787_v22 = vpop.permute.xlu1 %1395  ;;  %v4789_v18 = vpop.permute.xlu0 %1403 }
 0x218   : > { %6712 = vst [vmem:[#allocation70_spill] sm:$0xff] %v4787_v22 }
 0x219   : > { %6713 = vst [vmem:[#allocation77_spill] sm:$0xff] %v4789_v18 }
 0x21c   : > { %1579 = vperm.xlu2 %3622, %v4480_v37  }
 0x21d   : > { %1575 = vperm.xlu1 %3621, %v6714_v13   ;;  %1583 = vperm.xlu0 %3623, %v6715_v23  }
 0x21e   : > { %v4794_v19 = vpop.permute.xlu2 %1447 }
 0x21f   : > { %6716 = vst [vmem:[#allocation69_spill] sm:$0xff] %v4794_v19  ;;  %v4796_v57 = vpop.permute.xlu1 %1407  ;;  %v4798_v28 = vpop.permute.xlu0 %1415  ;;  %v3890_v19 = vmov 2  }
 0x220   : > { %6717 = vst [vmem:[#allocation76_spill] sm:$0xff] %v4796_v57 }
 0x221   : > { %6718 = vst [vmem:[#allocation83_spill] sm:$0xff] %v4798_v28 }
 0x224   : > { %1591 = vperm.xlu2 %3622, %v4498_v41  }
 0x225   : > { %1587 = vperm.xlu1 %3621, %v6719_v17   ;;  %1595 = vperm.xlu0 %3623, %v6720_v49  }
 0x226   : > { %v4803_v34 = vpop.permute.xlu2 %1459 }
 0x227   : > { %6721 = vst [vmem:[#allocation75_spill] sm:$0xff] %v4803_v34  ;;  %v4805_v18 = vpop.permute.xlu1 %1419  ;;  %v4807_v22 = vpop.permute.xlu0 %1427 }
 0x228   : > { %6722 = vst [vmem:[#allocation82_spill] sm:$0xff] %v4805_v18  ;;  %v6728_v18 = vld [vmem:[#allocation6_spill] sm:$0xff] }
 0x229   : > { %6723 = vst [vmem:[#allocation89_spill] sm:$0xff] %v4807_v22 }
 0x22c   : > { %1603 = vperm.xlu2 %3622, %v4510_v61  }
 0x22d   : > { %1599 = vperm.xlu1 %3621, %v6724_v21   ;;  %3624 = vset.pattern.permute.xlu0 %v3890_v19 }
 0x22e   : > { %1809 = vperm.xlu0 %3624, %v4000_v3   ;;  %v4812_v57 = vpop.permute.xlu2 %1471 }
 0x22f   : > { %6725 = vst [vmem:[#allocation81_spill] sm:$0xff] %v4812_v57  ;;  %v4814_v28 = vpop.permute.xlu1 %1431  ;;  %v4816_v17 = vpop.permute.xlu0 %1439 }
 0x230   : > { %6726 = vst [vmem:[#allocation88_spill] sm:$0xff] %v4814_v28 }
 0x231   : > { %6727 = vst [vmem:[#allocation95_spill] sm:$0xff] %v4816_v17 }
 0x234   : > { %3626 = vset.pattern.permute.xlu2 %v3890_v19 }
 0x235   : > { %3625 = vset.pattern.permute.xlu1 %v3890_v19  ;;  %1817 = vperm.xlu2 %3626, %v3997_v2  }
 0x236   : > { %1813 = vperm.xlu1 %3625, %v6728_v18   ;;  %1829 = vperm.xlu0 %3624, %v4006_v4   ;;  %v4821_v34 = vpop.permute.xlu2 %1483 }
 0x237   : > { %6729 = vst [vmem:[#allocation87_spill] sm:$0xff] %v4821_v34  ;;  %v4823_v22 = vpop.permute.xlu1 %1443  ;;  %v4825_v63 = vpop.permute.xlu0 %1451 }
 0x238   : > { %6730 = vst [vmem:[#allocation94_spill] sm:$0xff] %v4823_v22 }
 0x239   : > { %6731 = vst [vmem:[#allocation93_spill] sm:$0xff] %v4825_v63 }
 0x23d   : > { %1825 = vperm.xlu2 %3626, %v3994_v1  }
 0x23e   : > { %1821 = vperm.xlu1 %3625, %v4009_v5   ;;  %1841 = vperm.xlu0 %3624, %v4018_v7   ;;  %v4830_v3 = vpop.permute.xlu2 %1495 }
 0x23f   : > { %6732 = vst [vmem:[#allocation100_spill] sm:$0xff] %v4830_v3  ;;  %v4832_v19 = vpop.permute.xlu1 %1455  ;;  %v4834_v2 = vpop.permute.xlu0 %1463 }
 0x240   : > { %6733 = vst [vmem:[#allocation99_spill] sm:$0xff] %v4832_v19 }
 0x241   : > { %6734 = vst [vmem:[#allocation105_spill] sm:$0xff] %v4834_v2 }
 0x245   : > { %1837 = vperm.xlu2 %3626, %v4021_v8  }
 0x246   : > { %1833 = vperm.xlu1 %3625, %v4024_v9   ;;  %1969 = vperm.xlu0 %3624, %v4157_v43   ;;  %v4839_v4 = vpop.permute.xlu2 %1507 }
 0x247   : > { %6735 = vst [vmem:[#allocation104_spill] sm:$0xff] %v4839_v4  ;;  %v4841_v18 = vpop.permute.xlu1 %1467  ;;  %v4843_v1 = vpop.permute.xlu0 %1475 }
 0x248   : > { %6736 = vst [vmem:[#allocation6_spill] sm:$0xff] %v4841_v18 }
 0x249   : > { %6737 = vst [vmem:[#allocation147_spill] sm:$0xff] %v4843_v1 }
 0x24d   : > { %1953 = vperm.xlu2 %3626, %v4146_v40  }
 0x24e   : > { %1845 = vperm.xlu1 %3625, %v4036_v12   ;;  %1973 = vperm.xlu0 %3624, %v4154_v42   ;;  %v4848_v5 = vpop.permute.xlu2 %1519 }
 0x24f   : > { %6738 = vst [vmem:[#allocation148_spill] sm:$0xff] %v4848_v5  ;;  %v4850_v7 = vpop.permute.xlu1 %1479  ;;  %v4852_v8 = vpop.permute.xlu0 %1487 }
 0x250   : > { %6739 = vst [vmem:[#allocation149_spill] sm:$0xff] %v4850_v7 }
 0x251   : > { %6740 = vst [vmem:[#allocation150_spill] sm:$0xff] %v4852_v8  ;;  %v4905_v8 = vld [vmem:[%s6450_s2] ss:$0 sm:$0xff] }
 0x255   : > { %1957 = vperm.xlu2 %3626, %v4143_v39  }
 0x256   : > { %2129 = vperm.xlu1 %3625, %v6695_v46   ;;  %1977 = vperm.xlu0 %3624, %v4174_v48   ;;  %v4857_v9 = vpop.permute.xlu2 %1531 }
 0x257   : > { %v4859_v43 = vpop.permute.xlu1 %1491  ;;  %v4861_v40 = vpop.permute.xlu0 %1499 }
 0x258   : > { %6741 = vst [vmem:[#allocation151_spill] sm:$0xff] %v4859_v43 }
 0x259   : > { %6742 = vst [vmem:[#allocation152_spill] sm:$0xff] %v4861_v40 }
 0x25d   : > { %1961 = vperm.xlu2 %3626, %v4140_v38  }
 0x25e   : > { %2133 = vperm.xlu1 %3625, %v6694_v59   ;;  %2137 = vperm.xlu0 %3624, %v6696_v10   ;;  %v4866_v12 = vpop.permute.xlu2 %1543 }
 0x25f   : > { %6743 = vst [vmem:[#allocation153_spill] sm:$0xff] %v4866_v12  ;;  %v4868_v42 = vpop.permute.xlu1 %1503  ;;  %v4870_v39 = vpop.permute.xlu0 %1511 }
 0x260   : > { %6744 = vst [vmem:[#allocation154_spill] sm:$0xff] %v4868_v42  ;;  %v405_v42 = vld [vmem:[%s6449_s1 + $0x10] sm:$0xff] }
 0x261   : > { %6745 = vst [vmem:[#allocation155_spill] sm:$0xff] %v4870_v39  ;;  %v6756_v39 = vld [vmem:[#allocation11_spill] sm:$0xff] }
 0x262   : > { %v1007_v17 = vmul.f32 %v4905_v8, %v6756_v39 }
 0x264   : > { %v1107_v19 = vadd.f32 %v1007_v17, %v405_v42 }
 0x266   : > { %v4872_v46 = vpop.permute.xlu2 %1555 }
 0x267   : > { %6746 = vst [vmem:[#allocation156_spill] sm:$0xff] %v4872_v46  ;;  %v4874_v48 = vpop.permute.xlu1 %1515  ;;  %v4876_v2 = vpop.permute.xlu0 %1523 }
 0x268   : > { %6747 = vst [vmem:[#allocation157_spill] sm:$0xff] %v4874_v48  ;;  %v4912_v48 = vld [vmem:[%s6450_s2 + $0x1] ss:$0 sm:$0xff] }
 0x269   : > { %6748 = vst [vmem:[#allocation158_spill] sm:$0xff] %v4876_v2  ;;  %v1609_v1 = vmul.f32 %v4912_v48, %v4654_v14  ;;  %v4922_v2 = vld [vmem:[%s6450_s2 + $0x2] ss:$0 sm:$0xff]  ;;  %v1611_v17 = vmul.f32 %v4912_v48, %v4627_v36  ;;  %v410_v36 = vld [vmem:[%s6449_s1 + $0x38] sm:$0xff] }
 0x26a   : > { %v407_v14 = vld [vmem:[%s6449_s1 + $0x20] sm:$0xff] }
 0x26b   : > { %v1709_v5 = vadd.f32 %v1609_v1, %v1107_v19 }
 0x26e   : > { %v4878_v7 = vpop.permute.xlu2 %1567 }
 0x26f   : > { %6749 = vst [vmem:[#allocation159_spill] sm:$0xff] %v4878_v7  ;;  %v4880_v57 = vpop.permute.xlu1 %1527  ;;  %v4882_v38 = vpop.permute.xlu0 %1535 }
 0x276   : > { %v4884_v59 = vpop.permute.xlu2 %1579 }
 0x277   : > { %v4886_v10 = vpop.permute.xlu1 %1539  ;;  %v4888_v28 = vpop.permute.xlu0 %1547 }
 0x278   : > { %6750 = vst [vmem:[#allocation160_spill] sm:$0xff] %v4888_v28 }
 0x27e   : > { %v4890_v22 = vpop.permute.xlu2 %1591 }
 0x27f   : > { %v4892_v3 = vpop.permute.xlu1 %1551  ;;  %v4894_v18 = vpop.permute.xlu0 %1559 }
 0x280   : > { %6751 = vst [vmem:[#allocation161_spill] sm:$0xff] %v4892_v3 }
 0x281   : > { %6752 = vst [vmem:[#allocation162_spill] sm:$0xff] %v4894_v18 }
 0x286   : > { %v4896_v40 = vpop.permute.xlu2 %1603 }
 0x287   : > { %6753 = vst [vmem:[#allocation163_spill] sm:$0xff] %v4896_v40  ;;  %v4898_v63 = vpop.permute.xlu1 %1563  ;;  %v4900_v4 = vpop.permute.xlu0 %1571  ;;  %v6764_v40 = vld [vmem:[#allocation15_spill] sm:$0xff] }
 0x288   : > { %6754 = vst [vmem:[#allocation164_spill] sm:$0xff] %v4898_v63 }
 0x289   : > { %6755 = vst [vmem:[#allocation165_spill] sm:$0xff] %v4900_v4  ;;  %v6758_v4 = vld [vmem:[#allocation7_spill] sm:$0xff] }
 0x28a   : > { %v1009_v3 = vmul.f32 %v4905_v8, %v6758_v4  ;;  %v6761_v4 = vld [vmem:[#allocation12_spill] sm:$0xff] }
 0x28c   : > { %v1109_v42 = vadd.f32 %v1009_v3, %v407_v14  ;;  %v1607_v3 = vmul.f32 %v4912_v48, %v4645_v44  ;;  %v1614_v14 = vmul.f32 %v4912_v48, %v4663_v54  ;;  %v1006_v44 = vmul.f32 %v4905_v8, %v6764_v40  ;;  %v408_v40 = vld [vmem:[%s6449_s1 + $0x28] sm:$0xff] }
 0x28e   : > { %v1711_v1 = vadd.f32 %v1611_v17, %v1109_v42 }
 0x28f   : > { %v4924_v43 = vpop.permute.xlu1 %1575  ;;  %v4926_v39 = vpop.permute.xlu0 %1583 }
 0x290   : > { %6757 = vst [vmem:[#allocation11_spill] sm:$0xff] %v4926_v39  ;;  %v1818_v34 = vpop.permute.xlu2 %1817 }
 0x291   : > { %v2211_v46 = vmul.f32 %v4922_v2, %v1818_v34 }
 0x293   : > { %v2311_v63 = vadd.f32 %v2211_v46, %v1709_v5  ;;  %v1005_v5 = vmul.f32 %v4905_v8, %v6761_v4  ;;  %v6762_v46 = vld [vmem:[#allocation17_spill] sm:$0xff] }
 0x294   : > { %v1012_v18 = vmul.f32 %v4905_v8, %v6762_v46 }
 0x295   : > { %2412 = vst.msk [vmem:[#allocation2 + $0x10] sm:$0xff] %vm2409_vm0, %v2311_v63  ;;  %v403_v63 = vld [vmem:[%s6449_s1] sm:$0xff] }
 0x296   : > { %v1105_v17 = vadd.f32 %v1005_v5, %v403_v63  ;;  %v1112_v42 = vadd.f32 %v1012_v18, %v410_v36  ;;  %v6766_v5 = vld [vmem:[#allocation8_spill] sm:$0xff]  ;;  %v404_v63 = vld [vmem:[%s6449_s1 + $0x8] sm:$0xff]  ;;  %v439_v36 = vld [vmem:[%s6449_s1 + $0x120] sm:$0xff] }
 0x297   : > { %v4937_v7 = vpop.permute.xlu1 %1587  ;;  %v4939_v19 = vpop.permute.xlu0 %1595  ;;  %v1010_v18 = vmul.f32 %v4905_v8, %v6766_v5 }
 0x298   : > { %6759 = vst [vmem:[#allocation7_spill] sm:$0xff] %v4937_v7  ;;  %v1826_v34 = vpop.permute.xlu2 %1825  ;;  %v1707_v4 = vadd.f32 %v1607_v3, %v1105_v17  ;;  %v1714_v46 = vadd.f32 %v1614_v14, %v1112_v42  ;;  %v1106_v14 = vadd.f32 %v1006_v44, %v404_v63  ;;  %v6769_v63 = vld [vmem:[#allocation9_spill] sm:$0xff] }
 0x299   : > { %6760 = vst [vmem:[#allocation166_spill] sm:$0xff] %v4939_v19  ;;  %v2213_v12 = vmul.f32 %v4922_v2, %v1826_v34  ;;  %v6765_v19 = vld [vmem:[#allocation74_spill] sm:$0xff]  ;;  %v1110_v42 = vadd.f32 %v1010_v18, %v408_v40  ;;  %v406_v40 = vld [vmem:[%s6449_s1 + $0x18] sm:$0xff] }
 0x29a   : > { %v1041_v54 = vmul.f32 %v4905_v8, %v6765_v19  ;;  %v1612_v19 = vmul.f32 %v4912_v48, %v4661_v50 }
 0x29b   : > { %v2313_v28 = vadd.f32 %v2213_v12, %v1711_v1 }
 0x29c   : > { %v1141_v17 = vadd.f32 %v1041_v54, %v439_v36  ;;  %v1712_v5 = vadd.f32 %v1612_v19, %v1110_v42  ;;  %v1013_v36 = vmul.f32 %v4905_v8, %v6769_v63  ;;  %v1610_v19 = vmul.f32 %v4912_v48, %v4652_v62 }
 0x29d   : > { %2414 = vst.msk [vmem:[#allocation2 + $0x20] sm:$0xff] %vm2409_vm0, %v2313_v28 }
 0x29f   : > { %v4957_v34 = vpop.permute.xlu1 %1599 }
 0x2a0   : > { %6763 = vst [vmem:[#allocation12_spill] sm:$0xff] %v4957_v34  ;;  %v1838_v12 = vpop.permute.xlu2 %1837  ;;  %v1810_v1 = vpop.permute.xlu0 %1809  ;;  %v6767_v34 = vld [vmem:[#allocation14_spill] sm:$0xff] }
 0x2a1   : > { %v2216_v7 = vmul.f32 %v4922_v2, %v1838_v12  ;;  %v2209_v39 = vmul.f32 %v4922_v2, %v1810_v1  ;;  %v1008_v50 = vmul.f32 %v4905_v8, %v6767_v34  ;;  %v411_v34 = vld [vmem:[%s6449_s1 + $0x40] sm:$0xff] }
 0x2a2   : > { %v1113_v62 = vadd.f32 %v1013_v36, %v411_v34 }
 0x2a3   : > { %v2316_v0 = vadd.f32 %v2216_v7, %v1714_v46  ;;  %v2309_v28 = vadd.f32 %v2209_v39, %v1707_v4  ;;  %v1608_v7 = vmul.f32 %v4912_v48, %v4618_v33  ;;  %v1643_v39 = vmul.f32 %v4912_v48, %v4722_v60 }
 0x2a4   : > { %v2514_v3 = vld [vmem:[#allocation2 + $0x20] sm:$0xff] }
 0x2a5   : > { %2417 = vst.msk [vmem:[#allocation2 + $0x38] sm:$0xff] %vm2409_vm0, %v2316_v0  ;;  %2526 = vrot.lane.b32.xlu1 %v2514_v3, %s3891_s17  ;;  %v1708_v4 = vadd.f32 %v1608_v7, %v1106_v14  ;;  %v1743_v33 = vadd.f32 %v1643_v39, %v1141_v17  ;;  %v440_v7 = vld [vmem:[%s6449_s1 + $0x128] sm:$0xff]  ;;  %v1644_v14 = vmul.f32 %v4912_v48, %v4753_v6  ;;  %v3745_v17 = vld [vmem:[%s3991_s21 + $0x138] sm:$0xff] }
 0x2a6   : > { %2410 = vst.msk [vmem:[#allocation2] sm:$0xff] %vm2409_vm0, %v2309_v28  ;;  %v6768_v28 = vld [vmem:[#allocation73_spill] sm:$0xff] }
 0x2a7   : > { %v1042_v44 = vmul.f32 %v4905_v8, %v6768_v28 }
 0x2a8   : > { %v1954_v12 = vpop.permute.xlu2 %1953  ;;  %v1814_v1 = vpop.permute.xlu1 %1813 }
 0x2a9   : > { %v2245_v46 = vmul.f32 %v4922_v2, %v1954_v12  ;;  %v2210_v60 = vmul.f32 %v4922_v2, %v1814_v1  ;;  %v1830_v0 = vpop.permute.xlu0 %1829  ;;  %v1615_v12 = vmul.f32 %v4912_v48, %v4670_v53  ;;  %v1108_v1 = vadd.f32 %v1008_v50, %v406_v40  ;;  %v6771_v50 = vld [vmem:[#allocation54_spill] sm:$0xff]  ;;  %v409_v40 = vld [vmem:[%s6449_s1 + $0x30] sm:$0xff] }
 0x2aa   : > { %v2214_v3 = vmul.f32 %v4922_v2, %v1830_v0 }
 0x2ab   : > { %v2345_v54 = vadd.f32 %v2245_v46, %v1743_v33  ;;  %v2310_v18 = vadd.f32 %v2210_v60, %v1708_v4  ;;  %v1142_v4 = vadd.f32 %v1042_v44, %v440_v7  ;;  %v1710_v46 = vadd.f32 %v1610_v19, %v1108_v1  ;;  %v441_v7 = vld [vmem:[%s6449_s1 + $0x130] sm:$0xff] }
 0x2ac   : > { %v2314_v39 = vadd.f32 %v2214_v3, %v1712_v5  ;;  %v1715_v53 = vadd.f32 %v1615_v12, %v1113_v62  ;;  %v1043_v44 = vmul.f32 %v4905_v8, %v6771_v50  ;;  %v1647_v1 = vmul.f32 %v4912_v48, %v4762_v47 }
 0x2ad   : > { %2446 = vst.msk [vmem:[#allocation2 + $0x120] sm:$0xff] %vm2409_vm0, %v2345_v54  ;;  %1965 = vperm.xlu1 %3625, %v3745_v17   ;;  %v2518_v42 = vld [vmem:[#allocation2] sm:$0xff]  ;;  %v1744_v60 = vadd.f32 %v1644_v14, %v1142_v4  ;;  %v1613_v17 = vmul.f32 %v4912_v48, %v4636_v15  ;;  %v3746_v4 = vld [vmem:[%s3991_s21 + $0x158] sm:$0xff] }
 0x2ae   : > { %2411 = vst.msk [vmem:[#allocation2 + $0x8] sm:$0xff] %vm2409_vm0, %v2310_v18  ;;  %2542 = vrot.lane.b32.xlu2 %v2518_v42, %s3892_s25  ;;  %v6770_v54 = vld [vmem:[#allocation18_spill] sm:$0xff]  ;;  %v1645_v42 = vmul.f32 %v4912_v48, %v4760_v29 }
 0x2af   : > { %2415 = vst.msk [vmem:[#allocation2 + $0x28] sm:$0xff] %vm2409_vm0, %v2314_v39  ;;  %v1011_v18 = vmul.f32 %v4905_v8, %v6770_v54  ;;  %v6772_v39 = vld [vmem:[#allocation79_spill] sm:$0xff]  ;;  %v443_v14 = vld [vmem:[%s6449_s1 + $0x140] sm:$0xff] }
 0x2b0   : > { %v1958_v33 = vpop.permute.xlu2 %1957  ;;  %v1822_v6 = vpop.permute.xlu1 %1821  ;;  %v1045_v34 = vmul.f32 %v4905_v8, %v6772_v39  ;;  %v6773_v54 = vld [vmem:[#allocation21_spill] sm:$0xff]  ;;  %v444_v39 = vld [vmem:[%s6449_s1 + $0x148] sm:$0xff] }
 0x2b1   : > { %v2246_v0 = vmul.f32 %v4922_v2, %v1958_v33  ;;  %v2212_v5 = vmul.f32 %v4922_v2, %v1822_v6  ;;  %v1842_v3 = vpop.permute.xlu0 %1841  ;;  %v1111_v33 = vadd.f32 %v1011_v18, %v409_v40  ;;  %v1143_v6 = vadd.f32 %v1043_v44, %v441_v7 }
 0x2b2   : > { %v2217_v28 = vmul.f32 %v4922_v2, %v1842_v3  ;;  %v1145_v15 = vadd.f32 %v1045_v34, %v443_v14  ;;  %v1014_v18 = vmul.f32 %v4905_v8, %v6773_v54  ;;  %v1616_v34 = vmul.f32 %v4912_v48, %v4643_v56 }
 0x2b3   : > { %v2346_v63 = vadd.f32 %v2246_v0, %v1744_v60  ;;  %v2312_v36 = vadd.f32 %v2212_v5, %v1710_v46  ;;  %v1713_v60 = vadd.f32 %v1613_v17, %v1111_v33  ;;  %v1745_v0 = vadd.f32 %v1645_v42, %v1143_v6 }
 0x2b4   : > { %v2317_v19 = vadd.f32 %v2217_v28, %v1715_v53  ;;  %v1747_v53 = vadd.f32 %v1647_v1, %v1145_v15  ;;  %v445_v15 = vld [vmem:[%s6449_s1 + $0x150] sm:$0xff] }
 0x2b5   : > { %2447 = vst.msk [vmem:[#allocation2 + $0x128] sm:$0xff] %vm2409_vm0, %v2346_v63  ;;  %v2519_v12 = vld [vmem:[#allocation2 + $0x8] sm:$0xff] }
 0x2b6   : > { %2413 = vst.msk [vmem:[#allocation2 + $0x18] sm:$0xff] %vm2409_vm0, %v2312_v36  ;;  %2544 = vrot.lane.b32.xlu1 %v2519_v12, %s3892_s25  ;;  %1981 = vperm.xlu2 %3626, %v3746_v4   ;;  %v2515_v62 = vld [vmem:[#allocation2 + $0x28] sm:$0xff]  ;;  %v6774_v36 = vld [vmem:[#allocation60_spill] sm:$0xff] }
 0x2b7   : > { %2418 = vst.msk [vmem:[#allocation2 + $0x40] sm:$0xff] %vm2409_vm0, %v2317_v19  ;;  %2528 = vrot.lane.b32.xlu0 %v2515_v62, %s3891_s17  ;;  %v412_v63 = vld [vmem:[%s6449_s1 + $0x48] sm:$0xff]  ;;  %v1046_v40 = vmul.f32 %v4905_v8, %v6774_v36  ;;  %v1648_v19 = vmul.f32 %v4912_v48, %v4769_v27 }
 0x2b8   : > { %v1962_v29 = vpop.permute.xlu2 %1961  ;;  %v1834_v46 = vpop.permute.xlu1 %1833  ;;  %v1114_v14 = vadd.f32 %v1014_v18, %v412_v63  ;;  %v1086_v18 = vmul.f32 %v4905_v8, %v4591_v24  ;;  %v484_v63 = vld [vmem:[%s6449_s1 + $0x288] sm:$0xff]  ;;  %v1689_v24 = vmul.f32 %v4912_v48, %v4882_v38 }
 0x2b9   : > { %v2247_v47 = vmul.f32 %v4922_v2, %v1962_v29  ;;  %v2215_v5 = vmul.f32 %v4922_v2, %v1834_v46  ;;  %v1970_v3 = vpop.permute.xlu0 %1969  ;;  %v1146_v17 = vadd.f32 %v1046_v40, %v444_v39  ;;  %v1687_v29 = vmul.f32 %v4912_v48, %v4880_v57  ;;  %v485_v40 = vld [vmem:[%s6449_s1 + $0x290] sm:$0xff] }
 0x2ba   : > { %v2249_v28 = vmul.f32 %v4922_v2, %v1970_v3  ;;  %v1716_v12 = vadd.f32 %v1616_v34, %v1114_v14  ;;  %v1186_v39 = vadd.f32 %v1086_v18, %v484_v63  ;;  %v3758_v18 = vld [vmem:[%s3991_s21 + $0x2a8] sm:$0xff]  ;;  %v6776_v63 = vld [vmem:[#allocation85_spill] sm:$0xff] }
 0x2bb   : > { %v2347_v50 = vadd.f32 %v2247_v47, %v1745_v0  ;;  %v2315_v44 = vadd.f32 %v2215_v5, %v1713_v60  ;;  %v1748_v4 = vadd.f32 %v1648_v19, %v1146_v17  ;;  %v3747_v60 = vld [vmem:[%s3991_s21 + $0x100] sm:$0xff]  ;;  %v2520_v0 = vld [vmem:[#allocation2 + $0x10] sm:$0xff] }
 0x2bc   : > { %v2349_v7 = vadd.f32 %v2249_v28, %v1747_v53 }
 0x2bd   : > { %2448 = vst.msk [vmem:[#allocation2 + $0x130] sm:$0xff] %vm2409_vm0, %v2347_v50 }
 0x2be   : > { %2416 = vst.msk [vmem:[#allocation2 + $0x30] sm:$0xff] %vm2409_vm0, %v2315_v44  ;;  %2193 = vperm.xlu1 %3625, %v4498_v41   ;;  %2141 = vperm.xlu2 %3626, %v6699_v25   ;;  %v1085_v41 = vmul.f32 %v4905_v8, %v4551_v45  ;;  %v6775_v25 = vld [vmem:[#allocation86_spill] sm:$0xff]  ;;  %v1649_v45 = vmul.f32 %v4912_v48, %v4740_v30 }
 0x2bf   : > { %2450 = vst.msk [vmem:[#allocation2 + $0x140] sm:$0xff] %vm2409_vm0, %v2349_v7  ;;  %2177 = vperm.xlu0 %3624, %v6714_v13   ;;  %v1047_v33 = vmul.f32 %v4905_v8, %v6775_v25  ;;  %v483_v13 = vld [vmem:[%s6449_s1 + $0x280] sm:$0xff]  ;;  %v1087_v44 = vmul.f32 %v4905_v8, %v4589_v20  ;;  %v1688_v7 = vmul.f32 %v4912_v48, %v4857_v9  ;;  %v3748_v20 = vld [vmem:[%s3991_s21 + $0xb0] sm:$0xff]  ;;  %v3752_v25 = vld [vmem:[%s3991_s21 + $0xd8] sm:$0xff] }
 0x2c0   : > { %v1846_v42 = vpop.permute.xlu1 %1845  ;;  %v1185_v47 = vadd.f32 %v1085_v41, %v483_v13  ;;  %v2781_v41 = vld [vmem:[%s6451_s3 + $0x50] sm:$0xff]  ;;  %v2778_v13 = vld [vmem:[%s6451_s3 + $0x38] sm:$0xff] }
 0x2c1   : > { %v2218_v56 = vmul.f32 %v4922_v2, %v1846_v42  ;;  %v1974_v1 = vpop.permute.xlu0 %1973  ;;  %v1147_v5 = vadd.f32 %v1047_v33, %v445_v15  ;;  %v1187_v34 = vadd.f32 %v1087_v44, %v485_v40  ;;  %v1788_v14 = vadd.f32 %v1688_v7, %v1186_v39  ;;  %v2779_v33 = vld [vmem:[%s6451_s3 + $0x40] sm:$0xff]  ;;  %v446_v40 = vld [vmem:[%s6449_s1 + $0x158] sm:$0xff] }
 0x2c2   : > { %v2250_v27 = vmul.f32 %v4922_v2, %v1974_v1  ;;  %v1787_v57 = vadd.f32 %v1687_v29, %v1185_v47  ;;  %v2521_v1 = vld [vmem:[#allocation2 + $0x18] sm:$0xff]  ;;  %v2773_v47 = vld [vmem:[%s6451_s3 + $0x10] sm:$0xff]  ;;  %v1650_v7 = vmul.f32 %v4912_v48, %v4771_v26 }
 0x2c3   : > { %v2318_v62 = vadd.f32 %v2218_v56, %v1716_v12  ;;  %v1749_v54 = vadd.f32 %v1649_v45, %v1147_v5  ;;  %v1789_v42 = vadd.f32 %v1689_v24, %v1187_v34  ;;  %v3753_v29 = vld [vmem:[%s3991_s21 + $0x2f8] sm:$0xff]  ;;  %v2776_v45 = vld [vmem:[%s6451_s3 + $0x28] sm:$0xff]  ;;  %v3755_v5 = vld [vmem:[%s3991_s21 + $0x2c0] sm:$0xff] }
 0x2c4   : > { %v2350_v6 = vadd.f32 %v2250_v27, %v1748_v4  ;;  %v3750_v4 = vld [vmem:[%s3991_s21 + $0x108] sm:$0xff]  ;;  %v2782_v27 = vld [vmem:[%s6451_s3 + $0x58] sm:$0xff]  ;;  %v3761_v34 = vld [vmem:[%s3991_s21 + $0x160] sm:$0xff] }
 0x2c5   : > { %2419 = vst.msk [vmem:[#allocation2 + $0x48] sm:$0xff] %vm2409_vm0, %v2318_v62  ;;  %v2516_v46 = vld [vmem:[#allocation2 + $0x30] sm:$0xff]  ;;  %2848 = vmatpush.msra.mxu0 %v2782_v27  ;;  %3545 = vmatpush.msra.mxu2 %v2782_v27  ;;  %v2567_v62 = vld [vmem:[#allocation2 + $0x120] sm:$0xff]  ;;  %v486_v26 = vld [vmem:[%s6449_s1 + $0x298] sm:$0xff] }
 0x2c6   : > { %2451 = vst.msk [vmem:[#allocation2 + $0x148] sm:$0xff] %vm2409_vm0, %v2350_v6  ;;  %1937 = vperm.xlu1 %3625, %v3747_v60   ;;  %2530 = vrot.lane.b32.xlu2 %v2516_v46, %s3891_s17  ;;  %v2777_v6 = vld [vmem:[%s6451_s3 + $0x30] sm:$0xff]  ;;  %v2571_v15 = vld [vmem:[#allocation2 + $0x140] sm:$0xff] }
 0x2c7   : > { %2546 = vrot.lane.b32.xlu0 %v2520_v0, %s3892_s25  ;;  %2849 = vmatpush.msra.mxu0 %v2781_v41  ;;  %v3754_v46 = vld [vmem:[%s3991_s21 + $0x110] sm:$0xff]  ;;  %v2775_v60 = vld [vmem:[%s6451_s3 + $0x20] sm:$0xff]  ;;  %v2774_v0 = vld [vmem:[%s6451_s3 + $0x18] sm:$0xff] }
 0x2c8   : > { %v2130_v3 = vpop.permute.xlu1 %2129  ;;  %3546 = vmatpush.msra.mxu2 %v2781_v41 }
 0x2c9   : > { %v2289_v53 = vmul.f32 %v4922_v2, %v2130_v3  ;;  %v1978_v28 = vpop.permute.xlu0 %1977  ;;  %v2772_v3 = vld [vmem:[%s6451_s3 + $0x8] sm:$0xff] }
 0x2ca   : > { %v2251_v30 = vmul.f32 %v4922_v2, %v1978_v28  ;;  %v2568_v28 = vld [vmem:[#allocation2 + $0x128] sm:$0xff] }
 0x2cb   : > { %v2389_v50 = vadd.f32 %v2289_v53, %v1787_v57  ;;  %v3756_v57 = vld [vmem:[%s3991_s21 + $0x2a0] sm:$0xff] }
 0x2cc   : > { %v2351_v36 = vadd.f32 %v2251_v30, %v1749_v54  ;;  %v2771_v53 = vld [vmem:[%s6451_s3] sm:$0xff]  ;;  %v2569_v30 = vld [vmem:[#allocation2 + $0x130] sm:$0xff] }
 0x2cd   : > { %2490 = vst.msk [vmem:[#allocation2 + $0x280] sm:$0xff] %vm2409_vm0, %v2389_v50  ;;  %v2572_v54 = vld [vmem:[#allocation2 + $0x148] sm:$0xff] }
 0x2ce   : > { %2452 = vst.msk [vmem:[#allocation2 + $0x150] sm:$0xff] %vm2409_vm0, %v2351_v36  ;;  %1897 = vperm.xlu1 %3625, %v3748_v20   ;;  %2181 = vperm.xlu2 %3626, %v4480_v37   ;;  %v3749_v37 = vld [vmem:[%s3991_s21 + $0xd0] sm:$0xff]  ;;  %v3759_v50 = vld [vmem:[%s3991_s21 + $0x2c8] sm:$0xff]  ;;  %v1048_v36 = vmul.f32 %v4905_v8, %v6776_v63 }
 0x2cf   : > { %2197 = vperm.xlu0 %3624, %v6720_v49   ;;  %v2517_v49 = vld [vmem:[#allocation2 + $0x38] sm:$0xff]  ;;  %v3760_v20 = vld [vmem:[%s3991_s21 + $0x2b0] sm:$0xff] }
 0x2d0   : > { %v2134_v19 = vpop.permute.xlu1 %2133  ;;  %v1148_v39 = vadd.f32 %v1048_v36, %v446_v40 }
 0x2d1   : > { %v2290_v9 = vmul.f32 %v4922_v2, %v2134_v19  ;;  %v2138_v17 = vpop.permute.xlu0 %2137 }
 0x2d2   : > { %v2291_v38 = vmul.f32 %v4922_v2, %v2138_v17  ;;  %v1088_v17 = vmul.f32 %v4905_v8, %v4560_v11 }
 0x2d3   : > { %v2390_v12 = vadd.f32 %v2290_v9, %v1788_v14  ;;  %v1750_v14 = vadd.f32 %v1650_v7, %v1148_v39  ;;  %v429_v7 = vld [vmem:[%s6449_s1 + $0xd0] sm:$0xff]  ;;  %v1633_v39 = vmul.f32 %v4912_v48, %v4724_v51 }
 0x2d4   : > { %v2391_v56 = vadd.f32 %v2291_v38, %v1789_v42  ;;  %v1690_v38 = vmul.f32 %v4912_v48, %v4886_v10 }
 0x2d5   : > { %2491 = vst.msk [vmem:[#allocation2 + $0x288] sm:$0xff] %vm2409_vm0, %v2390_v12  ;;  %v2573_v24 = vld [vmem:[#allocation2 + $0x150] sm:$0xff] }
 0x2d6   : > { %2492 = vst.msk [vmem:[#allocation2 + $0x290] sm:$0xff] %vm2409_vm0, %v2391_v56  ;;  %2548 = vrot.lane.b32.xlu1 %v2521_v1, %s3892_s25  ;;  %1913 = vperm.xlu2 %3626, %v3749_v37   ;;  %v3762_v12 = vld [vmem:[%s3991_s21 + $0x2d0] sm:$0xff]  ;;  %v1188_v56 = vadd.f32 %v1088_v17, %v486_v26  ;;  %v2510_v1 = vld [vmem:[#allocation2 + $0x280] sm:$0xff] }
 0x2d7   : > { %2532 = vrot.lane.b32.xlu0 %v2517_v49, %s3891_s17 }
 0x2de   : > { %2201 = vperm.xlu1 %3625, %v6724_v21   ;;  %1941 = vperm.xlu2 %3626, %v3750_v4   ;;  %v3751_v21 = vld [vmem:[%s3991_s21 + $0xb8] sm:$0xff]  ;;  %v1790_v4 = vadd.f32 %v1690_v38, %v1188_v56 }
 0x2df   : > { %2185 = vperm.xlu0 %3624, %v6715_v23   ;;  %v2780_v23 = vld [vmem:[%s6451_s3 + $0x48] sm:$0xff] }
 0x2e0   : > { %2850 = vmatpush.msra.mxu0 %v2780_v23  ;;  %3547 = vmatpush.msra.mxu2 %v2780_v23  ;;  %v1646_v23 = vmul.f32 %v4912_v48, %v4731_v58  ;;  %v1098_v58 = vmul.f32 %v4905_v8, %v4625_v32  ;;  %v2511_v32 = vld [vmem:[#allocation2 + $0x288] sm:$0xff] }
 0x2e2   : > { %2851 = vmatpush.msra.mxu0 %v2779_v33  ;;  %3548 = vmatpush.msra.mxu2 %v2779_v33 }
 0x2e4   : > { %2852 = vmatpush.msra.mxu0 %v2778_v13  ;;  %3549 = vmatpush.msra.mxu2 %v2778_v13 }
 0x2e6   : > { %2579 = vrot.lane.b32.xlu1 %v2567_v62, %s3891_s17  ;;  %1901 = vperm.xlu2 %3626, %v3751_v21   ;;  %v6777_v62 = vld [vmem:[#allocation80_spill] sm:$0xff] }
 0x2e7   : > { %1917 = vperm.xlu0 %3624, %v3752_v25   ;;  %2853 = vmatpush.msra.mxu0 %v2777_v6  ;;  %v1044_v10 = vmul.f32 %v4905_v8, %v6777_v62  ;;  %v442_v21 = vld [vmem:[%s6449_s1 + $0x138] sm:$0xff] }
 0x2e8   : > { %3550 = vmatpush.msra.mxu2 %v2777_v6  ;;  %v3763_v6 = vld [vmem:[%s3991_s21 + $0x168] sm:$0xff] }
 0x2e9   : > { %2854 = vmatpush.msra.mxu0 %v2776_v45  ;;  %v1144_v13 = vadd.f32 %v1044_v10, %v442_v21  ;;  %v435_v10 = vld [vmem:[%s6449_s1 + $0x100] sm:$0xff]  ;;  %v1640_v21 = vmul.f32 %v4912_v48, %v4713_v55 }
 0x2ea   : > { %3551 = vmatpush.msra.mxu2 %v2776_v45 }
 0x2eb   : > { %2855 = vmatpush.msra.mxu0 %v2775_v60 }
 0x2ec   : > { %3552 = vmatpush.msra.mxu2 %v2775_v60 }
 0x2ed   : > { %2856 = vmatpush.msra.mxu0 %v2774_v0 }
 0x2ee   : > { %2189 = vperm.xlu1 %3625, %v3753_v29   ;;  %2595 = vrot.lane.b32.xlu2 %v2571_v15, %s3892_s25  ;;  %v1746_v29 = vadd.f32 %v1646_v23, %v1144_v13  ;;  %v3767_v23 = vld [vmem:[%s3991_s21 + $0x90] sm:$0xff] }
 0x2ef   : > { %1945 = vperm.xlu0 %3624, %v3754_v46   ;;  %2857 = vmatpush.msra.mxu0 %v2773_v47 }
 0x2f0   : > { %3553 = vmatpush.msra.mxu2 %v2774_v0  ;;  %v496_v0 = vld [vmem:[%s6449_s1 + $0x2e8] sm:$0xff] }
 0x2f1   : > { %2858 = vmatpush.msra.mxu0 %v2772_v3 }
 0x2f2   : > { %3554 = vmatpush.msra.mxu2 %v2773_v47  ;;  %v1700_v47 = vmul.f32 %v4912_v48, %v4884_v59  ;;  %v1101_v59 = vmul.f32 %v4905_v8, %v4634_v35  ;;  %v495_v35 = vld [vmem:[%s6449_s1 + $0x2e0] sm:$0xff] }
 0x2f3   : > { %2859 = vmatpush.msra.mxu0 %v2771_v53 }
 0x2f4   : > { %3555 = vmatpush.msra.mxu2 %v2772_v3  ;;  %v3765_v3 = vld [vmem:[%s3991_s21 + $0x2d8] sm:$0xff] }
 0x2f6   : > { %2161 = vperm.xlu1 %3625, %v3755_v5   ;;  %2205 = vperm.xlu2 %3626, %v4510_v61   ;;  %v3757_v61 = vld [vmem:[%s3991_s21 + $0x118] sm:$0xff] }
 0x2f7   : > { %2145 = vperm.xlu0 %3624, %v3756_v57   ;;  %3556 = vmatpush.msra.mxu2 %v2771_v53  ;;  %v3764_v5 = vld [vmem:[%s3991_s21 + $0x2b8] sm:$0xff]  ;;  %v1198_v57 = vadd.f32 %v1098_v58, %v496_v0 }
 0x2fe   : > { %1949 = vperm.xlu1 %3625, %v3757_v61   ;;  %2581 = vrot.lane.b32.xlu2 %v2568_v28, %s3891_s17  ;;  %v1800_v61 = vadd.f32 %v1700_v47, %v1198_v57 }
 0x2ff   : > { %2597 = vrot.lane.b32.xlu0 %v2572_v54, %s3892_s25 }
 0x306   : > { %2583 = vrot.lane.b32.xlu1 %v2569_v30, %s3891_s17  ;;  %2149 = vperm.xlu2 %3626, %v3758_v18  }
 0x307   : > { %2165 = vperm.xlu0 %3624, %v3759_v50   ;;  %v6778_v50 = vld [vmem:[#allocation30_spill] sm:$0xff] }
 0x308   : > { %v2543_v44 = vpop.permute.xlu2 %2542 }
 0x30e   : > { %2153 = vperm.xlu1 %3625, %v3760_v20   ;;  %2599 = vrot.lane.b32.xlu2 %v2573_v24, %s3892_s25  ;;  %v1097_v24 = vmul.f32 %v4905_v8, %v4587_v16  ;;  %v499_v20 = vld [vmem:[%s6449_s1 + $0x300] sm:$0xff]  ;;  %v1699_v16 = vmul.f32 %v4912_v48, %v4924_v43 }
 0x30f   : > { %1985 = vperm.xlu0 %3624, %v3761_v34   ;;  %v1703_v34 = vmul.f32 %v4912_v48, %v4890_v22 }
 0x310   : > { %v1982_v19 = vpop.permute.xlu2 %1981  ;;  %v1197_v17 = vadd.f32 %v1097_v24, %v495_v35 }
 0x311   : > { %v2252_v9 = vmul.f32 %v4922_v2, %v1982_v19  ;;  %v3766_v19 = vld [vmem:[%s3991_s21 + $0x170] sm:$0xff] }
 0x313   : > { %v2352_v42 = vadd.f32 %v2252_v9, %v1750_v14  ;;  %v1201_v9 = vadd.f32 %v1101_v59, %v499_v20 }
 0x315   : > { %2453 = vst.msk [vmem:[#allocation2 + $0x158] sm:$0xff] %vm2409_vm0, %v2352_v42 }
 0x316   : > { %2169 = vperm.xlu2 %3626, %v3762_v12   ;;  %v1803_v12 = vadd.f32 %v1703_v34, %v1201_v9 }
 0x317   : > { %v2527_v37 = vpop.permute.xlu1 %2526 }
 0x318   : > { %v2554_v11 = vsel %vm2409_vm0, %v2510_v1, %v2527_v37  ;;  %v2142_v49 = vpop.permute.xlu2 %2141  ;;  %v6779_v1 = vld [vmem:[#allocation68_spill] sm:$0xff] }
 0x319   : > { %v2292_v27 = vmul.f32 %v4922_v2, %v2142_v49  ;;  %v2559_v41 = vsel %vm2558_vm1, %v2554_v11, %v2543_v44  ;;  %v1031_v44 = vmul.f32 %v4905_v8, %v6778_v50  ;;  %v1038_v37 = vmul.f32 %v4905_v8, %v6779_v1  ;;  %v6780_v49 = vld [vmem:[#allocation42_spill] sm:$0xff] }
 0x31a   : > { %3523 = vmatmul.msk.f32.vlgmr.msra.gmra.mxu0 %vm2783_vm2, %v2559_v41  ;;  %v1799_v11 = vadd.f32 %v1699_v16, %v1197_v17  ;;  %v500_v50 = vld [vmem:[%s6449_s1 + $0x308] sm:$0xff] }
 0x31b   : > { %v2392_v25 = vadd.f32 %v2292_v27, %v1790_v4  ;;  %v1131_v14 = vadd.f32 %v1031_v44, %v429_v7  ;;  %v1037_v4 = vmul.f32 %v4905_v8, %v6780_v49  ;;  %v436_v27 = vld [vmem:[%s6449_s1 + $0x108] sm:$0xff]  ;;  %v6783_v44 = vld [vmem:[#allocation40_spill] sm:$0xff] }
 0x31c   : > { %v2574_v33 = vld [vmem:[#allocation2 + $0x158] sm:$0xff]  ;;  %v1138_v13 = vadd.f32 %v1038_v37, %v436_v27  ;;  %v1629_v59 = vmul.f32 %v4912_v48, %v6783_v44  ;;  %v6786_v27 = vld [vmem:[#allocation134_spill] sm:$0xff] }
 0x31d   : > { %2493 = vst.msk [vmem:[#allocation2 + $0x298] sm:$0xff] %vm2409_vm0, %v2392_v25  ;;  %2601 = vrot.lane.b32.xlu1 %v2574_v33, %s3892_s25  ;;  %v1733_v38 = vadd.f32 %v1633_v39, %v1131_v14  ;;  %v1639_v33 = vmul.f32 %v4912_v48, %v4742_v52 }
 0x31e   : > { %1989 = vperm.xlu2 %3626, %v3763_v6   ;;  %v1137_v6 = vadd.f32 %v1037_v4, %v435_v10  ;;  %v501_v4 = vld [vmem:[%s6449_s1 + $0x310] sm:$0xff] }
 0x31f   : > { %v1966_v15 = vpop.permute.xlu1 %1965 }
 0x320   : > { %v2248_v46 = vmul.f32 %v4922_v2, %v1966_v15  ;;  %v5205_v45 = vpop.permute.xlu2 %2530  ;;  %v1740_v15 = vadd.f32 %v1640_v21, %v1138_v13  ;;  %v1739_v58 = vadd.f32 %v1639_v33, %v1137_v6  ;;  %v502_v33 = vld [vmem:[%s6449_s1 + $0x318] sm:$0xff] }
 0x322   : > { %v2348_v60 = vadd.f32 %v2248_v46, %v1746_v29  ;;  %v2512_v29 = vld [vmem:[#allocation2 + $0x290] sm:$0xff] }
 0x323   : > { %v2556_v55 = vsel %vm2409_vm0, %v2512_v29, %v5205_v45  ;;  %v426_v45 = vld [vmem:[%s6449_s1 + $0xb8] sm:$0xff]  ;;  %v6789_v29 = vld [vmem:[#allocation163_spill] sm:$0xff] }
 0x324   : > { %2449 = vst.msk [vmem:[#allocation2 + $0x138] sm:$0xff] %vm2409_vm0, %v2348_v60 }
 0x325   : > { %2157 = vperm.xlu1 %3625, %v3764_v5  }
 0x326   : > { %2173 = vperm.xlu2 %3626, %v3765_v3   ;;  %v6781_v3 = vld [vmem:[#allocation24_spill] sm:$0xff] }
 0x327   : > { %v1028_v57 = vmul.f32 %v4905_v8, %v6781_v3 }
 0x328   : > { %v2545_v53 = vpop.permute.xlu1 %2544  ;;  %v2182_v28 = vpop.permute.xlu2 %2181 }
 0x329   : > { %v2302_v54 = vmul.f32 %v4922_v2, %v2182_v28  ;;  %v2529_v30 = vpop.permute.xlu0 %2528  ;;  %v1128_v24 = vadd.f32 %v1028_v57, %v426_v45 }
 0x32a   : > { %v2555_v18 = vsel %vm2409_vm0, %v2511_v32, %v2529_v30  ;;  %v425_v32 = vld [vmem:[%s6449_s1 + $0xb0] sm:$0xff]  ;;  %v1102_v30 = vmul.f32 %v4905_v8, %v4632_v31 }
 0x32b   : > { %v2402_v63 = vadd.f32 %v2302_v54, %v1800_v61  ;;  %v2560_v36 = vsel %vm2558_vm1, %v2555_v18, %v2545_v53  ;;  %v2570_v40 = vld [vmem:[#allocation2 + $0x138] sm:$0xff]  ;;  %v6782_v53 = vld [vmem:[#allocation43_spill] sm:$0xff] }
 0x32c   : > { %3524 = vmatmul.msk.f32.gmra.mxu0 %vm2783_vm2, %v2560_v36  ;;  %2585 = vrot.lane.b32.xlu0 %v2570_v40, %s3891_s17  ;;  %v1027_v28 = vmul.f32 %v4905_v8, %v6782_v53  ;;  %v6785_v40 = vld [vmem:[#allocation166_spill] sm:$0xff]  ;;  %v1202_v35 = vadd.f32 %v1102_v30, %v500_v50 }
 0x32d   : > { %2503 = vst.msk [vmem:[#allocation2 + $0x2e8] sm:$0xff] %vm2409_vm0, %v2402_v63  ;;  %v6784_v63 = vld [vmem:[#allocation47_spill] sm:$0xff]  ;;  %v1704_v7 = vmul.f32 %v4912_v48, %v6785_v40  ;;  %v430_v40 = vld [vmem:[%s6449_s1 + $0xd8] sm:$0xff] }
 0x32e   : > { %1993 = vperm.xlu2 %3626, %v3766_v19   ;;  %v1630_v36 = vmul.f32 %v4912_v48, %v6784_v63  ;;  %v1127_v20 = vadd.f32 %v1027_v28, %v425_v32 }
 0x330   : > { %v2194_v42 = vpop.permute.xlu1 %2193  ;;  %v1914_v26 = vpop.permute.xlu2 %1913  ;;  %v1729_v16 = vadd.f32 %v1629_v59, %v1127_v20  ;;  %v1730_v19 = vadd.f32 %v1630_v36, %v1128_v24  ;;  %v6792_v59 = vld [vmem:[#allocation56_spill] sm:$0xff]  ;;  %v3769_v24 = vld [vmem:[%s3991_s21 + $0xe0] sm:$0xff] }
 0x331   : > { %v2305_v51 = vmul.f32 %v4922_v2, %v2194_v42  ;;  %v2235_v56 = vmul.f32 %v4922_v2, %v1914_v26  ;;  %v2178_v22 = vpop.permute.xlu0 %2177  ;;  %v1804_v42 = vadd.f32 %v1704_v7, %v1202_v35  ;;  %v1032_v63 = vmul.f32 %v4905_v8, %v6792_v59  ;;  %v6793_v7 = vld [vmem:[#allocation35_spill] sm:$0xff]  ;;  %v3770_v20 = vld [vmem:[%s3991_s21 + $0x178] sm:$0xff]  ;;  %v3771_v59 = vld [vmem:[%s3991_s21 + $0xc0] sm:$0xff] }
 0x332   : > { %v2301_v43 = vmul.f32 %v4922_v2, %v2178_v22  ;;  %v3768_v22 = vld [vmem:[%s3991_s21 + $0x98] sm:$0xff] }
 0x333   : > { %v2405_v41 = vadd.f32 %v2305_v51, %v1803_v12  ;;  %v2335_v62 = vadd.f32 %v2235_v56, %v1733_v38  ;;  %v1132_v35 = vadd.f32 %v1032_v63, %v430_v40  ;;  %v3772_v63 = vld [vmem:[%s3991_s21 + $0xa0] sm:$0xff] }
 0x334   : > { %v2401_v25 = vadd.f32 %v2301_v43, %v1799_v11  ;;  %1881 = vperm.xlu0 %3624, %v3767_v23   ;;  %v2620_v56 = vld [vmem:[#allocation2 + $0x2e8] sm:$0xff]  ;;  %v2513_v11 = vld [vmem:[#allocation2 + $0x298] sm:$0xff] }
 0x335   : > { %2506 = vst.msk [vmem:[#allocation2 + $0x300] sm:$0xff] %vm2409_vm0, %v2405_v41  ;;  %v1103_v41 = vmul.f32 %v4905_v8, %v6786_v27 }
 0x336   : > { %2436 = vst.msk [vmem:[#allocation2 + $0xd0] sm:$0xff] %vm2409_vm0, %v2335_v62  ;;  %v6787_v62 = vld [vmem:[#allocation140_spill] sm:$0xff] }
 0x337   : > { %2502 = vst.msk [vmem:[#allocation2 + $0x2e0] sm:$0xff] %vm2409_vm0, %v2401_v25  ;;  %v1104_v10 = vmul.f32 %v4905_v8, %v6787_v62  ;;  %v6788_v25 = vld [vmem:[#allocation139_spill] sm:$0xff] }
 0x338   : > { %v1938_v46 = vpop.permute.xlu1 %1937  ;;  %v1942_v60 = vpop.permute.xlu2 %1941  ;;  %v1099_v23 = vmul.f32 %v4905_v8, %v6788_v25 }
 0x339   : > { %v2241_v0 = vmul.f32 %v4922_v2, %v1938_v46  ;;  %v2242_v52 = vmul.f32 %v4922_v2, %v1942_v60  ;;  %v2547_v47 = vpop.permute.xlu0 %2546  ;;  %v1706_v46 = vmul.f32 %v4912_v48, %v6789_v29  ;;  %v6790_v60 = vld [vmem:[#allocation12_spill] sm:$0xff] }
 0x33a   : > { %v2561_v5 = vsel %vm2558_vm1, %v2556_v55, %v2547_v47  ;;  %v6791_v55 = vld [vmem:[#allocation11_spill] sm:$0xff]  ;;  %v1203_v47 = vadd.f32 %v1103_v41, %v501_v4  ;;  %v6797_v4 = vld [vmem:[#allocation160_spill] sm:$0xff] }
 0x33b   : > { %v2341_v61 = vadd.f32 %v2241_v0, %v1739_v58  ;;  %v2342_v54 = vadd.f32 %v2242_v52, %v1740_v15  ;;  %3525 = vmatmul.msk.f32.gmra.mxu0 %vm2783_vm2, %v2561_v5  ;;  %v497_v15 = vld [vmem:[%s6449_s1 + $0x2f0] sm:$0xff]  ;;  %v1705_v58 = vmul.f32 %v4912_v48, %v6790_v60  ;;  %v1701_v0 = vmul.f32 %v4912_v48, %v6791_v55 }
 0x33c   : > { %v2623_v18 = vld [vmem:[#allocation2 + $0x300] sm:$0xff]  ;;  %v1204_v5 = vadd.f32 %v1104_v10, %v502_v33  ;;  %v1199_v3 = vadd.f32 %v1099_v23, %v497_v15  ;;  %v1692_v27 = vmul.f32 %v4912_v48, %v6797_v4  ;;  %v6798_v41 = vld [vmem:[#allocation7_spill] sm:$0xff]  ;;  %v6799_v10 = vld [vmem:[#allocation52_spill] sm:$0xff] }
 0x33d   : > { %2442 = vst.msk [vmem:[#allocation2 + $0x100] sm:$0xff] %vm2409_vm0, %v2341_v61  ;;  %2647 = vrot.lane.b32.xlu1 %v2623_v18, %s3892_s25  ;;  %v2677_v13 = vld [vmem:[#allocation2 + $0xd0] sm:$0xff]  ;;  %v1805_v61 = vadd.f32 %v1705_v58, %v1203_v47  ;;  %v1702_v62 = vmul.f32 %v4912_v48, %v6798_v41 }
 0x33e   : > { %2443 = vst.msk [vmem:[#allocation2 + $0x108] sm:$0xff] %vm2409_vm0, %v2342_v54  ;;  %v2619_v31 = vld [vmem:[#allocation2 + $0x2e0] sm:$0xff]  ;;  %v1806_v28 = vadd.f32 %v1706_v46, %v1204_v5  ;;  %v1801_v30 = vadd.f32 %v1701_v0, %v1199_v3  ;;  %v6800_v5 = vld [vmem:[#allocation135_spill] sm:$0xff] }
 0x33f   : > { %2631 = vrot.lane.b32.xlu0 %v2619_v31, %s3891_s17  ;;  %v1634_v31 = vmul.f32 %v4912_v48, %v6793_v7  ;;  %v1093_v3 = vmul.f32 %v4905_v8, %v6800_v5  ;;  %v6810_v5 = vld [vmem:[#allocation59_spill] sm:$0xff] }
 0x340   : > { %v1898_v39 = vpop.permute.xlu1 %1897  ;;  %v1902_v34 = vpop.permute.xlu2 %1901 }
 0x341   : > { %v2231_v14 = vmul.f32 %v4922_v2, %v1898_v39  ;;  %v2232_v9 = vmul.f32 %v4922_v2, %v1902_v34  ;;  %v2198_v17 = vpop.permute.xlu0 %2197 }
 0x342   : > { %v2306_v26 = vmul.f32 %v4922_v2, %v2198_v17 }
 0x343   : > { %v2331_v38 = vadd.f32 %v2231_v14, %v1729_v16  ;;  %v2332_v12 = vadd.f32 %v2232_v9, %v1730_v19  ;;  %v1734_v9 = vadd.f32 %v1634_v31, %v1132_v35  ;;  %v5412_v35 = vld [vmem:[%s6450_s2] ss:$0 sm:$0xff] }
 0x344   : > { %v2406_v51 = vadd.f32 %v2306_v26, %v1804_v42  ;;  %v2563_v39 = vld [vmem:[#allocation2 + $0x100] sm:$0xff]  ;;  %v6794_v26 = vld [vmem:[#allocation131_spill] sm:$0xff] }
 0x345   : > { %2432 = vst.msk [vmem:[#allocation2 + $0xb0] sm:$0xff] %vm2409_vm0, %v2331_v38  ;;  %2633 = vrot.lane.b32.xlu1 %v2620_v56, %s3891_s17  ;;  %v1100_v38 = vmul.f32 %v4905_v8, %v6794_v26  ;;  %v6796_v56 = vld [vmem:[#allocation67_spill] sm:$0xff] }
 0x346   : > { %2433 = vst.msk [vmem:[#allocation2 + $0xb8] sm:$0xff] %vm2409_vm0, %v2332_v12  ;;  %v6795_v12 = vld [vmem:[#allocation132_spill] sm:$0xff]  ;;  %v2564_v41 = vld [vmem:[#allocation2 + $0x108] sm:$0xff] }
 0x347   : > { %2507 = vst.msk [vmem:[#allocation2 + $0x308] sm:$0xff] %vm2409_vm0, %v2406_v51  ;;  %1885 = vperm.xlu0 %3624, %v3768_v22   ;;  %v1090_v51 = vmul.f32 %v4905_v8, %v6795_v12  ;;  %v1039_v22 = vmul.f32 %v4905_v8, %v6796_v56  ;;  %v5428_v12 = vld [vmem:[%s6450_s2 + $0x1] ss:$0 sm:$0xff] }
 0x348   : > { %v2549_v1 = vpop.permute.xlu1 %2548  ;;  %v2596_v37 = vpop.permute.xlu2 %2595 }
 0x349   : > { %v2533_v43 = vpop.permute.xlu0 %2532 }
 0x34a   : > { %v2557_v49 = vsel %vm2409_vm0, %v2513_v11, %v2533_v43  ;;  %v488_v11 = vld [vmem:[%s6449_s1 + $0x2a8] sm:$0xff] }
 0x34b   : > { %v2562_v21 = vsel %vm2558_vm1, %v2557_v49, %v2549_v1  ;;  %v498_v1 = vld [vmem:[%s6449_s1 + $0x2f8] sm:$0xff]  ;;  %v437_v49 = vld [vmem:[%s6449_s1 + $0x110] sm:$0xff] }
 0x34c   : > { %3526 = vmatmul.msk.f32.gmra.mxu0 %vm2783_vm2, %v2562_v21  ;;  %v2673_v6 = vld [vmem:[#allocation2 + $0xb0] sm:$0xff]  ;;  %v1641_v21 = vmul.f32 %v4912_v48, %v6799_v10  ;;  %v1200_v33 = vadd.f32 %v1100_v38, %v498_v1 }
 0x34d   : > { %2703 = vrot.lane.b32.xlu1 %v2677_v13, %s3892_s25  ;;  %v2674_v25 = vld [vmem:[#allocation2 + $0xb8] sm:$0xff]  ;;  %v1190_v13 = vadd.f32 %v1090_v51, %v488_v11  ;;  %v493_v38 = vld [vmem:[%s6449_s1 + $0x2d0] sm:$0xff] }
 0x34e   : > { %v2624_v52 = vld [vmem:[#allocation2 + $0x308] sm:$0xff]  ;;  %v1802_v60 = vadd.f32 %v1702_v62, %v1200_v33 }
 0x34f   : > { %2687 = vrot.lane.b32.xlu0 %v2673_v6, %s3891_s17  ;;  %2649 = vrot.lane.b32.xlu2 %v2624_v52, %s3892_s25  ;;  %v1139_v6 = vadd.f32 %v1039_v22, %v437_v49  ;;  %v1792_v46 = vadd.f32 %v1692_v27, %v1190_v13  ;;  %v6806_v51 = vld [vmem:[#allocation51_spill] sm:$0xff] }
 0x350   : > { %v2202_v57 = vpop.permute.xlu1 %2201  ;;  %v2206_v53 = vpop.permute.xlu2 %2205  ;;  %v1642_v56 = vmul.f32 %v5428_v12, %v6806_v51  ;;  %v6807_v11 = vld [vmem:[#allocation159_spill] sm:$0xff] }
 0x351   : > { %v2307_v54 = vmul.f32 %v4922_v2, %v2202_v57  ;;  %v2308_v45 = vmul.f32 %v4922_v2, %v2206_v53  ;;  %v2186_v32 = vpop.permute.xlu0 %2185  ;;  %v1741_v52 = vadd.f32 %v1641_v21, %v1139_v6  ;;  %v3776_v62 = vld [vmem:[%s3991_s21 + $0xe8] sm:$0xff] }
 0x352   : > { %v2303_v18 = vmul.f32 %v4922_v2, %v2186_v32  ;;  %v487_v32 = vld [vmem:[%s6449_s1 + $0x2a0] sm:$0xff] }
 0x353   : > { %v2407_v50 = vadd.f32 %v2307_v54, %v1805_v61  ;;  %v2408_v44 = vadd.f32 %v2308_v45, %v1806_v28  ;;  %v6801_v28 = vld [vmem:[#allocation133_spill] sm:$0xff] }
 0x354   : > { %v2403_v36 = vadd.f32 %v2303_v18, %v1801_v30  ;;  %v1089_v61 = vmul.f32 %v4905_v8, %v6801_v28  ;;  %v491_v54 = vld [vmem:[%s6449_s1 + $0x2c0] sm:$0xff] }
 0x355   : > { %2508 = vst.msk [vmem:[#allocation2 + $0x310] sm:$0xff] %vm2409_vm0, %v2407_v50  ;;  %v6802_v30 = vld [vmem:[#allocation162_spill] sm:$0xff]  ;;  %v6803_v50 = vld [vmem:[#allocation153_spill] sm:$0xff]  ;;  %v1193_v8 = vadd.f32 %v1093_v3, %v491_v54  ;;  %v1652_v3 = vmul.f32 %v5428_v12, %v6810_v5 }
 0x356   : > { %2509 = vst.msk [vmem:[#allocation2 + $0x318] sm:$0xff] %vm2409_vm0, %v2408_v44  ;;  %v1691_v44 = vmul.f32 %v4912_v48, %v6803_v50  ;;  %v3777_v54 = vld [vmem:[%s3991_s21 + $0xa8] sm:$0xff] }
 0x357   : > { %2504 = vst.msk [vmem:[#allocation2 + $0x2f0] sm:$0xff] %vm2409_vm0, %v2403_v36  ;;  %1921 = vperm.xlu0 %3624, %v3769_v24   ;;  %1997 = vperm.xlu2 %3626, %v3770_v20   ;;  %v1189_v36 = vadd.f32 %v1089_v61, %v487_v32 }
 0x358   : > { %v2580_v34 = vpop.permute.xlu1 %2579  ;;  %v5347_v16 = vpop.permute.xlu2 %2581 }
 0x359   : > { %v2607_v19 = vsel %vm2409_vm0, %v2563_v39, %v2580_v34  ;;  %v1918_v14 = vpop.permute.xlu0 %1917  ;;  %v6804_v39 = vld [vmem:[#allocation48_spill] sm:$0xff] }
 0x35a   : > { %v2236_v17 = vmul.f32 %v4922_v2, %v1918_v14  ;;  %v2611_v42 = vsel %vm2558_vm1, %v2607_v19, %v2596_v37  ;;  %v1040_v34 = vmul.f32 %v5412_v35, %v6804_v39  ;;  %v1791_v19 = vadd.f32 %v1691_v44, %v1189_v36 }
 0x35b   : > { %3527 = vmatmul.msk.f32.gmra.mxu0 %vm2783_vm2, %v2611_v42 }
 0x35c   : > { %v2336_v37 = vadd.f32 %v2236_v17, %v1734_v9  ;;  %v2625_v43 = vld [vmem:[#allocation2 + $0x310] sm:$0xff]  ;;  %v438_v9 = vld [vmem:[%s6449_s1 + $0x118] sm:$0xff]  ;;  %v6805_v17 = vld [vmem:[#allocation138_spill] sm:$0xff] }
 0x35d   : > { %v1095_v42 = vmul.f32 %v5412_v35, %v6805_v17  ;;  %v2626_v49 = vld [vmem:[#allocation2 + $0x318] sm:$0xff]  ;;  %v447_v17 = vld [vmem:[%s6449_s1 + $0x160] sm:$0xff] }
 0x35e   : > { %2437 = vst.msk [vmem:[#allocation2 + $0xd8] sm:$0xff] %vm2409_vm0, %v2336_v37  ;;  %v2621_v23 = vld [vmem:[#allocation2 + $0x2f0] sm:$0xff]  ;;  %v1697_v37 = vmul.f32 %v5428_v12, %v6807_v11 }
 0x35f   : > { %2689 = vrot.lane.b32.xlu0 %v2674_v25, %s3891_s17  ;;  %2651 = vrot.lane.b32.xlu2 %v2625_v43, %s3892_s25  ;;  %v1140_v43 = vadd.f32 %v1040_v34, %v438_v9  ;;  %v1195_v4 = vadd.f32 %v1095_v42, %v493_v38  ;;  %v6814_v34 = vld [vmem:[#allocation66_spill] sm:$0xff]  ;;  %v6815_v42 = vld [vmem:[#allocation161_spill] sm:$0xff] }
 0x360   : > { %2635 = vrot.lane.b32.xlu1 %v2621_v23, %s3891_s17  ;;  %v2190_v15 = vpop.permute.xlu1 %2189  ;;  %v2150_v29 = vpop.permute.xlu2 %2149  ;;  %v2608_v23 = vsel %vm2409_vm0, %v2564_v41, %v5347_v16  ;;  %v6809_v16 = vld [vmem:[#allocation128_spill] sm:$0xff]  ;;  %v6816_v38 = vld [vmem:[#allocation165_spill] sm:$0xff] }
 0x361   : > { %v2304_v58 = vmul.f32 %v4922_v2, %v2190_v15  ;;  %v2294_v55 = vmul.f32 %v4922_v2, %v2150_v29  ;;  %v1946_v0 = vpop.permute.xlu0 %1945  ;;  %v1742_v27 = vadd.f32 %v1642_v56, %v1140_v43  ;;  %v1797_v25 = vadd.f32 %v1697_v37, %v1195_v4  ;;  %v6808_v29 = vld [vmem:[#allocation92_spill] sm:$0xff]  ;;  %v3779_v4 = vld [vmem:[%s3991_s21 + $0xc8] sm:$0xff] }
 0x362   : > { %v2243_v47 = vmul.f32 %v4922_v2, %v1946_v0  ;;  %v1695_v2 = vmul.f32 %v4912_v48, %v6802_v30  ;;  %v5406_v48 = vld [vmem:[%s6450_s2 + $0x2] ss:$0 sm:$0xff]  ;;  %v1094_v0 = vmul.f32 %v5412_v35, %v6809_v16  ;;  %v1698_v51 = vmul.f32 %v5428_v12, %v6816_v38  ;;  %v6817_v56 = vld [vmem:[#allocation64_spill] sm:$0xff] }
 0x363   : > { %v2404_v57 = vadd.f32 %v2304_v58, %v1802_v60  ;;  %v2394_v53 = vadd.f32 %v2294_v55, %v1792_v46  ;;  %v1050_v46 = vmul.f32 %v5412_v35, %v6808_v29  ;;  %v448_v55 = vld [vmem:[%s6449_s1 + $0x168] sm:$0xff]  ;;  %v3778_v43 = vld [vmem:[%s3991_s21 + $0xf0] sm:$0xff] }
 0x364   : > { %v2343_v45 = vadd.f32 %v2243_v47, %v1741_v52  ;;  %v1795_v31 = vadd.f32 %v1695_v2, %v1193_v8  ;;  %v492_v47 = vld [vmem:[%s6449_s1 + $0x2c8] sm:$0xff] }
 0x365   : > { %2505 = vst.msk [vmem:[#allocation2 + $0x2f8] sm:$0xff] %vm2409_vm0, %v2404_v57  ;;  %v2678_v18 = vld [vmem:[#allocation2 + $0xd8] sm:$0xff]  ;;  %v1150_v61 = vadd.f32 %v1050_v46, %v448_v55  ;;  %v6819_v55 = vld [vmem:[#allocation71_spill] sm:$0xff] }
 0x366   : > { %2495 = vst.msk [vmem:[#allocation2 + $0x2a8] sm:$0xff] %vm2409_vm0, %v2394_v53  ;;  %v6811_v53 = vld [vmem:[#allocation164_spill] sm:$0xff]  ;;  %v1653_v16 = vmul.f32 %v5428_v12, %v6819_v55  ;;  %v6827_v55 = vld [vmem:[#allocation34_spill] sm:$0xff] }
 0x367   : > { %2444 = vst.msk [vmem:[#allocation2 + $0x110] sm:$0xff] %vm2409_vm0, %v2343_v45  ;;  %1905 = vperm.xlu0 %3624, %v3771_v59   ;;  %1889 = vperm.xlu2 %3626, %v3772_v63   ;;  %v1696_v28 = vmul.f32 %v5428_v12, %v6811_v53  ;;  %v1194_v45 = vadd.f32 %v1094_v0, %v492_v47  ;;  %v3780_v47 = vld [vmem:[%s3991_s21 + $0xf8] sm:$0xff] }
 0x368   : > { %2705 = vrot.lane.b32.xlu1 %v2678_v18, %s3892_s25  ;;  %v2162_v40 = vpop.permute.xlu1 %2161  ;;  %v5401_v7 = vpop.permute.xlu2 %2599  ;;  %v1752_v18 = vadd.f32 %v1652_v3, %v1150_v61  ;;  %v3781_v61 = vld [vmem:[%s3991_s21 + $0x70] sm:$0xff] }
 0x369   : > { %v2297_v24 = vmul.f32 %v5406_v48, %v2162_v40  ;;  %v2146_v20 = vpop.permute.xlu0 %2145  ;;  %v1796_v59 = vadd.f32 %v1696_v28, %v1194_v45  ;;  %v6812_v40 = vld [vmem:[#allocation125_spill] sm:$0xff] }
 0x36a   : > { %v2293_v14 = vmul.f32 %v5406_v48, %v2146_v20 }
 0x36b   : > { %v2397_v26 = vadd.f32 %v2297_v24, %v1795_v31  ;;  %v1091_v31 = vmul.f32 %v5412_v35, %v6812_v40  ;;  %v6813_v24 = vld [vmem:[#allocation137_spill] sm:$0xff] }
 0x36c   : > { %v2393_v22 = vadd.f32 %v2293_v14, %v1791_v19  ;;  %v2622_v1 = vld [vmem:[#allocation2 + $0x2f8] sm:$0xff]  ;;  %v1096_v20 = vmul.f32 %v5412_v35, %v6813_v24  ;;  %v1049_v19 = vmul.f32 %v5412_v35, %v6814_v34  ;;  %v489_v14 = vld [vmem:[%s6449_s1 + $0x2b0] sm:$0xff]  ;;  %v3783_v34 = vld [vmem:[%s3991_s21 + $0x88] sm:$0xff] }
 0x36d   : > { %2498 = vst.msk [vmem:[#allocation2 + $0x2c0] sm:$0xff] %vm2409_vm0, %v2397_v26  ;;  %v1693_v26 = vmul.f32 %v5428_v12, %v6815_v42  ;;  %v1191_v11 = vadd.f32 %v1091_v31, %v489_v14  ;;  %v6822_v14 = vld [vmem:[#allocation38_spill] sm:$0xff] }
 0x36e   : > { %2494 = vst.msk [vmem:[#allocation2 + $0x2a0] sm:$0xff] %vm2409_vm0, %v2393_v22  ;;  %v2565_v30 = vld [vmem:[#allocation2 + $0x110] sm:$0xff]  ;;  %v1651_v22 = vmul.f32 %v5428_v12, %v6817_v56 }
 0x36f   : > { %2653 = vrot.lane.b32.xlu0 %v2626_v49, %s3892_s25  ;;  %2637 = vrot.lane.b32.xlu2 %v2622_v1, %s3891_s17  ;;  %v2724_v1 = vld [vmem:[#allocation2 + $0x2a8] sm:$0xff]  ;;  %v1149_v49 = vadd.f32 %v1049_v19, %v447_v17 }
 0x370   : > { %1925 = vperm.xlu1 %3625, %v3776_v62   ;;  %v1950_v10 = vpop.permute.xlu1 %1949  ;;  %v2170_v21 = vpop.permute.xlu2 %2169  ;;  %v1793_v62 = vadd.f32 %v1693_v26, %v1191_v11  ;;  %v6823_v17 = vld [vmem:[#allocation143_spill] sm:$0xff] }
 0x371   : > { %v2244_v33 = vmul.f32 %v5406_v48, %v1950_v10  ;;  %v2299_v13 = vmul.f32 %v5406_v48, %v2170_v21  ;;  %v2598_v6 = vpop.permute.xlu0 %2597  ;;  %v1625_v42 = vmul.f32 %v5428_v12, %v6823_v17 }
 0x372   : > { %v2612_v15 = vsel %vm2558_vm1, %v2608_v23, %v2598_v6  ;;  %v6818_v6 = vld [vmem:[#allocation91_spill] sm:$0xff] }
 0x373   : > { %v2344_v60 = vadd.f32 %v2244_v33, %v1742_v27  ;;  %v2399_v58 = vadd.f32 %v2299_v13, %v1797_v25  ;;  %3528 = vmatmul.msk.f32.gmra.mxu0 %vm2783_vm2, %v2612_v15  ;;  %v1751_v33 = vadd.f32 %v1651_v22, %v1149_v49  ;;  %v1051_v15 = vmul.f32 %v5412_v35, %v6818_v6  ;;  %v3784_v49 = vld [vmem:[%s3991_s21 + $0x80] sm:$0xff] }
 0x374   : > { %v2727_v52 = vld [vmem:[#allocation2 + $0x2c0] sm:$0xff] }
 0x375   : > { %2445 = vst.msk [vmem:[#allocation2 + $0x118] sm:$0xff] %vm2409_vm0, %v2344_v60  ;;  %v2723_v57 = vld [vmem:[#allocation2 + $0x2a0] sm:$0xff]  ;;  %v449_v60 = vld [vmem:[%s6449_s1 + $0x170] sm:$0xff] }
 0x376   : > { %2500 = vst.msk [vmem:[#allocation2 + $0x2d0] sm:$0xff] %vm2409_vm0, %v2399_v58 }
 0x377   : > { %1893 = vperm.xlu0 %3624, %v3777_v54   ;;  %2751 = vrot.lane.b32.xlu2 %v2727_v52, %s3892_s25  ;;  %v1151_v52 = vadd.f32 %v1051_v15, %v449_v60 }
 0x378   : > { %2735 = vrot.lane.b32.xlu1 %v2723_v57, %s3891_s17  ;;  %v2584_v32 = vpop.permute.xlu1 %2583  ;;  %v1990_v2 = vpop.permute.xlu2 %1989 }
 0x379   : > { %v2609_v50 = vsel %vm2409_vm0, %v2565_v30, %v2584_v32  ;;  %v2254_v44 = vmul.f32 %v5406_v48, %v1990_v2  ;;  %v2166_v8 = vpop.permute.xlu0 %2165  ;;  %v1753_v3 = vadd.f32 %v1653_v16, %v1151_v52  ;;  %v6820_v32 = vld [vmem:[#allocation136_spill] sm:$0xff]  ;;  %v1626_v16 = vmul.f32 %v5428_v12, %v6827_v55 }
 0x37a   : > { %v2298_v63 = vmul.f32 %v5406_v48, %v2166_v8  ;;  %v2613_v36 = vsel %vm2558_vm1, %v2609_v50, %v5401_v7  ;;  %v494_v7 = vld [vmem:[%s6449_s1 + $0x2d8] sm:$0xff]  ;;  %v1092_v30 = vmul.f32 %v5412_v35, %v6820_v32 }
 0x37b   : > { %v2354_v39 = vadd.f32 %v2254_v44, %v1752_v18  ;;  %3529 = vmatmul.msk.f32.gmra.mxu0 %vm2783_vm2, %v2613_v36  ;;  %v1196_v37 = vadd.f32 %v1096_v20, %v494_v7  ;;  %v490_v2 = vld [vmem:[%s6449_s1 + $0x2b8] sm:$0xff]  ;;  %v1023_v7 = vmul.f32 %v5412_v35, %v6822_v14  ;;  %v6831_v14 = vld [vmem:[#allocation46_spill] sm:$0xff] }
 0x37c   : > { %v2398_v9 = vadd.f32 %v2298_v63, %v1796_v59  ;;  %v6821_v18 = vld [vmem:[#allocation156_spill] sm:$0xff]  ;;  %v1192_v44 = vadd.f32 %v1092_v30, %v490_v2  ;;  %v423_v30 = vld [vmem:[%s6449_s1 + $0xa0] sm:$0xff] }
 0x37d   : > { %2455 = vst.msk [vmem:[#allocation2 + $0x168] sm:$0xff] %vm2409_vm0, %v2354_v39  ;;  %v1798_v10 = vadd.f32 %v1698_v51, %v1196_v37  ;;  %v2729_v54 = vld [vmem:[#allocation2 + $0x2d0] sm:$0xff]  ;;  %v1694_v50 = vmul.f32 %v5428_v12, %v6821_v18  ;;  %v3782_v8 = vld [vmem:[%s3991_s21 + $0x78] sm:$0xff] }
 0x37e   : > { %2499 = vst.msk [vmem:[#allocation2 + $0x2c8] sm:$0xff] %vm2409_vm0, %v2398_v9  ;;  %v2566_v24 = vld [vmem:[#allocation2 + $0x118] sm:$0xff]  ;;  %v421_v9 = vld [vmem:[%s6449_s1 + $0x90] sm:$0xff] }
 0x37f   : > { %2737 = vrot.lane.b32.xlu0 %v2724_v1, %s3891_s17  ;;  %1929 = vperm.xlu2 %3626, %v3778_v43   ;;  %v1794_v36 = vadd.f32 %v1694_v50, %v1192_v44  ;;  %v1123_v38 = vadd.f32 %v1023_v7, %v421_v9  ;;  %v6824_v37 = vld [vmem:[#allocation72_spill] sm:$0xff]  ;;  %v6829_v2 = vld [vmem:[#allocation33_spill] sm:$0xff]  ;;  %v1635_v7 = vmul.f32 %v5428_v12, %v6831_v14 }
 0x380   : > { %1909 = vperm.xlu1 %3625, %v3779_v4   ;;  %v2154_v27 = vpop.permute.xlu1 %2153  ;;  %v2174_v41 = vpop.permute.xlu2 %2173  ;;  %v1052_v43 = vmul.f32 %v5412_v35, %v6824_v37  ;;  %v450_v4 = vld [vmem:[%s6449_s1 + $0x178] sm:$0xff]  ;;  %v1627_v18 = vmul.f32 %v5428_v12, %v6829_v2 }
 0x381   : > { %v2295_v21 = vmul.f32 %v5406_v48, %v2154_v27  ;;  %v2300_v25 = vmul.f32 %v5406_v48, %v2174_v41  ;;  %v1986_v23 = vpop.permute.xlu0 %1985  ;;  %v1725_v56 = vadd.f32 %v1625_v42, %v1123_v38  ;;  %v6825_v27 = vld [vmem:[#allocation70_spill] sm:$0xff]  ;;  %v6840_v14 = vld [vmem:[#allocation13_spill] sm:$0xff] }
 0x382   : > { %v2253_v13 = vmul.f32 %v5406_v48, %v1986_v23  ;;  %v1654_v41 = vmul.f32 %v5428_v12, %v6825_v27  ;;  %v427_v27 = vld [vmem:[%s6449_s1 + $0xc0] sm:$0xff] }
 0x383   : > { %v2395_v29 = vadd.f32 %v2295_v21, %v1793_v62  ;;  %v2400_v46 = vadd.f32 %v2300_v25, %v1798_v10  ;;  %v1152_v10 = vadd.f32 %v1052_v43, %v450_v4  ;;  %v6832_v43 = vld [vmem:[#allocation50_spill] sm:$0xff] }
 0x384   : > { %v2353_v58 = vadd.f32 %v2253_v13, %v1751_v33  ;;  %v2616_v52 = vld [vmem:[#allocation2 + $0x168] sm:$0xff] }
 0x385   : > { %2496 = vst.msk [vmem:[#allocation2 + $0x2b0] sm:$0xff] %vm2409_vm0, %v2395_v29  ;;  %v2728_v0 = vld [vmem:[#allocation2 + $0x2c8] sm:$0xff]  ;;  %v1754_v33 = vadd.f32 %v1654_v41, %v1152_v10  ;;  %v6826_v29 = vld [vmem:[#allocation37_spill] sm:$0xff] }
 0x386   : > { %2501 = vst.msk [vmem:[#allocation2 + $0x2d8] sm:$0xff] %vm2409_vm0, %v2400_v46  ;;  %v1024_v46 = vmul.f32 %v5412_v35, %v6826_v29  ;;  %v6833_v41 = vld [vmem:[#allocation62_spill] sm:$0xff] }
 0x387   : > { %2454 = vst.msk [vmem:[#allocation2 + $0x160] sm:$0xff] %vm2409_vm0, %v2353_v58  ;;  %1933 = vperm.xlu2 %3626, %v3780_v47   ;;  %v422_v58 = vld [vmem:[%s6449_s1 + $0x98] sm:$0xff] }
 0x388   : > { %2753 = vrot.lane.b32.xlu1 %v2728_v0, %s3892_s25  ;;  %v1994_v5 = vpop.permute.xlu2 %1993  ;;  %v1124_v47 = vadd.f32 %v1024_v46, %v422_v58 }
 0x389   : > { %v2255_v57 = vmul.f32 %v5406_v48, %v1994_v5 }
 0x38b   : > { %v2355_v53 = vadd.f32 %v2255_v57, %v1753_v3 }
 0x38c   : > { %v2725_v28 = vld [vmem:[#allocation2 + $0x2b0] sm:$0xff] }
 0x38d   : > { %2456 = vst.msk [vmem:[#allocation2 + $0x170] sm:$0xff] %vm2409_vm0, %v2355_v53  ;;  %2739 = vrot.lane.b32.xlu0 %v2725_v28, %s3891_s17  ;;  %v2730_v59 = vld [vmem:[#allocation2 + $0x2d8] sm:$0xff]  ;;  %v1726_v28 = vadd.f32 %v1626_v16, %v1124_v47 }
 0x38e   : > { %v2615_v25 = vld [vmem:[#allocation2 + $0x160] sm:$0xff] }
 0x38f   : > { %1865 = vperm.xlu2 %3626, %v3781_v61   ;;  %v2602_v45 = vpop.permute.xlu1 %2601 }
 0x390   : > { %2755 = vrot.lane.b32.xlu1 %v2729_v54, %s3892_s25  ;;  %v6828_v54 = vld [vmem:[#allocation19_spill] sm:$0xff] }
 0x397   : > { %1869 = vperm.xlu2 %3626, %v3782_v8   ;;  %v2158_v63 = vpop.permute.xlu1 %2157 }
 0x398   : > { %2757 = vrot.lane.b32.xlu1 %v2730_v59, %s3892_s25  ;;  %v2296_v40 = vmul.f32 %v5406_v48, %v2158_v63 }
 0x39a   : > { %v2396_v31 = vadd.f32 %v2296_v40, %v1794_v36 }
 0x39c   : > { %2497 = vst.msk [vmem:[#allocation2 + $0x2b8] sm:$0xff] %vm2409_vm0, %v2396_v31 }
 0x39e   : > { %v2586_v20 = vpop.permute.xlu0 %2585 }
 0x39f   : > { %v2610_v39 = vsel %vm2409_vm0, %v2566_v24, %v2586_v20  ;;  %v6830_v20 = vld [vmem:[#allocation55_spill] sm:$0xff] }
 0x3a0   : > { %1877 = vperm.xlu1 %3625, %v3783_v34   ;;  %v2614_v19 = vsel %vm2558_vm1, %v2610_v39, %v2602_v45  ;;  %v1025_v45 = vmul.f32 %v5412_v35, %v6828_v54  ;;  %v1033_v39 = vmul.f32 %v5412_v35, %v6830_v20 }
 0x3a1   : > { %3530 = vmatmul.msk.f32.gmra.mxu0 %vm2783_vm2, %v2614_v19  ;;  %v431_v19 = vld [vmem:[%s6449_s1 + $0xe0] sm:$0xff] }
 0x3a2   : > { %v1125_v50 = vadd.f32 %v1025_v45, %v423_v30  ;;  %v1133_v9 = vadd.f32 %v1033_v39, %v431_v19  ;;  %v434_v45 = vld [vmem:[%s6449_s1 + $0xf8] sm:$0xff] }
 0x3a3   : > { %v2726_v26 = vld [vmem:[#allocation2 + $0x2b8] sm:$0xff] }
 0x3a4   : > { %2741 = vrot.lane.b32.xlu0 %v2726_v26, %s3891_s17  ;;  %v1727_v36 = vadd.f32 %v1627_v18, %v1125_v50  ;;  %v1735_v26 = vadd.f32 %v1635_v7, %v1133_v9  ;;  %v6838_v30 = vld [vmem:[#allocation45_spill] sm:$0xff]  ;;  %v1019_v7 = vmul.f32 %v5412_v35, %v6840_v14  ;;  %v6841_v9 = vld [vmem:[#allocation44_spill] sm:$0xff] }
 0x3a5   : > { %v1638_v2 = vmul.f32 %v5428_v12, %v6838_v30  ;;  %v6839_v18 = vld [vmem:[#allocation53_spill] sm:$0xff] }
 0x3a6   : > { %v1882_v51 = vpop.permute.xlu0 %1881  ;;  %v1636_v50 = vmul.f32 %v5428_v12, %v6839_v18 }
 0x3a7   : > { %v2227_v22 = vmul.f32 %v5406_v48, %v1882_v51 }
 0x3a9   : > { %v2650_v1 = vpop.permute.xlu2 %2649  ;;  %v2327_v11 = vadd.f32 %v2227_v22, %v1725_v56 }
 0x3ab   : > { %2428 = vst.msk [vmem:[#allocation2 + $0x90] sm:$0xff] %vm2409_vm0, %v2327_v11  ;;  %v2617_v11 = vld [vmem:[#allocation2 + $0x170] sm:$0xff] }
 0x3ac   : > { %1873 = vperm.xlu0 %3624, %v3784_v49   ;;  %v1029_v49 = vmul.f32 %v5412_v35, %v6832_v43 }
 0x3af   : > { %v2648_v62 = vpop.permute.xlu1 %2647 }
 0x3b1   : > { %v1998_v21 = vpop.permute.xlu2 %1997  ;;  %v2632_v23 = vpop.permute.xlu0 %2631 }
 0x3b2   : > { %v2256_v13 = vmul.f32 %v5406_v48, %v1998_v21  ;;  %v2659_v6 = vsel %vm2409_vm0, %v2615_v25, %v2632_v23  ;;  %v2669_v59 = vld [vmem:[#allocation2 + $0x90] sm:$0xff]  ;;  %v6834_v25 = vld [vmem:[#allocation29_spill] sm:$0xff] }
 0x3b3   : > { %v2663_v15 = vsel %vm2558_vm1, %v2659_v6, %v2648_v62  ;;  %v1035_v62 = vmul.f32 %v5412_v35, %v6833_v41  ;;  %v433_v21 = vld [vmem:[%s6449_s1 + $0xf0] sm:$0xff]  ;;  %v1631_v23 = vmul.f32 %v5428_v12, %v6834_v25  ;;  %v1129_v6 = vadd.f32 %v1029_v49, %v427_v27 }
 0x3b4   : > { %v2356_v60 = vadd.f32 %v2256_v13, %v1754_v33  ;;  %3531 = vmatmul.msk.f32.gmra.mxu0 %vm2783_vm2, %v2663_v15  ;;  %v6835_v33 = vld [vmem:[#allocation41_spill] sm:$0xff] }
 0x3b5   : > { %v1637_v13 = vmul.f32 %v5428_v12, %v6835_v33  ;;  %v1135_v15 = vadd.f32 %v1035_v62, %v433_v21  ;;  %v1731_v29 = vadd.f32 %v1631_v23, %v1129_v6  ;;  %v6844_v6 = vld [vmem:[#allocation32_spill] sm:$0xff] }
 0x3b6   : > { %2457 = vst.msk [vmem:[#allocation2 + $0x178] sm:$0xff] %vm2409_vm0, %v2356_v60 }
 0x3b7   : > { %v2634_v0 = vpop.permute.xlu1 %2633  ;;  %v1737_v55 = vadd.f32 %v1637_v13, %v1135_v15  ;;  %v1020_v15 = vmul.f32 %v5412_v35, %v6844_v6  ;;  %v3795_v6 = vld [vmem:[%s3991_s21 + $0x250] sm:$0xff] }
 0x3b8   : > { %v2660_v5 = vsel %vm2409_vm0, %v2616_v52, %v2634_v0 }
 0x3b9   : > { %v2652_v3 = vpop.permute.xlu2 %2651  ;;  %v1886_v57 = vpop.permute.xlu0 %1885  ;;  %v2664_v53 = vsel %vm2558_vm1, %v2660_v5, %v2650_v1 }
 0x3ba   : > { %v2228_v61 = vmul.f32 %v5406_v48, %v1886_v57 }
 0x3bc   : > { %v2328_v32 = vadd.f32 %v2228_v61, %v1726_v28  ;;  %3532 = vmatmul.msk.f32.gmra.mxu0 %vm2783_vm2, %v2664_v53  ;;  %v6837_v61 = vld [vmem:[#allocation36_spill] sm:$0xff] }
 0x3bd   : > { %v1034_v54 = vmul.f32 %v5412_v35, %v6837_v61 }
 0x3be   : > { %2429 = vst.msk [vmem:[#allocation2 + $0x98] sm:$0xff] %vm2409_vm0, %v2328_v32  ;;  %v432_v32 = vld [vmem:[%s6449_s1 + $0xe8] sm:$0xff] }
 0x3bf   : > { %v2704_v44 = vpop.permute.xlu1 %2703 }
 0x3c1   : > { %v1890_v8 = vpop.permute.xlu2 %1889  ;;  %v2688_v63 = vpop.permute.xlu0 %2687 }
 0x3c2   : > { %v2229_v40 = vmul.f32 %v5406_v48, %v1890_v8  ;;  %v2713_v31 = vsel %vm2409_vm0, %v2669_v59, %v2688_v63  ;;  %v2618_v8 = vld [vmem:[#allocation2 + $0x178] sm:$0xff]  ;;  %v1134_v59 = vadd.f32 %v1034_v54, %v432_v32 }
 0x3c3   : > { %v2717_v24 = vsel %vm2558_vm1, %v2713_v31, %v2704_v44 }
 0x3c4   : > { %v2329_v34 = vadd.f32 %v2229_v40, %v1727_v36  ;;  %3537 = vmatmul.msk.f32.vlgmr.msra.gmra.mxu2 %vm2783_vm2, %v2717_v24 }
 0x3c5   : > { %v2670_v46 = vld [vmem:[#allocation2 + $0x98] sm:$0xff] }
 0x3c6   : > { %2430 = vst.msk [vmem:[#allocation2 + $0xa0] sm:$0xff] %vm2409_vm0, %v2329_v34  ;;  %v1736_v34 = vadd.f32 %v1636_v50, %v1134_v59 }
 0x3c9   : > { %v2638_v17 = vpop.permute.xlu2 %2637  ;;  %v1922_v42 = vpop.permute.xlu0 %1921 }
 0x3ca   : > { %v2237_v38 = vmul.f32 %v5406_v48, %v1922_v42  ;;  %v2662_v63 = vsel %vm2409_vm0, %v2618_v8, %v2638_v17  ;;  %v1026_v42 = vmul.f32 %v5412_v35, %v6841_v9  ;;  %v3786_v8 = vld [vmem:[%s3991_s21 + $0x68] sm:$0xff]  ;;  %v3789_v9 = vld [vmem:[%s3991_s21 + $0x58] sm:$0xff] }
 0x3cc   : > { %v2337_v51 = vadd.f32 %v2237_v38, %v1735_v26  ;;  %v417_v26 = vld [vmem:[%s6449_s1 + $0x70] sm:$0xff]  ;;  %v424_v38 = vld [vmem:[%s6449_s1 + $0xa8] sm:$0xff] }
 0x3cd   : > { %v2671_v56 = vld [vmem:[#allocation2 + $0xa0] sm:$0xff]  ;;  %v1119_v49 = vadd.f32 %v1019_v7, %v417_v26 }
 0x3ce   : > { %2438 = vst.msk [vmem:[#allocation2 + $0xe0] sm:$0xff] %vm2409_vm0, %v2337_v51  ;;  %2683 = vrot.lane.b32.xlu2 %v2671_v56, %s3891_s17  ;;  %v6842_v56 = vld [vmem:[#allocation23_spill] sm:$0xff] }
 0x3d1   : > { %v5588_v22 = vpop.permute.xlu2 %2751  ;;  %v2690_v1 = vpop.permute.xlu0 %2689 }
 0x3d2   : > { %v2636_v37 = vpop.permute.xlu1 %2635  ;;  %v2714_v16 = vsel %vm2409_vm0, %v2670_v46, %v2690_v1  ;;  %v1628_v1 = vmul.f32 %v5428_v12, %v6842_v56  ;;  %v6848_v56 = vld [vmem:[#allocation16_spill] sm:$0xff] }
 0x3d3   : > { %v2661_v4 = vsel %vm2409_vm0, %v2617_v11, %v2636_v37  ;;  %v6843_v11 = vld [vmem:[#allocation22_spill] sm:$0xff] }
 0x3d4   : > { %v2665_v10 = vsel %vm2558_vm1, %v2661_v4, %v2652_v3  ;;  %v6836_v3 = vld [vmem:[#allocation61_spill] sm:$0xff]  ;;  %v1621_v37 = vmul.f32 %v5428_v12, %v6843_v11  ;;  %v1126_v4 = vadd.f32 %v1026_v42, %v424_v38 }
 0x3d5   : > { %3533 = vmatmul.msk.f32.gmra.mxu0 %vm2783_vm2, %v2665_v10  ;;  %v1036_v57 = vmul.f32 %v5412_v35, %v6836_v3  ;;  %v2719_v23 = vld [vmem:[#allocation2 + $0xe0] sm:$0xff]  ;;  %v3785_v3 = vld [vmem:[%s3991_s21 + $0x50] sm:$0xff]  ;;  %v3790_v42 = vld [vmem:[%s3991_s21 + $0x1b8] sm:$0xff] }
 0x3d6   : > { %v1728_v62 = vadd.f32 %v1628_v1, %v1126_v4  ;;  %v1721_v10 = vadd.f32 %v1621_v37, %v1119_v49  ;;  %v1022_v1 = vmul.f32 %v5412_v35, %v6848_v56  ;;  %v420_v37 = vld [vmem:[%s6449_s1 + $0x88] sm:$0xff]  ;;  %v3792_v4 = vld [vmem:[%s3991_s21 + $0x1f0] sm:$0xff] }
 0x3d7   : > { %v1136_v44 = vadd.f32 %v1036_v57, %v434_v45  ;;  %v6857_v56 = vld [vmem:[#allocation146_spill] sm:$0xff] }
 0x3d9   : > { %v1930_v60 = vpop.permute.xlu2 %1929  ;;  %v1906_v58 = vpop.permute.xlu0 %1905  ;;  %v1738_v31 = vadd.f32 %v1638_v2, %v1136_v44 }
 0x3da   : > { %v2239_v0 = vmul.f32 %v5406_v48, %v1930_v60  ;;  %v2706_v52 = vpop.permute.xlu1 %2705  ;;  %v2233_v47 = vmul.f32 %v5406_v48, %v1906_v58  ;;  %v418_v58 = vld [vmem:[%s6449_s1 + $0x78] sm:$0xff] }
 0x3db   : > { %v2718_v5 = vsel %vm2558_vm1, %v2714_v16, %v2706_v52  ;;  %v6846_v52 = vld [vmem:[#allocation142_spill] sm:$0xff]  ;;  %v1120_v57 = vadd.f32 %v1020_v15, %v418_v58 }
 0x3dc   : > { %v2339_v53 = vadd.f32 %v2239_v0, %v1737_v55  ;;  %v2333_v28 = vadd.f32 %v2233_v47, %v1731_v29  ;;  %3538 = vmatmul.msk.f32.gmra.mxu2 %vm2783_vm2, %v2718_v5  ;;  %v6845_v55 = vld [vmem:[#allocation49_spill] sm:$0xff]  ;;  %v428_v0 = vld [vmem:[%s6449_s1 + $0xc8] sm:$0xff]  ;;  %v1622_v47 = vmul.f32 %v5428_v12, %v6846_v52 }
 0x3dd   : > { %v1030_v16 = vmul.f32 %v5412_v35, %v6845_v55  ;;  %v6847_v5 = vld [vmem:[#allocation39_spill] sm:$0xff]  ;;  %v419_v55 = vld [vmem:[%s6449_s1 + $0x80] sm:$0xff] }
 0x3de   : > { %2440 = vst.msk [vmem:[#allocation2 + $0xf0] sm:$0xff] %vm2409_vm0, %v2339_v53  ;;  %v1722_v61 = vadd.f32 %v1622_v47, %v1120_v57 }
 0x3df   : > { %2434 = vst.msk [vmem:[#allocation2 + $0xc0] sm:$0xff] %vm2409_vm0, %v2333_v28  ;;  %v1130_v53 = vadd.f32 %v1030_v16, %v428_v0  ;;  %v6851_v16 = vld [vmem:[#allocation28_spill] sm:$0xff] }
 0x3e0   : > { %v1623_v0 = vmul.f32 %v5428_v12, %v6851_v16  ;;  %v415_v16 = vld [vmem:[%s6449_s1 + $0x60] sm:$0xff] }
 0x3e1   : > { %v1934_v36 = vpop.permute.xlu2 %1933  ;;  %v2654_v40 = vpop.permute.xlu0 %2653 }
 0x3e2   : > { %v2240_v24 = vmul.f32 %v5406_v48, %v1934_v36  ;;  %v1926_v20 = vpop.permute.xlu1 %1925  ;;  %v2666_v39 = vsel %vm2558_vm1, %v2662_v63, %v2654_v40 }
 0x3e3   : > { %v2238_v19 = vmul.f32 %v5406_v48, %v1926_v20  ;;  %3534 = vmatmul.msk.f32.gmra.mxu0 %vm2783_vm2, %v2666_v39 }
 0x3e4   : > { %v2340_v17 = vadd.f32 %v2240_v24, %v1738_v31  ;;  %v3787_v24 = vld [vmem:[%s3991_s21 + $0x270] sm:$0xff] }
 0x3e5   : > { %v2338_v51 = vadd.f32 %v2238_v19, %v1736_v34  ;;  %v2721_v20 = vld [vmem:[#allocation2 + $0xf0] sm:$0xff]  ;;  %v3788_v34 = vld [vmem:[%s3991_s21 + $0x60] sm:$0xff] }
 0x3e6   : > { %2441 = vst.msk [vmem:[#allocation2 + $0xf8] sm:$0xff] %vm2409_vm0, %v2340_v17  ;;  %v2675_v43 = vld [vmem:[#allocation2 + $0xc0] sm:$0xff]  ;;  %v3791_v17 = vld [vmem:[%s3991_s21 + $0x238] sm:$0xff] }
 0x3e7   : > { %2439 = vst.msk [vmem:[#allocation2 + $0xe8] sm:$0xff] %vm2409_vm0, %v2338_v51  ;;  %2699 = vrot.lane.b32.xlu0 %v2675_v43, %s3892_s25  ;;  %v6849_v43 = vld [vmem:[#allocation27_spill] sm:$0xff] }
 0x3e8   : > { %v1624_v49 = vmul.f32 %v5428_v12, %v6849_v43 }
 0x3e9   : > { %v1866_v27 = vpop.permute.xlu2 %1865  ;;  %v1894_v41 = vpop.permute.xlu0 %1893 }
 0x3ea   : > { %v2223_v21 = vmul.f32 %v5406_v48, %v1866_v27  ;;  %v2736_v25 = vpop.permute.xlu1 %2735  ;;  %v2230_v33 = vmul.f32 %v5406_v48, %v1894_v41  ;;  %v3793_v27 = vld [vmem:[%s3991_s21 + $0x278] sm:$0xff]  ;;  %v1122_v41 = vadd.f32 %v1022_v1, %v420_v37  ;;  %v1620_v1 = vmul.f32 %v5428_v12, %v6857_v56  ;;  %v6867_v56 = vld [vmem:[#allocation87_spill] sm:$0xff] }
 0x3eb   : > { %v2763_v13 = vsel %vm2409_vm0, %v2719_v23, %v2736_v25 }
 0x3ec   : > { %v2323_v29 = vadd.f32 %v2223_v21, %v1721_v10  ;;  %v2330_v46 = vadd.f32 %v2230_v33, %v1728_v62  ;;  %v2767_v60 = vsel %vm2558_vm1, %v2763_v13, %v5588_v22  ;;  %v1632_v22 = vmul.f32 %v5428_v12, %v6847_v5  ;;  %v3794_v13 = vld [vmem:[%s3991_s21 + $0x1b0] sm:$0xff] }
 0x3ed   : > { %3539 = vmatmul.msk.f32.gmra.mxu2 %vm2783_vm2, %v2767_v60  ;;  %v1724_v10 = vadd.f32 %v1624_v49, %v1122_v41  ;;  %v2722_v23 = vld [vmem:[#allocation2 + $0xf8] sm:$0xff]  ;;  %v6850_v60 = vld [vmem:[#allocation31_spill] sm:$0xff] }
 0x3ee   : > { %2424 = vst.msk [vmem:[#allocation2 + $0x70] sm:$0xff] %vm2409_vm0, %v2323_v29  ;;  %v1732_v32 = vadd.f32 %v1632_v22, %v1130_v53  ;;  %v2720_v59 = vld [vmem:[#allocation2 + $0xe8] sm:$0xff]  ;;  %v3796_v29 = vld [vmem:[%s3991_s21 + $0x218] sm:$0xff]  ;;  %v1021_v58 = vmul.f32 %v5412_v35, %v6850_v60 }
 0x3ef   : > { %2431 = vst.msk [vmem:[#allocation2 + $0xa8] sm:$0xff] %vm2409_vm0, %v2330_v46  ;;  %1849 = vperm.xlu0 %3624, %v3785_v3   ;;  %v3797_v22 = vld [vmem:[%s3991_s21 + $0x228] sm:$0xff] }
 0x3f0   : > { %v1121_v52 = vadd.f32 %v1021_v58, %v419_v55 }
 0x3f1   : > { %v1870_v28 = vpop.permute.xlu2 %1869  ;;  %v2738_v44 = vpop.permute.xlu0 %2737 }
 0x3f2   : > { %v2224_v54 = vmul.f32 %v5406_v48, %v1870_v28  ;;  %v1910_v45 = vpop.permute.xlu1 %1909  ;;  %v2764_v63 = vsel %vm2409_vm0, %v2720_v59, %v2738_v44  ;;  %v1723_v5 = vadd.f32 %v1623_v0, %v1121_v52  ;;  %v414_v44 = vld [vmem:[%s6449_s1 + $0x58] sm:$0xff]  ;;  %v481_v0 = vld [vmem:[%s6449_s1 + $0x270] sm:$0xff] }
 0x3f3   : > { %v2234_v30 = vmul.f32 %v5406_v48, %v1910_v45  ;;  %v6854_v59 = vld [vmem:[#allocation144_spill] sm:$0xff]  ;;  %v6861_v52 = vld [vmem:[#allocation57_spill] sm:$0xff] }
 0x3f4   : > { %v2324_v2 = vadd.f32 %v2224_v54, %v1722_v61 }
 0x3f5   : > { %v2334_v18 = vadd.f32 %v2234_v30, %v1732_v32  ;;  %v2927_v51 = vld [vmem:[#allocation2 + $0x70] sm:$0xff]  ;;  %v6852_v30 = vld [vmem:[#allocation10_spill] sm:$0xff] }
 0x3f6   : > { %2425 = vst.msk [vmem:[#allocation2 + $0x78] sm:$0xff] %vm2409_vm0, %v2324_v2  ;;  %v2672_v50 = vld [vmem:[#allocation2 + $0xa8] sm:$0xff]  ;;  %v1016_v2 = vmul.f32 %v5412_v35, %v6852_v30 }
 0x3f7   : > { %2435 = vst.msk [vmem:[#allocation2 + $0xc8] sm:$0xff] %vm2409_vm0, %v2334_v18  ;;  %1861 = vperm.xlu0 %3624, %v3786_v8   ;;  %2685 = vrot.lane.b32.xlu1 %v2672_v50, %s3891_s17  ;;  %v6853_v18 = vld [vmem:[#allocation20_spill] sm:$0xff] }
 0x3f8   : > { %v1015_v50 = vmul.f32 %v5412_v35, %v6853_v18  ;;  %v413_v8 = vld [vmem:[%s6449_s1 + $0x50] sm:$0xff] }
 0x3fa   : > { %v2754_v36 = vpop.permute.xlu1 %2753 }
 0x3fb   : > { %v2768_v40 = vsel %vm2558_vm1, %v2764_v63, %v2754_v36  ;;  %v1617_v63 = vmul.f32 %v5428_v12, %v6854_v59  ;;  %v6855_v36 = vld [vmem:[#allocation145_spill] sm:$0xff] }
 0x3fc   : > { %3540 = vmatmul.msk.f32.gmra.mxu2 %vm2783_vm2, %v2768_v40  ;;  %v1618_v40 = vmul.f32 %v5428_v12, %v6855_v36 }
 0x3fd   : > { %v2928_v38 = vld [vmem:[#allocation2 + $0x78] sm:$0xff] }
 0x3fe   : > { %v2676_v31 = vld [vmem:[#allocation2 + $0xc8] sm:$0xff]  ;;  %v3627_v11 = vpack.i.bf16 %v2928_v38, %v2927_v51 }
 0x3ff   : > { %2701 = vrot.lane.b32.xlu2 %v2676_v31, %s3892_s25  ;;  %2121 = vperm.xlu0 %3624, %v3787_v24   ;;  %v2740_v39 = vpop.permute.xlu0 %2739  ;;  %v1116_v31 = vadd.f32 %v1016_v2, %v414_v44  ;;  %v1115_v24 = vadd.f32 %v1015_v50, %v413_v8  ;;  %v416_v51 = vld [vmem:[%s6449_s1 + $0x68] sm:$0xff] }
 0x400   : > { %1857 = vperm.xlu1 %3625, %v3788_v34   ;;  %v2765_v19 = vsel %vm2409_vm0, %v2721_v20, %v2740_v39  ;;  %v5736_v20 = vpop.f32.mrf.mxu0 }
 0x402   : > { %v2756_v14 = vpop.permute.xlu1 %2755 }
 0x403   : > { %v2769_v7 = vsel %vm2558_vm1, %v2765_v19, %v2756_v14  ;;  %v1717_v19 = vadd.f32 %v1617_v63, %v1115_v24  ;;  %v1718_v14 = vadd.f32 %v1618_v40, %v1116_v31  ;;  %v6864_v24 = vld [vmem:[#allocation122_spill] sm:$0xff] }
 0x404   : > { %3541 = vmatmul.msk.f32.gmra.mxu2 %vm2783_vm2, %v2769_v7 }
 0x407   : > { %1853 = vperm.xlu2 %3626, %v3789_v9   ;;  %2029 = vperm.xlu0 %3624, %v3790_v42  }
 0x408   : > { %2093 = vperm.xlu1 %3625, %v3791_v17  }
 0x40a   : > { %v2758_v26 = vpop.permute.xlu1 %2757 }
 0x40f   : > { %3628 = vrot.lane.b32.xlu2 %v3627_v11, %s3891_s17  ;;  %2057 = vperm.xlu0 %3624, %v3792_v4   ;;  %v5749_v11 = vpop.f32.mrf.mxu0 }
 0x410   : > { %2125 = vperm.xlu1 %3625, %v3793_v27  }
 0x412   : > { %v1878_v62 = vpop.permute.xlu1 %1877 }
 0x413   : > { %v2226_v21 = vmul.f32 %v5406_v48, %v1878_v62 }
 0x415   : > { %v2326_v25 = vadd.f32 %v2226_v21, %v1724_v10 }
 0x416   : > { %v2742_v33 = vpop.permute.xlu0 %2741 }
 0x417   : > { %2427 = vst.msk [vmem:[#allocation2 + $0x88] sm:$0xff] %vm2409_vm0, %v2326_v25  ;;  %2025 = vperm.xlu2 %3626, %v3794_v13   ;;  %2105 = vperm.xlu0 %3624, %v3795_v6   ;;  %v2766_v15 = vsel %vm2409_vm0, %v2722_v23, %v2742_v33  ;;  %v6858_v25 = vld [vmem:[#allocation108_spill] sm:$0xff]  ;;  %v6859_v13 = vld [vmem:[#allocation26_spill] sm:$0xff]  ;;  %v5779_v2 = vpop.f32.mrf.mxu0 }
 0x418   : > { %2077 = vperm.xlu1 %3625, %v3796_v29   ;;  %v2770_v46 = vsel %vm2558_vm1, %v2766_v15, %v2758_v26  ;;  %v6856_v26 = vld [vmem:[#allocation25_spill] sm:$0xff]  ;;  %v1059_v23 = vmul.f32 %v5412_v35, %v6858_v25  ;;  %v1017_v6 = vmul.f32 %v5412_v35, %v6859_v13  ;;  %v457_v15 = vld [vmem:[%s6449_s1 + $0x1b0] sm:$0xff]  ;;  %v6860_v29 = vld [vmem:[#allocation130_spill] sm:$0xff] }
 0x419   : > { %3542 = vmatmul.msk.f32.gmra.mxu2 %vm2783_vm2, %v2770_v46  ;;  %v1018_v38 = vmul.f32 %v5412_v35, %v6856_v26  ;;  %v1083_v46 = vmul.f32 %v5412_v35, %v6860_v29  ;;  %v3798_v13 = vld [vmem:[%s3991_s21 + $0x1f8] sm:$0xff] }
 0x41b   : > { %v1118_v37 = vadd.f32 %v1018_v38, %v416_v51  ;;  %v1183_v30 = vadd.f32 %v1083_v46, %v481_v0  ;;  %v458_v38 = vld [vmem:[%s6449_s1 + $0x1b8] sm:$0xff] }
 0x41c   : > { %v474_v51 = vld [vmem:[%s6449_s1 + $0x238] sm:$0xff] }
 0x41d   : > { %v1720_v62 = vadd.f32 %v1620_v1, %v1118_v37  ;;  %v1676_v1 = vmul.f32 %v5428_v12, %v6867_v56  ;;  %v6868_v37 = vld [vmem:[#allocation89_spill] sm:$0xff]  ;;  %v6877_v56 = vld [vmem:[#allocation154_spill] sm:$0xff] }
 0x41e   : > { %v1874_v47 = vpop.permute.xlu0 %1873  ;;  %v2668_v49 = vld [vmem:[#allocation2 + $0x88] sm:$0xff] }
 0x41f   : > { %2085 = vperm.xlu2 %3626, %v3797_v22   ;;  %v2225_v3 = vmul.f32 %v5406_v48, %v1874_v47  ;;  %v1661_v47 = vmul.f32 %v5428_v12, %v6861_v52  ;;  %v6871_v52 = vld [vmem:[#allocation129_spill] sm:$0xff] }
 0x421   : > { %v2325_v57 = vadd.f32 %v2225_v3, %v1723_v5  ;;  %v6862_v3 = vld [vmem:[#allocation141_spill] sm:$0xff] }
 0x423   : > { %2426 = vst.msk [vmem:[#allocation2 + $0x80] sm:$0xff] %vm2409_vm0, %v2325_v57  ;;  %v1619_v57 = vmul.f32 %v5428_v12, %v6862_v3  ;;  %v482_v3 = vld [vmem:[%s6449_s1 + $0x278] sm:$0xff] }
 0x428   : > { %v2684_v53 = vpop.permute.xlu2 %2683 }
 0x42a   : > { %v2667_v28 = vld [vmem:[#allocation2 + $0x80] sm:$0xff] }
 0x42b   : > { %v2711_v61 = vsel %vm2409_vm0, %v2667_v28, %v2684_v53  ;;  %v6863_v53 = vld [vmem:[#allocation148_spill] sm:$0xff] }
 0x42c   : > { %v1685_v28 = vmul.f32 %v5428_v12, %v6863_v53 }
 0x42e   : > { %v1785_v36 = vadd.f32 %v1685_v28, %v1183_v30  ;;  %v6872_v28 = vld [vmem:[#allocation99_spill] sm:$0xff] }
 0x459   : > { %v2702_v54 = vpop.permute.xlu2 %2701  ;;  %v2700_v45 = vpop.permute.xlu0 %2699 }
 0x45a   : > { %v2715_v32 = vsel %vm2558_vm1, %v2711_v61, %v2700_v45 }
 0x45b   : > { %3535 = vmatmul.msk.f32.gmra.mxu0 %vm2783_vm2, %v2715_v32  ;;  %v1117_v32 = vadd.f32 %v1017_v6, %v415_v16  ;;  %v6870_v16 = vld [vmem:[#allocation101_spill] sm:$0xff] }
 0x45c   : > { %v1067_v0 = vmul.f32 %v5412_v35, %v6870_v16 }
 0x45d   : > { %v1719_v63 = vadd.f32 %v1619_v57, %v1117_v32 }
 0x461   : > { %v1854_v39 = vpop.permute.xlu2 %1853  ;;  %v1850_v34 = vpop.permute.xlu0 %1849 }
 0x462   : > { %v2220_v7 = vmul.f32 %v5406_v48, %v1854_v39  ;;  %v2219_v9 = vmul.f32 %v5406_v48, %v1850_v34  ;;  %v1074_v39 = vmul.f32 %v5412_v35, %v6864_v24  ;;  %v477_v24 = vld [vmem:[%s6449_s1 + $0x250] sm:$0xff] }
 0x464   : > { %v2320_v42 = vadd.f32 %v2220_v7, %v1718_v14  ;;  %v2319_v17 = vadd.f32 %v2219_v9, %v1717_v19  ;;  %v6865_v19 = vld [vmem:[#allocation107_spill] sm:$0xff]  ;;  %v6866_v7 = vld [vmem:[#allocation112_spill] sm:$0xff] }
 0x465   : > { %v1060_v14 = vmul.f32 %v5412_v35, %v6865_v19  ;;  %v1076_v9 = vmul.f32 %v5412_v35, %v6866_v7  ;;  %v6875_v19 = vld [vmem:[#allocation119_spill] sm:$0xff] }
 0x466   : > { %2421 = vst.msk [vmem:[#allocation2 + $0x58] sm:$0xff] %vm2409_vm0, %v2320_v42  ;;  %v472_v42 = vld [vmem:[%s6449_s1 + $0x228] sm:$0xff] }
 0x467   : > { %2420 = vst.msk [vmem:[#allocation2 + $0x50] sm:$0xff] %vm2409_vm0, %v2319_v17 }
 0x469   : > { %v3629_v43 = vpop.permute.xlu2 %3628  ;;  %v2686_v4 = vpop.permute.xlu1 %2685 }
 0x46a   : > { %v2712_v27 = vsel %vm2409_vm0, %v2668_v49, %v2686_v4  ;;  %v1862_v41 = vpop.permute.xlu0 %1861  ;;  %v3631_v33 = vunpack.i.h.bf16 %v3629_v43  ;;  %v3630_v58 = vunpack.i.l.bf16 %v3629_v43  ;;  %v1662_v43 = vmul.f32 %v5428_v12, %v6868_v37  ;;  %v6869_v49 = vld [vmem:[#allocation151_spill] sm:$0xff] }
 0x46b   : > { %v2222_v10 = vmul.f32 %v5406_v48, %v1862_v41  ;;  %v2716_v21 = vsel %vm2558_vm1, %v2712_v27, %v2702_v54  ;;  %v1159_v54 = vadd.f32 %v1059_v23, %v457_v15  ;;  %v1678_v4 = vmul.f32 %v5428_v12, %v6869_v49 }
 0x46c   : > { %3536 = vmatmul.msk.f32.gmra.mxu0 %vm2783_vm2, %v2716_v21  ;;  %v1174_v27 = vadd.f32 %v1074_v39, %v472_v42  ;;  %v1160_v41 = vadd.f32 %v1060_v14, %v458_v38  ;;  %v6874_v39 = vld [vmem:[#allocation115_spill] sm:$0xff]  ;;  %v1072_v14 = vmul.f32 %v5412_v35, %v6875_v19  ;;  %v470_v42 = vld [vmem:[%s6449_s1 + $0x218] sm:$0xff] }
 0x46d   : > { %v2924_v60 = vld [vmem:[#allocation2 + $0x58] sm:$0xff]  ;;  %v2322_v55 = vadd.f32 %v2222_v10, %v1720_v62  ;;  %v1761_v50 = vadd.f32 %v1661_v47, %v1159_v54  ;;  %v1176_v62 = vadd.f32 %v1076_v9, %v474_v51  ;;  %v5809_v10 = vpop.f32.mrf.mxu0  ;;  %v1084_v47 = vmul.f32 %v5412_v35, %v6871_v52  ;;  %v6873_v54 = vld [vmem:[#allocation158_spill] sm:$0xff]  ;;  %v6876_v38 = vld [vmem:[#allocation147_spill] sm:$0xff] }
 0x46e   : > { %v2948_v5 = vsel %vm2409_vm0, %v2924_v60, %v3631_v33  ;;  %v2923_v22 = vld [vmem:[#allocation2 + $0x50] sm:$0xff]  ;;  %v1776_v25 = vadd.f32 %v1676_v1, %v1174_v27  ;;  %v1762_v15 = vadd.f32 %v1662_v43, %v1160_v41  ;;  %v1674_v51 = vmul.f32 %v5428_v12, %v6876_v38  ;;  %v3801_v41 = vld [vmem:[%s3991_s21 + $0x1a0] sm:$0xff]  ;;  %v3164_v38 = vld [vmem:[%s6452_s4 + $0x18] sm:$0xff] }
 0x46f   : > { %v2947_v61 = vsel %vm2409_vm0, %v2923_v22, %v3630_v58  ;;  %2423 = vst.msk [vmem:[#allocation2 + $0x68] sm:$0xff] %vm2409_vm0, %v2322_v55  ;;  %v1778_v29 = vadd.f32 %v1678_v4, %v1176_v62  ;;  %v465_v55 = vld [vmem:[%s6449_s1 + $0x1f0] sm:$0xff]  ;;  %v1681_v1 = vmul.f32 %v5428_v12, %v6877_v56  ;;  %v1172_v43 = vadd.f32 %v1072_v14, %v470_v42  ;;  %v3800_v4 = vld [vmem:[%s3991_s21 + $0x260] sm:$0xff] }
 0x470   : > { %v3637_v45 = vpack.i.bf16 %v2948_v5, %v2947_v61  ;;  %v1669_v61 = vmul.f32 %v5428_v12, %v6872_v28  ;;  %v1167_v30 = vadd.f32 %v1067_v0, %v465_v55  ;;  %v3804_v55 = vld [vmem:[%s3991_s21 + $0x190] sm:$0xff]  ;;  %v3806_v0 = vld [vmem:[%s3991_s21 + $0x198] sm:$0xff]  ;;  %v3811_v28 = vld [vmem:[%s3991_s21 + $0x240] sm:$0xff] }
 0x471   : > { %v2026_v18 = vpop.permute.xlu2 %2025  ;;  %v3807_v52 = vld [vmem:[%s3991_s21 + $0x230] sm:$0xff]  ;;  %v6878_v19 = vld [vmem:[#allocation117_spill] sm:$0xff] }
 0x472   : > { %v2263_v44 = vmul.f32 %v5406_v48, %v2026_v18  ;;  %v1858_v8 = vpop.permute.xlu1 %1857  ;;  %3638 = vrot.lane.b32.xlu2 %v3637_v45, %s3892_s25  ;;  %v2122_v59 = vpop.permute.xlu0 %2121  ;;  %v1686_v45 = vmul.f32 %v5428_v12, %v6873_v54  ;;  %v1184_v18 = vadd.f32 %v1084_v47, %v482_v3  ;;  %v1774_v12 = vadd.f32 %v1674_v51, %v1172_v43  ;;  %v3808_v47 = vld [vmem:[%s3991_s21 + $0x208] sm:$0xff]  ;;  %v3813_v54 = vld [vmem:[%s3991_s21 + $0x1d8] sm:$0xff]  ;;  %v5933_v42 = vld [vmem:[%s6450_s2 + $0x1] ss:$0 sm:$0xff] }
 0x473   : > { %v2221_v40 = vmul.f32 %v5406_v48, %v1858_v8  ;;  %v2287_v31 = vmul.f32 %v5406_v48, %v2122_v59  ;;  %v3799_v8 = vld [vmem:[%s3991_s21 + $0x268] sm:$0xff]  ;;  %v3163_v51 = vld [vmem:[%s6452_s4 + $0x10] sm:$0xff] }
 0x474   : > { %v2363_v34 = vadd.f32 %v2263_v44, %v1761_v50 }
 0x475   : > { %v2321_v17 = vadd.f32 %v2221_v40, %v1719_v63  ;;  %v2387_v26 = vadd.f32 %v2287_v31, %v1785_v36  ;;  %v5832_v50 = vpop.f32.mrf.mxu0  ;;  %v1769_v63 = vadd.f32 %v1669_v61, %v1167_v30  ;;  %v1786_v36 = vadd.f32 %v1686_v45, %v1184_v18  ;;  %v3812_v61 = vld [vmem:[%s3991_s21 + $0x248] sm:$0xff]  ;;  %v3176_v45 = vld [vmem:[%s6452_s4 + $0x78] sm:$0xff]  ;;  %v3814_v30 = vld [vmem:[%s3991_s21 + $0x180] sm:$0xff] }
 0x476   : > { %2464 = vst.msk [vmem:[#allocation2 + $0x1b0] sm:$0xff] %vm2409_vm0, %v2363_v34  ;;  %v2926_v53 = vld [vmem:[#allocation2 + $0x68] sm:$0xff]  ;;  %v1079_v34 = vmul.f32 %v5412_v35, %v6874_v39  ;;  %3177 = vmatpush.msra.mxu1 %v3176_v45  ;;  %3557 = vmatpush.msra.mxu3 %v3176_v45 }
 0x477   : > { %2422 = vst.msk [vmem:[#allocation2 + $0x60] sm:$0xff] %vm2409_vm0, %v2321_v17  ;;  %v3174_v18 = vld [vmem:[%s6452_s4 + $0x68] sm:$0xff] }
 0x478   : > { %2488 = vst.msk [vmem:[#allocation2 + $0x270] sm:$0xff] %vm2409_vm0, %v2387_v26  ;;  %v1179_v35 = vadd.f32 %v1079_v34, %v477_v24  ;;  %v3166_v39 = vld [vmem:[%s6452_s4 + $0x28] sm:$0xff]  ;;  %v5920_v34 = vld [vmem:[%s6450_s2] ss:$0 sm:$0xff] }
 0x479   : > { %v2086_v21 = vpop.permute.xlu2 %2085  ;;  %v1068_v14 = vmul.f32 %v5920_v34, %v6878_v19 }
 0x47a   : > { %v2278_v23 = vmul.f32 %v5406_v48, %v2086_v21  ;;  %v2094_v33 = vpop.permute.xlu1 %2093  ;;  %2061 = vperm.xlu2 %3626, %v3798_v13   ;;  %v2030_v6 = vpop.permute.xlu0 %2029  ;;  %v1781_v21 = vadd.f32 %v1681_v1, %v1179_v35  ;;  %v5946_v35 = vld [vmem:[%s6450_s2 + $0x2] ss:$0 sm:$0xff] }
 0x47b   : > { %v2280_v46 = vmul.f32 %v5406_v48, %v2094_v33  ;;  %v2264_v60 = vmul.f32 %v5406_v48, %v2030_v6  ;;  %v3647_v6 = vpack.i.bf16 %v5809_v10, %v5779_v2  ;;  %v3805_v2 = vld [vmem:[%s3991_s21 + $0x1d0] sm:$0xff] }
 0x47c   : > { %v2378_v58 = vadd.f32 %v2278_v23, %v1776_v25 }
 0x47d   : > { %v2380_v5 = vadd.f32 %v2280_v46, %v1778_v29  ;;  %v2364_v22 = vadd.f32 %v2264_v60, %v1762_v15  ;;  %v5854_v49 = vpop.f32.mrf.mxu0  ;;  %v3802_v15 = vld [vmem:[%s3991_s21 + $0x258] sm:$0xff]  ;;  %v3803_v29 = vld [vmem:[%s3991_s21 + $0x1a8] sm:$0xff]  ;;  %v3011_v60 = vld [vmem:[#allocation2 + $0x1b0] sm:$0xff] }
 0x47e   : > { %2479 = vst.msk [vmem:[#allocation2 + $0x228] sm:$0xff] %vm2409_vm0, %v2378_v58  ;;  %v2925_v57 = vld [vmem:[#allocation2 + $0x60] sm:$0xff] }
 0x47f   : > { %2481 = vst.msk [vmem:[#allocation2 + $0x238] sm:$0xff] %vm2409_vm0, %v2380_v5  ;;  %v3632_v32 = vpack.i.bf16 %v2926_v53, %v2925_v57  ;;  %v2983_v26 = vld [vmem:[#allocation2 + $0x270] sm:$0xff]  ;;  %v3809_v5 = vld [vmem:[%s3991_s21 + $0x1e0] sm:$0xff] }
 0x480   : > { %2465 = vst.msk [vmem:[#allocation2 + $0x1b8] sm:$0xff] %vm2409_vm0, %v2364_v22  ;;  %v3810_v22 = vld [vmem:[%s3991_s21 + $0x1e8] sm:$0xff] }
 0x481   : > { %3633 = vrot.lane.b32.xlu1 %v3632_v32, %s3891_s17  ;;  %v3175_v32 = vld [vmem:[%s6452_s4 + $0x70] sm:$0xff] }
 0x482   : > { %v2126_v44 = vpop.permute.xlu1 %2125  ;;  %2117 = vperm.xlu2 %3626, %v3799_v8   ;;  %v2058_v59 = vpop.permute.xlu0 %2057  ;;  %3178 = vmatpush.msra.mxu1 %v3175_v32  ;;  %v3172_v8 = vld [vmem:[%s6452_s4 + $0x58] sm:$0xff] }
 0x483   : > { %v2288_v40 = vmul.f32 %v5406_v48, %v2126_v44  ;;  %v2271_v31 = vmul.f32 %v5406_v48, %v2058_v59  ;;  %3558 = vmatpush.msra.mxu3 %v3175_v32  ;;  %v3173_v44 = vld [vmem:[%s6452_s4 + $0x60] sm:$0xff]  ;;  %v3171_v59 = vld [vmem:[%s6452_s4 + $0x50] sm:$0xff] }
 0x484   : > { %3179 = vmatpush.msra.mxu1 %v3174_v18  ;;  %v6886_v32 = vld [vmem:[#allocation110_spill] sm:$0xff] }
 0x485   : > { %v2388_v7 = vadd.f32 %v2288_v40, %v1786_v36  ;;  %v2371_v9 = vadd.f32 %v2271_v31, %v1769_v63  ;;  %v2879_v46 = vpop.f32.mrf.mxu0  ;;  %v2954_v3 = vld [vmem:[#allocation2 + $0x228] sm:$0xff]  ;;  %3559 = vmatpush.msra.mxu3 %v3174_v18  ;;  %v3169_v36 = vld [vmem:[%s6452_s4 + $0x40] sm:$0xff]  ;;  %v3168_v40 = vld [vmem:[%s6452_s4 + $0x38] sm:$0xff] }
 0x486   : > { %v2956_v17 = vld [vmem:[#allocation2 + $0x238] sm:$0xff]  ;;  %3180 = vmatpush.msra.mxu1 %v3173_v44  ;;  %v3170_v63 = vld [vmem:[%s6452_s4 + $0x48] sm:$0xff]  ;;  %v3167_v31 = vld [vmem:[%s6452_s4 + $0x30] sm:$0xff] }
 0x487   : > { %2489 = vst.msk [vmem:[#allocation2 + $0x278] sm:$0xff] %vm2409_vm0, %v2388_v7  ;;  %v3642_v37 = vpack.i.bf16 %v2983_v26, %v2956_v17  ;;  %v3012_v57 = vld [vmem:[#allocation2 + $0x1b8] sm:$0xff]  ;;  %3560 = vmatpush.msra.mxu3 %v3173_v44  ;;  %v3165_v7 = vld [vmem:[%s6452_s4 + $0x20] sm:$0xff]  ;;  %v6879_v17 = vld [vmem:[#allocation75_spill] sm:$0xff] }
 0x488   : > { %2472 = vst.msk [vmem:[#allocation2 + $0x1f0] sm:$0xff] %vm2409_vm0, %v2371_v9  ;;  %v3662_v53 = vpack.i.bf16 %v2954_v3, %v3012_v57  ;;  %3181 = vmatpush.msra.mxu1 %v3172_v8  ;;  %v466_v9 = vld [vmem:[%s6449_s1 + $0x1f8] sm:$0xff]  ;;  %v1670_v26 = vmul.f32 %v5933_v42, %v6879_v17  ;;  %v6885_v3 = vld [vmem:[#allocation82_spill] sm:$0xff]  ;;  %v461_v44 = vld [vmem:[%s6449_s1 + $0x1d0] sm:$0xff] }
 0x489   : > { %2113 = vperm.xlu1 %3625, %v3800_v4   ;;  %3643 = vrot.lane.b32.xlu0 %v3642_v37, %s3891_s17  ;;  %v1168_v56 = vadd.f32 %v1068_v14, %v466_v9  ;;  %v3162_v4 = vld [vmem:[%s6452_s4 + $0x8] sm:$0xff]  ;;  %v1660_v57 = vmul.f32 %v5933_v42, %v6885_v3 }
 0x48a   : > { %v2078_v27 = vpop.permute.xlu1 %2077  ;;  %2017 = vperm.xlu2 %3626, %v3801_v41   ;;  %v2106_v62 = vpop.permute.xlu0 %2105  ;;  %3561 = vmatpush.msra.mxu3 %v3172_v8  ;;  %v6887_v8 = vld [vmem:[#allocation95_spill] sm:$0xff]  ;;  %v6888_v9 = vld [vmem:[#allocation126_spill] sm:$0xff] }
 0x48b   : > { %v2276_v25 = vmul.f32 %v5406_v48, %v2078_v27  ;;  %v2283_v23 = vmul.f32 %v5406_v48, %v2106_v62  ;;  %3182 = vmatpush.msra.mxu1 %v3171_v59  ;;  %v1770_v37 = vadd.f32 %v1670_v26, %v1168_v56  ;;  %v6880_v27 = vld [vmem:[#allocation118_spill] sm:$0xff]  ;;  %v1081_v17 = vmul.f32 %v5920_v34, %v6888_v9 }
 0x48c   : > { %3562 = vmatpush.msra.mxu3 %v3171_v59  ;;  %v1082_v41 = vmul.f32 %v5920_v34, %v6880_v27  ;;  %v1665_v59 = vmul.f32 %v5933_v42, %v6887_v8  ;;  %v6890_v27 = vld [vmem:[#allocation155_spill] sm:$0xff] }
 0x48d   : > { %v2376_v33 = vadd.f32 %v2276_v25, %v1774_v12  ;;  %v2383_v13 = vadd.f32 %v2283_v23, %v1781_v21  ;;  %v2882_v10 = vpop.f32.mrf.mxu0  ;;  %3183 = vmatpush.msra.mxu1 %v3170_v63  ;;  %v3161_v12 = vld [vmem:[%s6452_s4] sm:$0xff]  ;;  %v480_v21 = vld [vmem:[%s6449_s1 + $0x268] sm:$0xff] }
 0x48e   : > { %v2984_v48 = vld [vmem:[#allocation2 + $0x278] sm:$0xff]  ;;  %v3657_v16 = vpack.i.bf16 %v2882_v10, %v2879_v46  ;;  %3563 = vmatpush.msra.mxu3 %v3170_v63 }
 0x48f   : > { %2477 = vst.msk [vmem:[#allocation2 + $0x218] sm:$0xff] %vm2409_vm0, %v2376_v33  ;;  %v3652_v58 = vpack.i.bf16 %v3011_v60, %v2984_v48  ;;  %3184 = vmatpush.msra.mxu1 %v3169_v36  ;;  %v6881_v25 = vld [vmem:[#allocation157_spill] sm:$0xff]  ;;  %v1182_v33 = vadd.f32 %v1082_v41, %v480_v21  ;;  %v1683_v41 = vmul.f32 %v5933_v42, %v6890_v27  ;;  %v6897_v27 = vld [vmem:[#allocation123_spill] sm:$0xff] }
 0x490   : > { %2484 = vst.msk [vmem:[#allocation2 + $0x250] sm:$0xff] %vm2409_vm0, %v2383_v13  ;;  %3564 = vmatpush.msra.mxu3 %v3169_v36  ;;  %v1684_v23 = vmul.f32 %v5933_v42, %v6881_v25  ;;  %v455_v60 = vld [vmem:[%s6449_s1 + $0x1a0] sm:$0xff] }
 0x491   : > { %2109 = vperm.xlu1 %3625, %v3802_v15   ;;  %3648 = vrot.lane.b32.xlu0 %v3647_v6, %s3892_s25 }
 0x492   : > { %2021 = vperm.xlu2 %3626, %v3803_v29   ;;  %3185 = vmatpush.msra.mxu1 %v3168_v40  ;;  %v1784_v6 = vadd.f32 %v1684_v23, %v1182_v33  ;;  %v6882_v29 = vld [vmem:[#allocation102_spill] sm:$0xff] }
 0x493   : > { %3565 = vmatpush.msra.mxu3 %v3168_v40  ;;  %v1057_v46 = vmul.f32 %v5920_v34, %v6882_v29 }
 0x494   : > { %3186 = vmatpush.msra.mxu1 %v3167_v31 }
 0x495   : > { %3566 = vmatpush.msra.mxu3 %v3167_v31 }
 0x496   : > { %3187 = vmatpush.msra.mxu1 %v3166_v39 }
 0x497   : > { %3567 = vmatpush.msra.mxu3 %v3166_v39 }
 0x498   : > { %3188 = vmatpush.msra.mxu1 %v3165_v7 }
 0x499   : > { %2009 = vperm.xlu1 %3625, %v3804_v55   ;;  %3653 = vrot.lane.b32.xlu0 %v3652_v58, %s3891_s17  ;;  %v6883_v58 = vld [vmem:[#allocation83_spill] sm:$0xff] }
 0x49a   : > { %2041 = vperm.xlu2 %3626, %v3805_v2   ;;  %3568 = vmatpush.msra.mxu3 %v3165_v7  ;;  %v1659_v55 = vmul.f32 %v5933_v42, %v6883_v58  ;;  %v1157_v2 = vadd.f32 %v1057_v46, %v455_v60  ;;  %v2921_v7 = vld [vmem:[#allocation2 + $0x40] sm:$0xff] }
 0x49b   : > { %3189 = vmatpush.msra.mxu1 %v3164_v38 }
 0x49c   : > { %3569 = vmatpush.msra.mxu3 %v3164_v38 }
 0x49d   : > { %3190 = vmatpush.msra.mxu1 %v3163_v51 }
 0x49e   : > { %3570 = vmatpush.msra.mxu3 %v3163_v51  ;;  %v6889_v51 = vld [vmem:[#allocation121_spill] sm:$0xff] }
 0x49f   : > { %3191 = vmatpush.msra.mxu1 %v3162_v4  ;;  %v1075_v56 = vmul.f32 %v5920_v34, %v6889_v51  ;;  %v6896_v51 = vld [vmem:[#allocation78_spill] sm:$0xff] }
 0x4a0   : > { %3571 = vmatpush.msra.mxu3 %v3162_v4  ;;  %v473_v4 = vld [vmem:[%s6449_s1 + $0x230] sm:$0xff] }
 0x4a1   : > { %2013 = vperm.xlu1 %3625, %v3806_v0   ;;  %3658 = vrot.lane.b32.xlu0 %v3657_v16, %s3892_s25  ;;  %v1759_v16 = vadd.f32 %v1659_v55, %v1157_v2  ;;  %v1175_v23 = vadd.f32 %v1075_v56, %v473_v4  ;;  %v2952_v2 = vld [vmem:[#allocation2 + $0x218] sm:$0xff]  ;;  %v1055_v56 = vmul.f32 %v5920_v34, %v6896_v51  ;;  %v453_v4 = vld [vmem:[%s6449_s1 + $0x190] sm:$0xff] }
 0x4a2   : > { %2089 = vperm.xlu2 %3626, %v3807_v52   ;;  %3192 = vmatpush.msra.mxu1 %v3161_v12  ;;  %v6884_v52 = vld [vmem:[#allocation84_spill] sm:$0xff] }
 0x4a3   : > { %3572 = vmatpush.msra.mxu3 %v3161_v12  ;;  %v6891_v12 = vld [vmem:[#allocation150_spill] sm:$0xff] }
 0x4a4   : > { %v1677_v21 = vmul.f32 %v5933_v42, %v6891_v12 }
 0x4a6   : > { %v1777_v58 = vadd.f32 %v1677_v21, %v1175_v23  ;;  %v476_v23 = vld [vmem:[%s6449_s1 + $0x248] sm:$0xff] }
 0x4a9   : > { %2069 = vperm.xlu1 %3625, %v3808_v47   ;;  %2049 = vperm.xlu0 %3624, %v3809_v5   ;;  %v1058_v47 = vmul.f32 %v5920_v34, %v6884_v52 }
 0x4aa   : > { %2053 = vperm.xlu2 %3626, %v3810_v22   ;;  %v456_v22 = vld [vmem:[%s6449_s1 + $0x1a8] sm:$0xff] }
 0x4b1   : > { %2097 = vperm.xlu0 %3624, %v3811_v28   ;;  %3663 = vrot.lane.b32.xlu1 %v3662_v53, %s3891_s17  ;;  %v1158_v53 = vadd.f32 %v1058_v47, %v456_v22  ;;  %v5981_v28 = vpop.f32.mrf.mxu0  ;;  %v6893_v22 = vld [vmem:[#allocation113_spill] sm:$0xff] }
 0x4b2   : > { %2101 = vperm.xlu2 %3626, %v3812_v61   ;;  %v1066_v3 = vmul.f32 %v5920_v34, %v6893_v22 }
 0x4b9   : > { %2045 = vperm.xlu1 %3625, %v3813_v54   ;;  %v1760_v54 = vadd.f32 %v1660_v57, %v1158_v53  ;;  %v5996_v26 = vpop.f32.mrf.mxu0  ;;  %v478_v57 = vld [vmem:[%s6449_s1 + $0x258] sm:$0xff] }
 0x4ba   : > { %2001 = vperm.xlu2 %3626, %v3814_v30   ;;  %v1063_v30 = vmul.f32 %v5920_v34, %v6886_v32 }
 0x4bc   : > { %v1163_v63 = vadd.f32 %v1063_v30, %v461_v44 }
 0x4be   : > { %v1765_v39 = vadd.f32 %v1665_v59, %v1163_v63  ;;  %v2979_v63 = vld [vmem:[#allocation2 + $0x250] sm:$0xff] }
 0x4c1   : > { %v2891_v52 = vpop.f32.mrf.mxu0 }
 0x4cc   : > { %v5912_v24 = vpop.permute.xlu2 %3638 }
 0x4cd   : > { %v3640_v19 = vunpack.i.l.bf16 %v5912_v24  ;;  %v3641_v55 = vunpack.i.h.bf16 %v5912_v24 }
 0x4d4   : > { %v2062_v1 = vpop.permute.xlu2 %2061 }
 0x4d5   : > { %v2272_v43 = vmul.f32 %v5946_v35, %v2062_v1  ;;  %v479_v1 = vld [vmem:[%s6449_s1 + $0x260] sm:$0xff] }
 0x4d6   : > { %v1181_v25 = vadd.f32 %v1081_v17, %v479_v1  ;;  %v2894_v1 = vpop.f32.mrf.mxu0 }
 0x4d7   : > { %v2372_v62 = vadd.f32 %v2272_v43, %v1770_v37 }
 0x4d9   : > { %2473 = vst.msk [vmem:[#allocation2 + $0x1f8] sm:$0xff] %vm2409_vm0, %v2372_v62 }
 0x4dc   : > { %v2118_v13 = vpop.permute.xlu2 %2117 }
 0x4dd   : > { %v2286_v15 = vmul.f32 %v5946_v35, %v2118_v13 }
 0x4df   : > { %v2386_v48 = vadd.f32 %v2286_v15, %v1784_v6  ;;  %v2922_v6 = vld [vmem:[#allocation2 + $0x48] sm:$0xff]  ;;  %v1783_v15 = vadd.f32 %v1683_v41, %v1181_v25  ;;  %v1078_v41 = vmul.f32 %v5920_v34, %v6897_v27  ;;  %v3039_v25 = vld [vmem:[#allocation2 + $0x1f0] sm:$0xff] }
 0x4e1   : > { %2487 = vst.msk [vmem:[#allocation2 + $0x268] sm:$0xff] %vm2409_vm0, %v2386_v48 }
 0x4e4   : > { %v2018_v10 = vpop.permute.xlu2 %2017 }
 0x4e5   : > { %v2261_v0 = vmul.f32 %v5946_v35, %v2018_v10 }
 0x4e7   : > { %v2361_v5 = vadd.f32 %v2261_v0, %v1759_v16  ;;  %v6892_v16 = vld [vmem:[#allocation127_spill] sm:$0xff] }
 0x4e8   : > { %v1080_v0 = vmul.f32 %v5920_v34, %v6892_v16 }
 0x4e9   : > { %2462 = vst.msk [vmem:[#allocation2 + $0x1a0] sm:$0xff] %vm2409_vm0, %v2361_v5 }
 0x4ea   : > { %v1180_v8 = vadd.f32 %v1080_v0, %v478_v57 }
 0x4ec   : > { %v2022_v61 = vpop.permute.xlu2 %2021 }
 0x4ed   : > { %v2262_v45 = vmul.f32 %v5946_v35, %v2022_v61 }
 0x4ef   : > { %v2362_v18 = vadd.f32 %v2262_v45, %v1760_v54  ;;  %v464_v54 = vld [vmem:[%s6449_s1 + $0x1e8] sm:$0xff]  ;;  %v6894_v45 = vld [vmem:[#allocation104_spill] sm:$0xff] }
 0x4f0   : > { %v1682_v32 = vmul.f32 %v5933_v42, %v6894_v45  ;;  %v1166_v59 = vadd.f32 %v1066_v3, %v464_v54 }
 0x4f1   : > { %2463 = vst.msk [vmem:[#allocation2 + $0x1a8] sm:$0xff] %vm2409_vm0, %v2362_v18  ;;  %v6895_v18 = vld [vmem:[#allocation93_spill] sm:$0xff] }
 0x4f2   : > { %v1668_v44 = vmul.f32 %v5933_v42, %v6895_v18  ;;  %v451_v18 = vld [vmem:[%s6449_s1 + $0x180] sm:$0xff] }
 0x4f3   : > { %v3634_v36 = vpop.permute.xlu1 %3633 }
 0x4f4   : > { %v3635_v40 = vunpack.i.l.bf16 %v3634_v36  ;;  %v2042_v31 = vpop.permute.xlu2 %2041  ;;  %v3636_v62 = vunpack.i.h.bf16 %v3634_v36  ;;  %v1768_v17 = vadd.f32 %v1668_v44, %v1166_v59  ;;  %v6902_v44 = vld [vmem:[#allocation65_spill] sm:$0xff] }
 0x4f5   : > { %v2267_v14 = vmul.f32 %v5946_v35, %v2042_v31  ;;  %v1782_v31 = vadd.f32 %v1682_v32, %v1180_v8  ;;  %v1658_v8 = vmul.f32 %v5933_v42, %v6902_v44  ;;  %v3819_v44 = vld [vmem:[%s3991_s21 + $0x1c0] sm:$0xff] }
 0x4f6   : > { %v2945_v38 = vsel %vm2409_vm0, %v2921_v7, %v3635_v40  ;;  %v2946_v60 = vsel %vm2409_vm0, %v2922_v6, %v3636_v62  ;;  %v6899_v6 = vld [vmem:[#allocation152_spill] sm:$0xff] }
 0x4f7   : > { %v2367_v37 = vadd.f32 %v2267_v14, %v1765_v39  ;;  %v3069_v43 = vsel %vm2558_vm1, %v2945_v38, %v3640_v19  ;;  %v3070_v24 = vsel %vm2558_vm1, %v2946_v60, %v3641_v55  ;;  %v2903_v39 = vpop.f32.mrf.mxu2 }
 0x4f8   : > { %3193 = vmatmul.f32.vlgmr.msra.gmra.mxu1 %v3069_v43 }
 0x4f9   : > { %2468 = vst.msk [vmem:[#allocation2 + $0x1d0] sm:$0xff] %vm2409_vm0, %v2367_v37 }
 0x4fb   : > { %v2114_v33 = vpop.permute.xlu1 %2113  ;;  %v3644_v13 = vpop.permute.xlu0 %3643 }
 0x4fc   : > { %v2285_v29 = vmul.f32 %v5946_v35, %v2114_v33  ;;  %v3645_v46 = vunpack.i.l.bf16 %v3644_v13  ;;  %v2090_v48 = vpop.permute.xlu2 %2089  ;;  %v3646_v30 = vunpack.i.h.bf16 %v3644_v13  ;;  %v6898_v33 = vld [vmem:[#allocation76_spill] sm:$0xff] }
 0x4fd   : > { %v2279_v10 = vmul.f32 %v5946_v35, %v2090_v48  ;;  %v1657_v13 = vmul.f32 %v5933_v42, %v6898_v33 }
 0x4fe   : > { %v2385_v47 = vadd.f32 %v2285_v29, %v1783_v15  ;;  %v2976_v5 = vsel %vm2409_vm0, %v2952_v2, %v3645_v46  ;;  %v3003_v19 = vsel %vm2409_vm0, %v2979_v63, %v3646_v30  ;;  %v1680_v15 = vmul.f32 %v5933_v42, %v6899_v6  ;;  %v3040_v30 = vld [vmem:[#allocation2 + $0x1f8] sm:$0xff] }
 0x4ff   : > { %v3667_v53 = vpack.i.bf16 %v2976_v5, %v2891_v52  ;;  %v2379_v61 = vadd.f32 %v2279_v10, %v1777_v58  ;;  %v3677_v62 = vpack.i.bf16 %v3003_v19, %v2894_v1  ;;  %v1155_v29 = vadd.f32 %v1055_v56, %v453_v4  ;;  %v6059_v2 = vpop.f32.mrf.mxu2  ;;  %v6900_v5 = vld [vmem:[#allocation103_spill] sm:$0xff]  ;;  %v6904_v1 = vld [vmem:[#allocation106_spill] sm:$0xff] }
 0x500   : > { %2486 = vst.msk [vmem:[#allocation2 + $0x260] sm:$0xff] %vm2409_vm0, %v2385_v47  ;;  %3196 = vmatmul.f32.gmra.mxu1 %v3070_v24  ;;  %v1178_v46 = vadd.f32 %v1078_v41, %v476_v23  ;;  %v2982_v47 = vld [vmem:[#allocation2 + $0x268] sm:$0xff]  ;;  %v1056_v22 = vmul.f32 %v5920_v34, %v6900_v5  ;;  %v454_v24 = vld [vmem:[%s6449_s1 + $0x198] sm:$0xff]  ;;  %v463_v23 = vld [vmem:[%s6449_s1 + $0x1e0] sm:$0xff] }
 0x501   : > { %2480 = vst.msk [vmem:[#allocation2 + $0x230] sm:$0xff] %vm2409_vm0, %v2379_v61  ;;  %3668 = vrot.lane.b32.xlu0 %v3667_v53, %s3892_s25  ;;  %v1757_v55 = vadd.f32 %v1657_v13, %v1155_v29  ;;  %v6901_v53 = vld [vmem:[#allocation98_spill] sm:$0xff]  ;;  %v3682_v63 = vpack.i.bf16 %v2982_v47, %v3040_v30 }
 0x502   : > { %v1780_v0 = vadd.f32 %v1680_v15, %v1178_v46  ;;  %v1053_v61 = vmul.f32 %v5920_v34, %v6901_v53  ;;  %v6905_v4 = vld [vmem:[#allocation114_spill] sm:$0xff] }
 0x503   : > { %v2110_v36 = vpop.permute.xlu1 %2109  ;;  %v3649_v40 = vpop.permute.xlu0 %3648  ;;  %v1065_v27 = vmul.f32 %v5920_v34, %v6905_v4  ;;  %v6907_v15 = vld [vmem:[#allocation6_spill] sm:$0xff] }
 0x504   : > { %v2284_v14 = vmul.f32 %v5946_v35, %v2110_v36  ;;  %v3650_v7 = vunpack.i.l.bf16 %v3649_v40  ;;  %v2054_v9 = vpop.permute.xlu2 %2053  ;;  %v3651_v48 = vunpack.i.h.bf16 %v3649_v40  ;;  %v6903_v36 = vld [vmem:[#allocation58_spill] sm:$0xff]  ;;  %v1153_v19 = vadd.f32 %v1053_v61, %v451_v18 }
 0x505   : > { %v2270_v38 = vmul.f32 %v5946_v35, %v2054_v9  ;;  %v1655_v40 = vmul.f32 %v5933_v42, %v6903_v36  ;;  %v1672_v29 = vmul.f32 %v5933_v42, %v6907_v15  ;;  %v3009_v46 = vld [vmem:[#allocation2 + $0x1a0] sm:$0xff] }
 0x506   : > { %v2384_v37 = vadd.f32 %v2284_v14, %v1782_v31  ;;  %v3079_v43 = vsel %vm2558_vm1, %v5736_v20, %v3650_v7  ;;  %v3080_v32 = vsel %vm2558_vm1, %v5749_v11, %v3651_v48  ;;  %v1156_v11 = vadd.f32 %v1056_v22, %v454_v24 }
 0x507   : > { %v2370_v12 = vadd.f32 %v2270_v38, %v1768_v17  ;;  %v2981_v21 = vld [vmem:[#allocation2 + $0x260] sm:$0xff]  ;;  %v6084_v17 = vpop.f32.mrf.mxu2 }
 0x508   : > { %2485 = vst.msk [vmem:[#allocation2 + $0x258] sm:$0xff] %vm2409_vm0, %v2384_v37  ;;  %3199 = vmatmul.f32.gmra.mxu1 %v3079_v43  ;;  %v3672_v20 = vpack.i.bf16 %v2981_v21, %v3039_v25  ;;  %v1758_v9 = vadd.f32 %v1658_v8, %v1156_v11  ;;  %v1755_v37 = vadd.f32 %v1655_v40, %v1153_v19  ;;  %v3010_v21 = vld [vmem:[#allocation2 + $0x1a8] sm:$0xff]  ;;  %v6910_v11 = vld [vmem:[#allocation96_spill] sm:$0xff] }
 0x509   : > { %2471 = vst.msk [vmem:[#allocation2 + $0x1e8] sm:$0xff] %vm2409_vm0, %v2370_v12  ;;  %3678 = vrot.lane.b32.xlu0 %v3677_v62, %s3892_s25  ;;  %v468_v25 = vld [vmem:[%s6449_s1 + $0x208] sm:$0xff]  ;;  %v1064_v19 = vmul.f32 %v5920_v34, %v6910_v11 }
 0x50a   : > { %3673 = vrot.lane.b32.xlu1 %v3672_v20, %s3891_s17  ;;  %v6906_v20 = vld [vmem:[#allocation69_spill] sm:$0xff]  ;;  %v460_v11 = vld [vmem:[%s6449_s1 + $0x1c8] sm:$0xff] }
 0x50b   : > { %v2010_v60 = vpop.permute.xlu1 %2009  ;;  %v3654_v58 = vpop.permute.xlu0 %3653  ;;  %v1667_v6 = vmul.f32 %v5933_v42, %v6906_v20 }
 0x50c   : > { %v2259_v10 = vmul.f32 %v5946_v35, %v2010_v60  ;;  %v2102_v16 = vpop.permute.xlu2 %2101  ;;  %v3655_v57 = vunpack.i.l.bf16 %v3654_v58  ;;  %v3656_v41 = vunpack.i.h.bf16 %v3654_v58  ;;  %v3697_v60 = vpack.i.bf16 %v3010_v21, %v3009_v46 }
 0x50d   : > { %v2282_v52 = vmul.f32 %v5946_v35, %v2102_v16 }
 0x50e   : > { %v2359_v3 = vadd.f32 %v2259_v10, %v1757_v55  ;;  %v1165_v55 = vadd.f32 %v1065_v27, %v463_v23  ;;  %v3818_v10 = vld [vmem:[%s3991_s21 + $0x188] sm:$0xff] }
 0x50f   : > { %v2980_v54 = vld [vmem:[#allocation2 + $0x258] sm:$0xff]  ;;  %v2382_v45 = vadd.f32 %v2282_v52, %v1780_v0  ;;  %v6111_v22 = vpop.f32.mrf.mxu2 }
 0x510   : > { %2460 = vst.msk [vmem:[#allocation2 + $0x190] sm:$0xff] %vm2409_vm0, %v2359_v3  ;;  %v3004_v59 = vsel %vm2409_vm0, %v2980_v54, %v3655_v57  ;;  %3202 = vmatmul.f32.gmra.mxu1 %v3080_v32  ;;  %v1767_v47 = vadd.f32 %v1667_v6, %v1165_v55  ;;  %v6908_v57 = vld [vmem:[#allocation124_spill] sm:$0xff]  ;;  %v475_v54 = vld [vmem:[%s6449_s1 + $0x240] sm:$0xff]  ;;  %v3038_v21 = vld [vmem:[#allocation2 + $0x1e8] sm:$0xff] }
 0x511   : > { %v3687_v31 = vpack.i.bf16 %v3004_v59, %v2903_v39  ;;  %2483 = vst.msk [vmem:[#allocation2 + $0x248] sm:$0xff] %vm2409_vm0, %v2382_v45  ;;  %v1070_v39 = vmul.f32 %v5920_v34, %v6904_v1  ;;  %v1077_v53 = vmul.f32 %v5920_v34, %v6908_v57  ;;  %v6909_v32 = vld [vmem:[#allocation100_spill] sm:$0xff] }
 0x512   : > { %3683 = vrot.lane.b32.xlu1 %v3682_v63, %s3891_s17  ;;  %v1679_v30 = vmul.f32 %v5933_v42, %v6909_v32  ;;  %v3820_v63 = vld [vmem:[%s3991_s21 + $0x210] sm:$0xff] }
 0x513   : > { %v2014_v14 = vpop.permute.xlu1 %2013  ;;  %v3659_v7 = vpop.permute.xlu0 %3658  ;;  %3688 = vrot.lane.b32.xlu0 %v3687_v31, %s3892_s25  ;;  %v1170_v58 = vadd.f32 %v1070_v39, %v468_v25  ;;  %v1177_v18 = vadd.f32 %v1077_v53, %v475_v54  ;;  %v2955_v25 = vld [vmem:[#allocation2 + $0x230] sm:$0xff] }
 0x514   : > { %v2260_v38 = vmul.f32 %v5946_v35, %v2014_v14  ;;  %v3660_v51 = vunpack.i.l.bf16 %v3659_v7  ;;  %v2002_v56 = vpop.permute.xlu2 %2001  ;;  %v3661_v16 = vunpack.i.h.bf16 %v3659_v7  ;;  %v3712_v23 = vpack.i.bf16 %v3038_v21, %v2955_v25 }
 0x515   : > { %v2257_v43 = vmul.f32 %v5946_v35, %v2002_v56  ;;  %v1772_v5 = vadd.f32 %v1672_v29, %v1170_v58  ;;  %v1779_v36 = vadd.f32 %v1679_v30, %v1177_v18  ;;  %v6911_v56 = vld [vmem:[#allocation94_spill] sm:$0xff] }
 0x516   : > { %v2360_v62 = vadd.f32 %v2260_v38, %v1758_v9  ;;  %v3089_v12 = vsel %vm2558_vm1, %v5832_v50, %v3660_v51  ;;  %v3090_v45 = vsel %vm2558_vm1, %v5854_v49, %v3661_v16  ;;  %v462_v38 = vld [vmem:[%s6449_s1 + $0x1d8] sm:$0xff]  ;;  %v1666_v1 = vmul.f32 %v5933_v42, %v6911_v56 }
 0x517   : > { %v3007_v33 = vld [vmem:[#allocation2 + $0x190] sm:$0xff]  ;;  %v2357_v13 = vadd.f32 %v2257_v43, %v1755_v37  ;;  %v2915_v14 = vpop.f32.mrf.mxu2  ;;  %v1164_v39 = vadd.f32 %v1064_v19, %v462_v38  ;;  %v3821_v37 = vld [vmem:[%s3991_s21 + $0x220] sm:$0xff]  ;;  %v2897_v19 = vpop.f32.mrf.mxu0 }
 0x518   : > { %v3031_v50 = vsel %vm2409_vm0, %v3007_v33, %v3656_v41  ;;  %2461 = vst.msk [vmem:[#allocation2 + $0x198] sm:$0xff] %vm2409_vm0, %v2360_v62  ;;  %3205 = vmatmul.f32.gmra.mxu1 %v3089_v12  ;;  %v3822_v62 = vld [vmem:[%s3991_s21 + $0x1c8] sm:$0xff]  ;;  %v3823_v33 = vld [vmem:[%s3991_s21 + $0x200] sm:$0xff]  ;;  %s296_s21 = sand.u32 1, %s3878_s28  }
 0x519   : > { %v3692_v48 = vpack.i.bf16 %v3031_v50, %v6059_v2  ;;  %2458 = vst.msk [vmem:[#allocation2 + $0x180] sm:$0xff] %vm2409_vm0, %v2357_v13  ;;  %v1766_v4 = vadd.f32 %v1666_v1, %v1164_v39  ;;  %v6915_v39 = vld [vmem:[#allocation77_spill] sm:$0xff]  ;;  %s297_s10 = scalar_lea.vmem [#allocation3], %s296_s21  ;;  %s3451_s18 = scalar_lea.sflag [#allocation4], %s296_s21 }
 0x51a   : > { %2005 = vperm.xlu1 %3625, %v3818_v10   ;;  %s3461_s12 = sshll.u32 %s297_s10, 4  ;;  %s3462_s12 = int_to_ptr.vmem [resolvable:$true] %s3461_s12 }
 0x51b   : > { %v2070_v0 = vpop.permute.xlu1 %2069  ;;  %v2050_v52 = vpop.permute.xlu0 %2049  ;;  %3693 = vrot.lane.b32.xlu2 %v3692_v48, %s3892_s25  ;;  %3698 = vrot.lane.b32.xlu0 %v3697_v60, %s3891_s17 }
 0x51c   : > { %v2274_v2 = vmul.f32 %v5946_v35, %v2070_v0  ;;  %v2269_v3 = vmul.f32 %v5946_v35, %v2050_v52 }
 0x51e   : > { %v2374_v61 = vadd.f32 %v2274_v2, %v1772_v5  ;;  %v2369_v24 = vadd.f32 %v2269_v3, %v1767_v47  ;;  %v3035_v2 = vld [vmem:[#allocation2 + $0x1d0] sm:$0xff] }
 0x51f   : > { %v3008_v31 = vld [vmem:[#allocation2 + $0x198] sm:$0xff] }
 0x520   : > { %2475 = vst.msk [vmem:[#allocation2 + $0x208] sm:$0xff] %vm2409_vm0, %v2374_v61  ;;  %3208 = vmatmul.f32.gmra.mxu1 %v3090_v45 }
 0x521   : > { %2470 = vst.msk [vmem:[#allocation2 + $0x1e0] sm:$0xff] %vm2409_vm0, %v2369_v24 }
 0x522   : > { %2033 = vperm.xlu1 %3625, %v3819_v44  }
 0x523   : > { %v3664_v8 = vpop.permute.xlu1 %3663  ;;  %v2098_v59 = vpop.permute.xlu0 %2097  ;;  %2073 = vperm.xlu0 %3624, %v3820_v63  }
 0x524   : > { %v3665_v40 = vunpack.i.l.bf16 %v3664_v8  ;;  %v2281_v49 = vmul.f32 %v5946_v35, %v2098_v59  ;;  %v3666_v20 = vunpack.i.h.bf16 %v3664_v8  ;;  %v6912_v8 = vld [vmem:[#allocation111_spill] sm:$0xff] }
 0x525   : > { %v1062_v59 = vmul.f32 %v5920_v34, %v6912_v8 }
 0x526   : > { %v3032_v7 = vsel %vm2409_vm0, %v3008_v31, %v3665_v40  ;;  %v2381_v9 = vadd.f32 %v2281_v49, %v1779_v36  ;;  %v2978_v40 = vld [vmem:[#allocation2 + $0x248] sm:$0xff]  ;;  %v6913_v49 = vld [vmem:[#allocation97_spill] sm:$0xff] }
 0x527   : > { %v3702_v51 = vpack.i.bf16 %v3032_v7, %v2915_v14  ;;  %v2950_v13 = vld [vmem:[#allocation2 + $0x208] sm:$0xff]  ;;  %v1054_v31 = vmul.f32 %v5920_v34, %v6913_v49 }
 0x528   : > { %2482 = vst.msk [vmem:[#allocation2 + $0x240] sm:$0xff] %vm2409_vm0, %v2381_v9  ;;  %v3037_v12 = vld [vmem:[#allocation2 + $0x1e0] sm:$0xff]  ;;  %v2974_v46 = vsel %vm2409_vm0, %v2950_v13, %v3666_v20  ;;  %v452_v7 = vld [vmem:[%s6449_s1 + $0x188] sm:$0xff] }
 0x529   : > { %3703 = vrot.lane.b32.xlu2 %v3702_v51, %s3892_s25  ;;  %v6914_v9 = vld [vmem:[#allocation63_spill] sm:$0xff] }
 0x52a   : > { %2081 = vperm.xlu1 %3625, %v3821_v37   ;;  %v1664_v38 = vmul.f32 %v5933_v42, %v6914_v9  ;;  %v1656_v37 = vmul.f32 %v5933_v42, %v6915_v39  ;;  %v6920_v9 = vld [vmem:[#allocation109_spill] sm:$0xff] }
 0x52b   : > { %v2046_v43 = vpop.permute.xlu1 %2045  ;;  %v471_v39 = vld [vmem:[%s6449_s1 + $0x220] sm:$0xff] }
 0x52c   : > { %v2268_v27 = vmul.f32 %v5946_v35, %v2046_v43 }
 0x52e   : > { %v2368_v41 = vadd.f32 %v2268_v27, %v1766_v4  ;;  %v1162_v4 = vadd.f32 %v1062_v59, %v460_v11  ;;  %v1154_v27 = vadd.f32 %v1054_v31, %v452_v7  ;;  %v3316_v11 = vld [vmem:[%s6453_s5 + $0x60] sm:$0xff] }
 0x52f   : > { %v2977_v57 = vld [vmem:[#allocation2 + $0x240] sm:$0xff] }
 0x530   : > { %2469 = vst.msk [vmem:[#allocation2 + $0x1d8] sm:$0xff] %vm2409_vm0, %v2368_v41  ;;  %v3332_v7 = vld [vmem:[%s6453_s5 + $0xe0] sm:$0xff] }
 0x531   : > { %2037 = vperm.xlu2 %3626, %v3822_v62   ;;  %v1764_v62 = vadd.f32 %v1664_v38, %v1162_v4  ;;  %v1073_v38 = vmul.f32 %v5920_v34, %v6920_v9 }
 0x532   : > { %3045 = vrot.lane.b32.xlu1 %v3037_v12, %s3891_s17 }
 0x537   : > { %v3036_v1 = vld [vmem:[#allocation2 + $0x1d8] sm:$0xff] }
 0x539   : > { %3713 = vrot.lane.b32.xlu2 %v3712_v23, %s3891_s17  ;;  %v1756_v23 = vadd.f32 %v1656_v37, %v1154_v27 }
 0x53a   : > { %2065 = vperm.xlu1 %3625, %v3823_v33  }
 0x573   : > { %v3669_v6 = vpop.permute.xlu0 %3668 }
 0x574   : > { %v3671_v15 = vunpack.i.h.bf16 %v3669_v6  ;;  %v3670_v29 = vunpack.i.l.bf16 %v3669_v6 }
 0x575   : > { %v6146_v50 = vpop.f32.mrf.mxu1  ;;  %v6152_v58 = vpop.permute.xlu2 %3693 }
 0x576   : > { %v3099_v48 = vsel %vm2558_vm1, %v5981_v28, %v3670_v29  ;;  %v3130_v60 = vsel %vm2558_vm1, %v2974_v46, %v3671_v15  ;;  %v2918_v28 = vpop.f32.mrf.mxu2  ;;  %v3695_v12 = vunpack.i.l.bf16 %v6152_v58  ;;  %v6916_v46 = vld [vmem:[#allocation90_spill] sm:$0xff] }
 0x577   : > { %3211 = vmatmul.f32.gmra.mxu1 %v3099_v48  ;;  %3232 = vmatmul.f32.vlgmr.msra.gmra.mxu3 %v3130_v60  ;;  %v1061_v48 = vmul.f32 %v5920_v34, %v6916_v46  ;;  %v2900_v60 = vpop.f32.mrf.mxu0 }
 0x57b   : > { %v3679_v55 = vpop.permute.xlu0 %3678 }
 0x57c   : > { %v3680_v10 = vunpack.i.l.bf16 %v3679_v55  ;;  %v3674_v16 = vpop.permute.xlu1 %3673  ;;  %v3681_v5 = vunpack.i.h.bf16 %v3679_v55  ;;  %v3696_v55 = vunpack.i.h.bf16 %v6152_v58 }
 0x57d   : > { %v3676_v0 = vunpack.i.h.bf16 %v3674_v16  ;;  %v3675_v52 = vunpack.i.l.bf16 %v3674_v16  ;;  %v6154_v47 = vpop.f32.mrf.mxu1  ;;  %v3005_v16 = vld [vmem:[#allocation2 + $0x180] sm:$0xff] }
 0x57e   : > { %v3100_v3 = vsel %vm2558_vm1, %v5996_v26, %v3680_v10 }
 0x57f   : > { %v3059_v53 = vsel %vm2409_vm0, %v3035_v2, %v3675_v52  ;;  %3214 = vmatmul.f32.gmra.mxu1 %v3100_v3  ;;  %v3001_v61 = vsel %vm2409_vm0, %v2977_v57, %v3676_v0  ;;  %v459_v0 = vld [vmem:[%s6449_s1 + $0x1c0] sm:$0xff]  ;;  %v469_v52 = vld [vmem:[%s6449_s1 + $0x210] sm:$0xff]  ;;  %v3110_v3 = vsel %vm2558_vm1, %v2900_v60, %v3695_v12 }
 0x580   : > { %v3707_v24 = vpack.i.bf16 %v3059_v53, %v2918_v28  ;;  %v3139_v54 = vsel %vm2558_vm1, %v3001_v61, %v3681_v5  ;;  %v6917_v5 = vld [vmem:[#allocation120_spill] sm:$0xff] }
 0x581   : > { %3235 = vmatmul.f32.gmra.mxu3 %v3139_v54  ;;  %v1071_v2 = vmul.f32 %v5920_v34, %v6917_v5  ;;  %v6918_v57 = vld [vmem:[#allocation88_spill] sm:$0xff]  ;;  %v6923_v5 = vld [vmem:[#allocation105_spill] sm:$0xff] }
 0x582   : > { %3708 = vrot.lane.b32.xlu0 %v3707_v24, %s3892_s25  ;;  %v1663_v28 = vmul.f32 %v5933_v42, %v6918_v57  ;;  %v3319_v61 = vld [vmem:[%s6453_s5 + $0x78] sm:$0xff]  ;;  %v3318_v24 = vld [vmem:[%s6453_s5 + $0x70] sm:$0xff] }
 0x583   : > { %v6162_v45 = vpop.permute.xlu2 %3703  ;;  %v3335_v54 = vld [vmem:[%s6453_s5 + $0xf8] sm:$0xff]  ;;  %3336 = vmatpush.msrb.mxu2 %v3319_v61  ;;  %v1171_v8 = vadd.f32 %v1071_v2, %v469_v52  ;;  %v1671_v2 = vmul.f32 %v5933_v42, %v6923_v5  ;;  %v3329_v61 = vld [vmem:[%s6453_s5 + $0xc8] sm:$0xff] }
 0x584   : > { %v3684_v32 = vpop.permute.xlu1 %3683  ;;  %3368 = vmatpush.msrb.mxu3 %v3335_v54  ;;  %v3705_v59 = vunpack.i.l.bf16 %v6162_v45  ;;  %v3706_v37 = vunpack.i.h.bf16 %v6162_v45  ;;  %v3331_v45 = vld [vmem:[%s6453_s5 + $0xd8] sm:$0xff] }
 0x585   : > { %v3686_v30 = vunpack.i.h.bf16 %v3684_v32  ;;  %v3685_v18 = vunpack.i.l.bf16 %v3684_v32  ;;  %v3200_v44 = vpop.f32.mrf.mxu1  ;;  %v3689_v26 = vpop.permute.xlu0 %3688  ;;  %v6919_v32 = vld [vmem:[#allocation81_spill] sm:$0xff]  ;;  %3337 = vmatpush.msrb.mxu2 %v3318_v24  ;;  %v3310_v24 = vld [vmem:[%s6453_s5 + $0x30] sm:$0xff] }
 0x586   : > { %v3691_v63 = vunpack.i.h.bf16 %v3689_v26  ;;  %v3690_v36 = vunpack.i.l.bf16 %v3689_v26  ;;  %v3317_v26 = vld [vmem:[%s6453_s5 + $0x68] sm:$0xff]  ;;  %v3119_v4 = vsel %vm2558_vm1, %v6084_v17, %v3705_v59  ;;  %v3327_v54 = vld [vmem:[%s6453_s5 + $0xb8] sm:$0xff]  ;;  %v3306_v59 = vld [vmem:[%s6453_s5 + $0x10] sm:$0xff] }
 0x587   : > { %v3002_v14 = vsel %vm2409_vm0, %v2978_v40, %v3686_v30  ;;  %v3060_v43 = vsel %vm2409_vm0, %v3036_v1, %v3685_v18  ;;  %v1673_v30 = vmul.f32 %v5933_v42, %v6919_v32  ;;  %v3334_v18 = vld [vmem:[%s6453_s5 + $0xf0] sm:$0xff]  ;;  %3338 = vmatpush.msrb.mxu2 %v3317_v26  ;;  %v3315_v1 = vld [vmem:[%s6453_s5 + $0x58] sm:$0xff]  ;;  %v3309_v32 = vld [vmem:[%s6453_s5 + $0x28] sm:$0xff] }
 0x588   : > { %v3109_v51 = vsel %vm2558_vm1, %v2897_v19, %v3690_v36  ;;  %v3140_v56 = vsel %vm2558_vm1, %v3002_v14, %v3691_v63  ;;  %v3333_v36 = vld [vmem:[%s6453_s5 + $0xe8] sm:$0xff]  ;;  %3369 = vmatpush.msrb.mxu3 %v3334_v18  ;;  %v3308_v18 = vld [vmem:[%s6453_s5 + $0x20] sm:$0xff]  ;;  %v3307_v26 = vld [vmem:[%s6453_s5 + $0x18] sm:$0xff] }
 0x589   : > { %3217 = vmatmul.f32.gmra.mxu1 %v3109_v51  ;;  %3238 = vmatmul.f32.gmra.mxu3 %v3140_v56  ;;  %v1773_v19 = vadd.f32 %v1673_v30, %v1171_v8  ;;  %v3326_v30 = vld [vmem:[%s6453_s5 + $0xb0] sm:$0xff]  ;;  %v3324_v8 = vld [vmem:[%s6453_s5 + $0xa0] sm:$0xff] }
 0x58a   : > { %3155 = vrot.lane.b32.xlu0 %v3060_v43, %s3892_s25  ;;  %3370 = vmatpush.msrb.mxu3 %v3333_v36 }
 0x58b   : > { %v2038_v41 = vpop.permute.xlu2 %2037  ;;  %3339 = vmatpush.msrb.mxu2 %v3316_v11  ;;  %v3321_v11 = vld [vmem:[%s6453_s5 + $0x88] sm:$0xff] }
 0x58c   : > { %v2266_v21 = vmul.f32 %v5946_v35, %v2038_v41  ;;  %v2006_v25 = vpop.permute.xlu1 %2005  ;;  %v6921_v41 = vld [vmem:[#allocation149_spill] sm:$0xff]  ;;  %3371 = vmatpush.msrb.mxu3 %v3332_v7 }
 0x58d   : > { %v2258_v33 = vmul.f32 %v5946_v35, %v2006_v25  ;;  %v3203_v13 = vpop.f32.mrf.mxu1  ;;  %v3699_v20 = vpop.permute.xlu0 %3698  ;;  %3340 = vmatpush.msrb.mxu2 %v3315_v1  ;;  %v1173_v25 = vadd.f32 %v1073_v38, %v471_v39 }
 0x58e   : > { %v2366_v6 = vadd.f32 %v2266_v21, %v1764_v62  ;;  %v3717_v15 = vpack.i.bf16 %v3203_v13, %v3200_v44  ;;  %v3700_v29 = vunpack.i.l.bf16 %v3699_v20  ;;  %v1161_v44 = vadd.f32 %v1061_v48, %v459_v0  ;;  %v3314_v21 = vld [vmem:[%s6453_s5 + $0x50] sm:$0xff]  ;;  %3372 = vmatpush.msrb.mxu3 %v3331_v45  ;;  %v467_v0 = vld [vmem:[%s6449_s1 + $0x200] sm:$0xff] }
 0x58f   : > { %v2358_v10 = vadd.f32 %v2258_v33, %v1756_v23  ;;  %v3701_v51 = vunpack.i.h.bf16 %v3699_v20  ;;  %v1675_v62 = vmul.f32 %v5933_v42, %v6921_v41  ;;  %v3313_v23 = vld [vmem:[%s6453_s5 + $0x48] sm:$0xff]  ;;  %v3330_v33 = vld [vmem:[%s6453_s5 + $0xd0] sm:$0xff]  ;;  %3341 = vmatpush.msrb.mxu2 %v3314_v21  ;;  %v3311_v42 = vld [vmem:[%s6453_s5 + $0x38] sm:$0xff] }
 0x590   : > { %2467 = vst.msk [vmem:[#allocation2 + $0x1c8] sm:$0xff] %vm2409_vm0, %v2366_v6  ;;  %3718 = vrot.lane.b32.xlu1 %v3717_v15, %s3892_s25  ;;  %v3029_v58 = vsel %vm2409_vm0, %v3005_v16, %v3700_v29  ;;  %v1763_v40 = vadd.f32 %v1663_v28, %v1161_v44  ;;  %3373 = vmatpush.msrb.mxu3 %v3330_v33  ;;  %v3325_v44 = vld [vmem:[%s6453_s5 + $0xa8] sm:$0xff] }
 0x591   : > { %2459 = vst.msk [vmem:[#allocation2 + $0x188] sm:$0xff] %vm2409_vm0, %v2358_v10  ;;  %3220 = vmatmul.f32.gmra.mxu1 %v3110_v3  ;;  %v3149_v53 = vsel %vm2558_vm1, %v3029_v58, %v3696_v55  ;;  %v1775_v20 = vadd.f32 %v1675_v62, %v1173_v25  ;;  %3342 = vmatpush.msrb.mxu2 %v3313_v23  ;;  %v6922_v10 = vld [vmem:[#allocation116_spill] sm:$0xff] }
 0x592   : > { %3241 = vmatmul.f32.gmra.mxu3 %v3149_v53  ;;  %v1069_v16 = vmul.f32 %v5920_v34, %v6922_v10  ;;  %v3312_v34 = vld [vmem:[%s6453_s5 + $0x40] sm:$0xff] }
 0x593   : > { %v6263_v6 = vpop.permute.xlu2 %3713  ;;  %3343 = vmatpush.msrb.mxu2 %v3312_v34  ;;  %3374 = vmatpush.msrb.mxu3 %v3329_v61  ;;  %v3426_v61 = vld [vmem:[%s6454_s6 + $0x78] sm:$0xff] }
 0x594   : > { %v2034_v63 = vpop.permute.xlu1 %2033  ;;  %v3715_v46 = vunpack.i.l.bf16 %v6263_v6  ;;  %v1169_v3 = vadd.f32 %v1069_v16, %v467_v0 }
 0x595   : > { %v2265_v49 = vmul.f32 %v5946_v35, %v2034_v63  ;;  %v2074_v31 = vpop.permute.xlu0 %2073  ;;  %3344 = vmatpush.msrb.mxu2 %v3311_v42  ;;  %v3323_v63 = vld [vmem:[%s6453_s5 + $0x98] sm:$0xff]  ;;  %v3206_v36 = vpop.f32.mrf.mxu1  ;;  %v3425_v42 = vld [vmem:[%s6454_s6 + $0x70] sm:$0xff] }
 0x596   : > { %v2275_v14 = vmul.f32 %v5946_v35, %v2074_v31  ;;  %v1771_v57 = vadd.f32 %v1671_v2, %v1169_v3  ;;  %v3304_v31 = vld [vmem:[%s6453_s5] sm:$0xff] }
 0x597   : > { %v2365_v56 = vadd.f32 %v2265_v49, %v1763_v40  ;;  %3345 = vmatpush.msrb.mxu2 %v3310_v24  ;;  %v3305_v40 = vld [vmem:[%s6453_s5 + $0x8] sm:$0xff]  ;;  %v3322_v49 = vld [vmem:[%s6453_s5 + $0x90] sm:$0xff] }
 0x598   : > { %v2375_v43 = vadd.f32 %v2275_v14, %v1773_v19  ;;  %v3006_v27 = vld [vmem:[#allocation2 + $0x188] sm:$0xff]  ;;  %v3320_v19 = vld [vmem:[%s6453_s5 + $0x80] sm:$0xff] }
 0x599   : > { %2466 = vst.msk [vmem:[#allocation2 + $0x1c0] sm:$0xff] %vm2409_vm0, %v2365_v56  ;;  %3223 = vmatmul.f32.gmra.mxu1 %v3119_v4  ;;  %v3030_v12 = vsel %vm2409_vm0, %v3006_v27, %v3701_v51  ;;  %3346 = vmatpush.msrb.mxu2 %v3309_v32  ;;  %v3034_v4 = vld [vmem:[#allocation2 + $0x1c8] sm:$0xff]  ;;  %v3716_v27 = vunpack.i.h.bf16 %v6263_v6 }
 0x59a   : > { %2476 = vst.msk [vmem:[#allocation2 + $0x210] sm:$0xff] %vm2409_vm0, %v2375_v43  ;;  %v3150_v17 = vsel %vm2558_vm1, %v3030_v12, %v3706_v37 }
 0x59b   : > { %3244 = vmatmul.f32.gmra.mxu3 %v3150_v17  ;;  %3347 = vmatpush.msrb.mxu2 %v3308_v18  ;;  %v3058_v21 = vsel %vm2409_vm0, %v3034_v4, %v3716_v27  ;;  %v3416_v27 = vld [vmem:[%s6454_s6 + $0x28] sm:$0xff] }
 0x59c   : > { %v2082_v13 = vpop.permute.xlu1 %2081 }
 0x59d   : > { %v2277_v15 = vmul.f32 %v5946_v35, %v2082_v13  ;;  %3348 = vmatpush.msrb.mxu2 %v3307_v26  ;;  %v3209_v14 = vpop.f32.mrf.mxu1 }
 0x59f   : > { %v2377_v29 = vadd.f32 %v2277_v15, %v1775_v20  ;;  %3349 = vmatpush.msrb.mxu2 %v3306_v59 }
 0x5a0   : > { %v3033_v38 = vld [vmem:[#allocation2 + $0x1c0] sm:$0xff] }
 0x5a1   : > { %2478 = vst.msk [vmem:[#allocation2 + $0x220] sm:$0xff] %vm2409_vm0, %v2377_v29  ;;  %v2951_v48 = vld [vmem:[#allocation2 + $0x210] sm:$0xff]  ;;  %3350 = vmatpush.msrb.mxu2 %v3305_v40 }
 0x5a2   : > { %v2975_v60 = vsel %vm2409_vm0, %v2951_v48, %v3715_v46 }
 0x5a3   : > { %3123 = vrot.lane.b32.xlu0 %v2975_v60, %s3892_s25  ;;  %3351 = vmatpush.msrb.mxu2 %v3304_v31 }
 0x5a4   : > { %v3046_v55 = vpop.permute.xlu1 %3045 }
 0x5a5   : > { %v3057_v1 = vsel %vm2409_vm0, %v3033_v38, %v3046_v55  ;;  %3428 = vmatpush.msra.mxu2 %v3426_v61  ;;  %v3420_v38 = vld [vmem:[%s6454_s6 + $0x48] sm:$0xff] }
 0x5a7   : > { %3429 = vmatpush.msra.mxu2 %v3425_v42 }
 0x5a8   : > { %v2953_v52 = vld [vmem:[#allocation2 + $0x220] sm:$0xff] }
 0x5a9   : > { %2961 = vrot.lane.b32.xlu2 %v2953_v52, %s3891_s17 }
 0x5ac   : > { %v2066_v58 = vpop.permute.xlu1 %2065 }
 0x5ad   : > { %v2273_v28 = vmul.f32 %v5946_v35, %v2066_v58  ;;  %v3328_v35 = vld [vmem:[%s6453_s5 + $0xc0] sm:$0xff] }
 0x5ae   : > { %3375 = vmatpush.msrb.mxu3 %v3328_v35 }
 0x5af   : > { %v2373_v53 = vadd.f32 %v2273_v28, %v1771_v57 }
 0x5b0   : > { %3376 = vmatpush.msrb.mxu3 %v3327_v54 }
 0x5b1   : > { %2474 = vst.msk [vmem:[#allocation2 + $0x200] sm:$0xff] %vm2409_vm0, %v2373_v53 }
 0x5b2   : > { %3377 = vmatpush.msrb.mxu3 %v3326_v30 }
 0x5b4   : > { %3378 = vmatpush.msrb.mxu3 %v3325_v44 }
 0x5b6   : > { %3379 = vmatpush.msrb.mxu3 %v3324_v8 }
 0x5b8   : > { %3380 = vmatpush.msrb.mxu3 %v3323_v63  ;;  %v2949_v29 = vld [vmem:[#allocation2 + $0x200] sm:$0xff] }
 0x5ba   : > { %3381 = vmatpush.msrb.mxu3 %v3322_v49 }
 0x5bc   : > { %3382 = vmatpush.msrb.mxu3 %v3321_v11 }
 0x5be   : > { %3383 = vmatpush.msrb.mxu3 %v3320_v19  ;;  %v3424_v19 = vld [vmem:[%s6454_s6 + $0x68] sm:$0xff] }
 0x5bf   : > { %3430 = vmatpush.msra.mxu2 %v3424_v19 }
 0x5f4   : > { %v3709_v7 = vpop.permute.xlu0 %3708  ;;  %v3212_v9 = vpop.f32.mrf.mxu1 }
 0x5f5   : > { %v3711_v51 = vunpack.i.h.bf16 %v3709_v7  ;;  %v3710_v56 = vunpack.i.l.bf16 %v3709_v7  ;;  %v3422_v7 = vld [vmem:[%s6454_s6 + $0x58] sm:$0xff] }
 0x5f7   : > { %v3120_v39 = vsel %vm2558_vm1, %v6111_v22, %v3710_v56  ;;  %v3159_v37 = vsel %vm2558_vm1, %v3057_v1, %v3711_v51  ;;  %v3419_v51 = vld [vmem:[%s6454_s6 + $0x40] sm:$0xff]  ;;  %v3418_v56 = vld [vmem:[%s6454_s6 + $0x38] sm:$0xff] }
 0x5f8   : > { %3226 = vmatmul.f32.gmra.mxu1 %v3120_v39  ;;  %3247 = vmatmul.f32.gmra.mxu3 %v3159_v37  ;;  %v3417_v37 = vld [vmem:[%s6454_s6 + $0x30] sm:$0xff] }
 0x5fa   : > { %v6341_v43 = vpop.f32.mrf.mxu3 }
 0x5fc   : > { %v3156_v41 = vpop.permute.xlu0 %3155  ;;  %v3215_v62 = vpop.f32.mrf.mxu1 }
 0x5fd   : > { %v3722_v12 = vpack.i.bf16 %v3215_v62, %v3212_v9  ;;  %v3160_v45 = vsel %vm2558_vm1, %v3058_v21, %v3156_v41  ;;  %v3421_v9 = vld [vmem:[%s6454_s6 + $0x50] sm:$0xff]  ;;  %v3415_v41 = vld [vmem:[%s6454_s6 + $0x20] sm:$0xff]  ;;  %v3414_v62 = vld [vmem:[%s6454_s6 + $0x18] sm:$0xff] }
 0x5fe   : > { %v3412_v21 = vld [vmem:[%s6454_s6 + $0x8] sm:$0xff] }
 0x5ff   : > { %3723 = vrot.lane.b32.xlu2 %v3722_v12, %s3892_s25  ;;  %v3413_v12 = vld [vmem:[%s6454_s6 + $0x10] sm:$0xff] }
 0x600   : > { %3250 = vmatmul.f32.gmra.mxu3 %v3160_v45 }
 0x602   : > { %v3719_v22 = vpop.permute.xlu1 %3718 }
 0x603   : > { %v3721_v17 = vunpack.i.h.bf16 %v3719_v22  ;;  %v3720_v25 = vunpack.i.l.bf16 %v3719_v22  ;;  %v2962_v15 = vpop.permute.xlu2 %2961 }
 0x604   : > { %v3236_v23 = vpop.f32.mrf.mxu3  ;;  %v2973_v46 = vsel %vm2409_vm0, %v2949_v29, %v2962_v15 }
 0x605   : > { %v3262_v33 = vsel %vm2558_vm1, %v6146_v50, %v3720_v25  ;;  %v3263_v13 = vsel %vm2558_vm1, %v6154_v47, %v3721_v17  ;;  %v3411_v17 = vld [vmem:[%s6454_s6] sm:$0xff] }
 0x606   : > { %3352 = vmatmul.f32.vlgmr.msrb.gmra.mxu2 %v3262_v33  ;;  %v3218_v55 = vpop.f32.mrf.mxu1 }
 0x608   : > { %3384 = vmatmul.f32.vlgmr.msrb.gmra.mxu3 %v3263_v13 }
 0x60c   : > { %v3239_v20 = vpop.f32.mrf.mxu3 }
 0x60d   : > { %v3732_v6 = vpack.i.bf16 %v3239_v20, %v3236_v23 }
 0x60e   : > { %v3221_v52 = vpop.f32.mrf.mxu1 }
 0x60f   : > { %3733 = vrot.lane.b32.xlu1 %v3732_v6, %s3892_s25 }
 0x615   : > { %v3124_v48 = vpop.permute.xlu0 %3123  ;;  %v3242_v5 = vpop.f32.mrf.mxu3 }
 0x616   : > { %v3129_v60 = vsel %vm2558_vm1, %v2973_v46, %v3124_v48  ;;  %v3224_v2 = vpop.f32.mrf.mxu1 }
 0x617   : > { %3229 = vmatmul.f32.gmra.mxu1 %v3129_v60 }
 0x61e   : > { %v3245_v3 = vpop.f32.mrf.mxu3 }
 0x659   : > { %v3724_v10 = vpop.permute.xlu2 %3723 }
 0x65a   : > { %v3726_v50 = vunpack.i.h.bf16 %v3724_v10  ;;  %v3725_v16 = vunpack.i.l.bf16 %v3724_v10 }
 0x65c   : > { %v3272_v0 = vsel %vm2558_vm1, %v3206_v36, %v3725_v16  ;;  %v3273_v47 = vsel %vm2558_vm1, %v3209_v14, %v3726_v50  ;;  %v3423_v14 = vld [vmem:[%s6454_s6 + $0x60] sm:$0xff] }
 0x65d   : > { %3355 = vmatmul.f32.gmra.mxu2 %v3272_v0  ;;  %3387 = vmatmul.f32.gmra.mxu3 %v3273_v47 }
 0x65e   : > { %3431 = vmatpush.msra.mxu2 %v3423_v14 }
 0x660   : > { %3432 = vmatpush.msra.mxu2 %v3422_v7 }
 0x662   : > { %3433 = vmatpush.msra.mxu2 %v3421_v9 }
 0x664   : > { %3434 = vmatpush.msra.mxu2 %v3420_v38 }
 0x666   : > { %3435 = vmatpush.msra.mxu2 %v3419_v51 }
 0x668   : > { %3436 = vmatpush.msra.mxu2 %v3418_v56 }
 0x66a   : > { %3437 = vmatpush.msra.mxu2 %v3417_v37 }
 0x66c   : > { %3438 = vmatpush.msra.mxu2 %v3416_v27 }
 0x66e   : > { %3439 = vmatpush.msra.mxu2 %v3415_v41 }
 0x670   : > { %3440 = vmatpush.msra.mxu2 %v3414_v62 }
 0x672   : > { %3441 = vmatpush.msra.mxu2 %v3413_v12 }
 0x674   : > { %3442 = vmatpush.msra.mxu2 %v3412_v21 }
 0x675   : > { %v3227_v58 = vpop.f32.mrf.mxu1 }
 0x676   : > { %v3727_v57 = vpack.i.bf16 %v3227_v58, %v3224_v2  ;;  %3443 = vmatpush.msra.mxu2 %v3411_v17 }
 0x678   : > { %3728 = vrot.lane.b32.xlu0 %v3727_v57, %s3892_s25 }
 0x67b   : > { %v3248_v28 = vpop.f32.mrf.mxu3 }
 0x681   : > { %v3734_v18 = vpop.permute.xlu1 %3733 }
 0x682   : > { %v3736_v44 = vunpack.i.h.bf16 %v3734_v18  ;;  %v3735_v8 = vunpack.i.l.bf16 %v3734_v18 }
 0x683   : > { %v3251_v53 = vpop.f32.mrf.mxu3 }
 0x684   : > { %v3737_v34 = vpack.i.bf16 %v3251_v53, %v3248_v28  ;;  %v3293_v63 = vsel %vm2558_vm1, %v6341_v43, %v3736_v44 }
 0x686   : > { %3738 = vrot.lane.b32.xlu2 %v3737_v34, %s3892_s25  ;;  %s3840_s25 = scalar_lea.hbm %s3839_s19, 1 }
 0x687   : > { %p3841_p11 = scmp.ne.s32.totalorder %s3839_s19, %s3840_s25  ;;  %p3846_p1 = scmp.lt.s32.totalorder %s3844_s20, %s3840_s25 }
 0x689   : > { %v3353_v1 = vpop.f32.mrf.mxu2  ;;  %p3842_p12 = pnand %p3841_p11, %p3976_p5  ;;  %p3847_p2 = por %p3846_p1, %p3845_p0 }
 0x68b   : > { %v3385_v39 = vpop.f32.mrf.mxu3  ;;  %p3843_p13 = pneg %p3842_p12 }
 0x68c   : > { %v3386_v13 = vadd.f32 %v3385_v39, %v3353_v1 }
 0x68d   : > { %p3848_p3 = pnand %p3847_p2, %p3843_p13 }
 0x694   : > { %v3230_v26 = vpop.f32.mrf.mxu1 }
 0x695   : > { %v3292_v59 = vsel %vm2558_vm1, %v3230_v26, %v3735_v8 }
 0x6e0   : > { %v3739_v36 = vpop.permute.xlu2 %3738  ;;  %v3356_v43 = vpop.f32.mrf.mxu2 }
 0x6e1   : > { %v3741_v40 = vunpack.i.h.bf16 %v3739_v36  ;;  %v3740_v49 = vunpack.i.l.bf16 %v3739_v36  ;;  %v3388_v4 = vpop.f32.mrf.mxu3 }
 0x6e2   : > { %v3389_v33 = vadd.f32 %v3388_v4, %v3356_v43 }
 0x6e3   : > { %v3302_v31 = vsel %vm2558_vm1, %v3242_v5, %v3740_v49  ;;  %v3303_v11 = vsel %vm2558_vm1, %v3245_v3, %v3741_v40  ;;  %v3427_v3 = vld [vmem:[%s6455_s7] sm:$0x1] }
 0x6e4   : > { %v3400_v6 = vadd.f32 %v3389_v33, %v3386_v13 }
 0x6ea   : > { %v3729_v35 = vpop.permute.xlu0 %3728 }
 0x6eb   : > { %v3731_v24 = vunpack.i.h.bf16 %v3729_v35  ;;  %v3730_v54 = vunpack.i.l.bf16 %v3729_v35 }
 0x6ed   : > { %v3282_v32 = vsel %vm2558_vm1, %v3218_v55, %v3730_v54  ;;  %v3283_v30 = vsel %vm2558_vm1, %v3221_v52, %v3731_v24 }
 0x6ee   : > { %3358 = vmatmul.f32.gmra.mxu2 %v3282_v32  ;;  %3390 = vmatmul.f32.gmra.mxu3 %v3283_v30 }
 0x6f6   : > { %3361 = vmatmul.f32.gmra.mxu2 %v3292_v59  ;;  %3393 = vmatmul.f32.gmra.mxu3 %v3293_v63 }
 0x6fe   : > { %3364 = vmatmul.f32.gmra.mxu2 %v3302_v31  ;;  %3396 = vmatmul.f32.gmra.mxu3 %v3303_v11 }
 0x771   : > { %v3359_v45 = vpop.f32.mrf.mxu2  ;;  %v3391_v22 = vpop.f32.mrf.mxu3 }
 0x772   : > { %v3392_v20 = vadd.f32 %v3391_v22, %v3359_v45 }
 0x774   : > { %v3401_v29 = vadd.f32 %v3400_v6, %v3392_v20 }
 0x779   : > { %v3362_v25 = vpop.f32.mrf.mxu2  ;;  %v3394_v23 = vpop.f32.mrf.mxu3 }
 0x77a   : > { %v3395_v15 = vadd.f32 %v3394_v23, %v3362_v25 }
 0x77c   : > { %v3402_v60 = vadd.f32 %v3401_v29, %v3395_v15 }
 0x781   : > { %v3365_v46 = vpop.f32.mrf.mxu2  ;;  %v3397_v48 = vpop.f32.mrf.mxu3 }
 0x782   : > { %v3398_v55 = vadd.f32 %v3397_v48, %v3365_v46 }
 0x784   : > { %v3403_v10 = vadd.f32 %v3402_v60, %v3398_v55 }
 0x786   : > { %v3404_v50 = vrot.slane %v3403_v10, 4 }
 0x788   : > { %v3405_v16 = vadd.f32 %v3404_v50, %v3403_v10 }
 0x78a   : > { %v3406_v0 = vrot.slane %v3405_v16, 2 }
 0x78c   : > { %v3407_v47 = vadd.f32 %v3406_v0, %v3405_v16 }
 0x78e   : > { %v3408_v52 = vrot.slane %v3407_v47, 1 }
 0x790   : > { %v3409_v5 = vadd.f32 %v3408_v52, %v3407_v47 }
 0x792   : > { %v3410_v2 = vmul.f32 0.025, %v3409_v5 }
 0x794   : > { %3444 = vmatmul.f32.vlgmr.msra.gmra.mxu2 %v3410_v2 }
 0x817   : > { %v3445_v58 = vpop.f32.mrf.mxu2 }
 0x818   : > { %v3446_v57 = vadd.f32 %v3445_v58, %v3427_v3 }
 0x81a   : > { %3449 = vst.msk [vmem:[%s297_s10] sm:$0x1] %vm3448_vm3, %v3446_v57 }
 0x81b   : > { %3851 = shalt.err (!%p3848_p3)
}
 0x81c   : > { %3574 = dma.vmem_to_hbm [thread:$0]  (%p3976_p5), %s3462_s12, 16, %s3464_s13, %s3451_s18  }
 0x81d PF: > { %p3580_p4 = scmp.ge.s32.totalorder %s3886_s30, 2  ;;  %s3475_s21 = sand.u32 1, %s3874_s27  }
 0x81e   : > { %s3476_s24 = scalar_lea.sflag [#allocation4], %s3475_s21 }
 0x81f   : > { %p3577_p7 = pnand %p3580_p4, %p3980_p6 }
 0x821   : > { %p3578_p8 = pneg %p3577_p7 }
 0x823   : > { %3869 = dma.done.wait (%p3578_p8), %s3476_s24, 16  }
 0x824   : > { %3871 = vsyncadd (%p3578_p8), %s3476_s24, 4294967280  ;;  %p18_p9 = scmp.ge.s32.totalorder %s3963_s11, 4   ;;  %s6924_s27 = smov %s3878_s28 }
 0x825   : > { %s6925_s28 = smov %s3882_s29  ;;  %s6926_s29 = smov %s3974_s14 }
 0x826   : > { %s6927_s30 = smov %s3963_s11  ;;  %20 = sbr.rel (!%p18_p9) target bundleno = 3 (0x3), region = 87 }
 0x82b   :  { %3481 = vsyncpa [#allocation4], 1 }
 0x82c   :  { %3483 = vsyncpa [#allocation4 + $0x1], 1 }

</bundles_post_ra>
